<compile_context>
chip_gen: v7x
topology: tpu7x:2x2x1
jax: 0.10.0
libtpu: 0.0.40
codegen_flags: <defaults>
</compile_context>

<pallas_src>
import functools

import jax
import jax.numpy as jnp
from jax import lax
from jax.experimental import pallas as pl
from jax.experimental.pallas import tpu as pltpu


def _round_up(x, m):
    return ((x + m - 1) // m) * m


# ----------------------------------------------------------------------------
# Fused encoder kernel (no grid — single invocation, everything in VMEM).
#   x_ref      : (T*B, Dp)      time-major rows, features zero-padded to Dp
#   layers_ref : (L, Rl, 3*Hp)  per-layer packed slab:
#                  rows [0, Kp)      wih^T  (each gate in its own 128-lane block)
#                  rows [Kp, Kp+Hp)  whh^T
#                  row   Kp+Hp       b_gi  (= b_ih with b_hr/b_hz folded in)
#                  row   Kp+Hp+8     b_hn  (columns [0, Hp))
#   head_ref   : (Hp+8, Op)     rows [0, Hp) = wo^T, row Hp = bo
#   out_ref    : (B, Op)
# ----------------------------------------------------------------------------
def _encoder_kernel(x_ref, layers_ref, head_ref, out_ref, *,
                    num_layers, T, B, Dp, Hp, Kp):
    seq2d = x_ref[...]                                        # (T*B, Dp)
    h = None
    bias_row = Kp + Hp
    for l in range(num_layers):
        k_in = Dp if l == 0 else Hp
        wih = layers_ref[l, 0:k_in, :]                        # (k_in, 3Hp)
        whh = layers_ref[l, Kp:Kp + Hp, :]                    # (Hp, 3Hp)
        b_gi = layers_ref[l, bias_row:bias_row + 1, :]        # (1, 3Hp)
        # Hoisted per-layer broadcast (JAX does not CSE broadcast_in_dim).
        b_hn = jnp.broadcast_to(
            layers_ref[l, bias_row + 8:bias_row + 9, 0:Hp], (B, Hp))

        # Hoisted input projection: one MXU GEMM for all timesteps.
        gi_all = jnp.dot(seq2d, wih,
                         preferred_element_type=jnp.float32) + b_gi  # (T*B, 3Hp)

        h = jnp.zeros((B, Hp), jnp.float32)                   # PyTorch h0 = 0
        hs = []
        last = (l == num_layers - 1)
        for t in range(T):                                    # static, unrolled
            gi = gi_all[t * B:(t + 1) * B, :]                 # sublane-aligned slice
            gh = jnp.dot(h, whh, preferred_element_type=jnp.float32)  # (B, 3Hp)
            # All slices below are whole 128-lane blocks (vreg-aligned).
            r = jax.nn.sigmoid(gi[:, 0:Hp] + gh[:, 0:Hp])
            z = jax.nn.sigmoid(gi[:, Hp:2 * Hp] + gh[:, Hp:2 * Hp])
            n = jnp.tanh(gi[:, 2 * Hp:3 * Hp] + r * (gh[:, 2 * Hp:3 * Hp] + b_hn))
            h = n + z * (h - n)                               # == (1-z)*n + z*h
            if not last:
                hs.append(h)
        if not last:
            seq2d = jnp.concatenate(hs, axis=0)               # (T*B, Hp)

    # Fused linear head on the last hidden state only.
    wo = head_ref[0:Hp, :]                                    # (Hp, Op)
    bo = head_ref[Hp:Hp + 1, :]                               # (1, Op)
    out_ref[...] = jnp.dot(h, wo, preferred_element_type=jnp.float32) + bo


# ----------------------------------------------------------------------------
# One-time parameter packing.
# gru_params: list of (w_ih (3H, D_in), w_hh (3H, H), b_ih (3H,), b_hh (3H,))
# w_o: (O, H) PyTorch convention, b_o: (O,)
# ----------------------------------------------------------------------------
def pack_encoder_params(gru_params, w_o, b_o, obs_dim):
    H = gru_params[0][1].shape[1]
    O = w_o.shape[0]
    Hp = _round_up(H, 128)
    Dp = _round_up(max(obs_dim, 1), 128)
    Kp = max(Dp, Hp)
    Rl = Kp + Hp + 16
    Op = _round_up(O, 128)

    slabs = []
    for (w_ih, w_hh, b_ih, b_hh) in gru_params:
        d_in = w_ih.shape[1]
        # Fold b_hr, b_hz into the input-projection bias; keep b_hn separate.
        b_gi = b_ih.astype(jnp.float32) + jnp.concatenate(
            [b_hh[:2 * H].astype(jnp.float32), jnp.zeros((H,), jnp.float32)])
        wih_T = jnp.transpose(w_ih).astype(jnp.float32)       # (d_in, 3H)
        whh_T = jnp.transpose(w_hh).astype(jnp.float32)       # (H, 3H)
        slab = jnp.zeros((Rl, 3 * Hp), jnp.float32)
        for g in range(3):                                    # gate g -> lanes [g*Hp, g*Hp+H)
            slab = slab.at[0:d_in, g * Hp:g * Hp + H].set(wih_T[:, g * H:(g + 1) * H])
            slab = slab.at[Kp:Kp + H, g * Hp:g * Hp + H].set(whh_T[:, g * H:(g + 1) * H])
            slab = slab.at[Kp + Hp, g * Hp:g * Hp + H].set(b_gi[g * H:(g + 1) * H])
        slab = slab.at[Kp + Hp + 8, 0:H].set(b_hh[2 * H:3 * H].astype(jnp.float32))
        slabs.append(slab)
    layers_slab = jnp.stack(slabs, axis=0)                    # (L, Rl, 3Hp)

    head_slab = jnp.zeros((Hp + 8, Op), jnp.float32)
    head_slab = head_slab.at[0:H, 0:O].set(jnp.transpose(w_o).astype(jnp.float32))
    head_slab = head_slab.at[Hp, 0:O].set(b_o.astype(jnp.float32))

    dims = dict(H=H, O=O, Hp=Hp, Dp=Dp, Kp=Kp, Op=Op, L=len(gru_params))
    return layers_slab, head_slab, dims


def make_encoder(gru_params, w_o, b_o, obs_dim):
    """Pack params once; return a jitted forward(x_btd) -> (B, 2*latent)."""
    layers_slab, head_slab, d = pack_encoder_params(gru_params, w_o, b_o, obs_dim)
    layers_slab = jax.device_put(layers_slab)
    head_slab = jax.device_put(head_slab)
    Hp, Dp, Kp, Op, O, L = d["Hp"], d["Dp"], d["Kp"], d["Op"], d["O"], d["L"]

    @jax.jit
    def forward(x_btd):
        B, T, D = x_btd.shape
        B_pad = max(8, _round_up(B, 8))                       # sublane-align batch
        x_tbd = jnp.swapaxes(x_btd, 0, 1).astype(jnp.float32) # (T, B, D) time-major
        x_tbd = jnp.pad(x_tbd, ((0, 0), (0, B_pad - B), (0, Dp - D)))
        x2d = x_tbd.reshape(T * B_pad, Dp)

        kernel = functools.partial(
            _encoder_kernel, num_layers=L, T=T, B=B_pad, Dp=Dp, Hp=Hp, Kp=Kp)
        out = pl.pallas_call(
            kernel,
            out_shape=jax.ShapeDtypeStruct((B_pad, Op), jnp.float32),
            in_specs=[pl.BlockSpec(memory_space=pltpu.MemorySpace.VMEM)] * 3,
            out_specs=pl.BlockSpec(memory_space=pltpu.MemorySpace.VMEM),
        )(x2d, layers_slab, head_slab)
        return out[:B, :O]

    return forward


# ----------------------------------------------------------------------------
# Pure-JAX reference (correctness check only)
# ----------------------------------------------------------------------------
def encoder_ref(x_btd, gru_params, w_o, b_o):
    B = x_btd.shape[0]
    seq = jnp.swapaxes(x_btd, 0, 1)                           # (T, B, D)
    for (w_ih, w_hh, b_ih, b_hh) in gru_params:
        H = w_hh.shape[1]

        def step(h, x_t):
            gi = x_t @ w_ih.T + b_ih
            gh = h @ w_hh.T + b_hh
            r = jax.nn.sigmoid(gi[:, :H] + gh[:, :H])
            z = jax.nn.sigmoid(gi[:, H:2 * H] + gh[:, H:2 * H])
            n = jnp.tanh(gi[:, 2 * H:] + r * gh[:, 2 * H:])
            h_new = (1.0 - z) * n + z * h
            return h_new, h_new

        h0 = jnp.zeros((B, H), jnp.float32)
        _, seq = lax.scan(step, h0, seq)
    return seq[-1] @ w_o.T + b_o


if __name__ == "__main__":
    # Small deterministic config consistent with the module's __init__.
    latent_dim, obs_dim, hidden_units, hidden_layers = 8, 4, 32, 2
    B, T = 2, 8

    key = jax.random.PRNGKey(0)
    k_x, key = jax.random.split(key)
    x = jax.random.normal(k_x, (B, T, obs_dim), dtype=jnp.float32)

    # PyTorch-style uniform(-1/sqrt(H), 1/sqrt(H)) init, deterministic.
    bound = 1.0 / jnp.sqrt(jnp.float32(hidden_units))
    gru_params = []
    for layer in range(hidden_layers):
        d_in = obs_dim if layer == 0 else hidden_units
        k1, k2, k3, k4, key = jax.random.split(key, 5)
        w_ih = jax.random.uniform(k1, (3 * hidden_units, d_in),
                                  minval=-bound, maxval=bound, dtype=jnp.float32)
        w_hh = jax.random.uniform(k2, (3 * hidden_units, hidden_units),
                                  minval=-bound, maxval=bound, dtype=jnp.float32)
        b_ih = jax.random.uniform(k3, (3 * hidden_units,),
                                  minval=-bound, maxval=bound, dtype=jnp.float32)
        b_hh = jax.random.uniform(k4, (3 * hidden_units,),
                                  minval=-bound, maxval=bound, dtype=jnp.float32)
        gru_params.append((w_ih, w_hh, b_ih, b_hh))

    k5, k6, key = jax.random.split(key, 3)
    w_o = jax.random.uniform(k5, (2 * latent_dim, hidden_units),
                             minval=-bound, maxval=bound, dtype=jnp.float32)
    b_o = jax.random.uniform(k6, (2 * latent_dim,),
                             minval=-bound, maxval=bound, dtype=jnp.float32)

    # One-time param packing + jitted forward.
    encoder = make_encoder(gru_params, w_o, b_o, obs_dim)

    out = encoder(x)
    out = jax.block_until_ready(out)

    ref = encoder_ref(x, gru_params, w_o, b_o)
    assert out.shape == (B, 2 * latent_dim)
    assert jnp.allclose(out, ref, atol=2e-5, rtol=1e-5), "mismatch vs reference"

    print("KERNEL_OK")
</pallas_src>

<mosaic_0001>
module attributes {stable_mosaic.version = 11 : i64} {
  func.func @_encoder_kernel(%arg0: memref<64x128xf32, #tpu.memory_space<vmem>>, %arg1: memref<2x272x384xf32, #tpu.memory_space<vmem>>, %arg2: memref<136x128xf32, #tpu.memory_space<vmem>>, %arg3: memref<8x128xf32, #tpu.memory_space<vmem>>) attributes {dimension_semantics = [], scalar_prefetch = 0 : i64, scratch_operands = 0 : i64, tpu.core_type = #tpu.core_type<tc>} {
    %c0 = arith.constant 0 : index
    %c0_0 = arith.constant 0 : index
    %0 = vector.load %arg0[%c0, %c0_0] : memref<64x128xf32, #tpu.memory_space<vmem>>, vector<64x128xf32>
    %c0_1 = arith.constant 0 : index
    %c0_2 = arith.constant 0 : index
    %c0_3 = arith.constant 0 : index
    %1 = vector.load %arg1[%c0_1, %c0_2, %c0_3] : memref<2x272x384xf32, #tpu.memory_space<vmem>>, vector<1x128x384xf32>
    %2 = vector.shape_cast %1 : vector<1x128x384xf32> to vector<128x384xf32>
    %c0_4 = arith.constant 0 : index
    %c128 = arith.constant 128 : index
    %c0_5 = arith.constant 0 : index
    %3 = vector.load %arg1[%c0_4, %c128, %c0_5] : memref<2x272x384xf32, #tpu.memory_space<vmem>>, vector<1x128x384xf32>
    %4 = vector.shape_cast %3 : vector<1x128x384xf32> to vector<128x384xf32>
    %c0_6 = arith.constant 0 : index
    %c256 = arith.constant 256 : index
    %c0_7 = arith.constant 0 : index
    %5 = vector.load %arg1[%c0_6, %c256, %c0_7] : memref<2x272x384xf32, #tpu.memory_space<vmem>>, vector<1x1x384xf32>
    %6 = vector.shape_cast %5 : vector<1x1x384xf32> to vector<1x384xf32>
    %c0_8 = arith.constant 0 : index
    %c264 = arith.constant 264 : index
    %c0_9 = arith.constant 0 : index
    %7 = vector.load %arg1[%c0_8, %c264, %c0_9] : memref<2x272x384xf32, #tpu.memory_space<vmem>>, vector<1x1x128xf32>
    %8 = vector.shape_cast %7 : vector<1x1x128xf32> to vector<1x128xf32>
    %9 = vector.shape_cast %8 : vector<1x128xf32> to vector<1x128xf32>
    %10 = vector.broadcast %9 : vector<1x128xf32> to vector<8x128xf32>
    %cst = arith.constant dense<0.000000e+00> : vector<64x384xf32>
    %11 = tpu.matmul %0, %2, %cst {dimension_numbers = #tpu.dot_dimension_numbers<[1], [0], [0], [1], [0, 0, 1, 1], [], []>} : vector<64x128xf32>, vector<128x384xf32>, vector<64x384xf32> -> vector<64x384xf32>
    %12 = vector.broadcast %6 : vector<1x384xf32> to vector<64x384xf32>
    %13 = arith.addf %11, %12 : vector<64x384xf32>
    %cst_10 = arith.constant 0.000000e+00 : f32
    %14 = vector.broadcast %cst_10 : f32 to vector<8x128xf32>
    %15 = vector.extract_strided_slice %13 {offsets = [0, 0], sizes = [8, 384], strides = [1, 1]} : vector<64x384xf32> to vector<8x384xf32>
    %cst_11 = arith.constant dense<0.000000e+00> : vector<8x384xf32>
    %16 = tpu.matmul %14, %4, %cst_11 {dimension_numbers = #tpu.dot_dimension_numbers<[1], [0], [0], [1], [0, 0, 1, 1], [], []>} : vector<8x128xf32>, vector<128x384xf32>, vector<8x384xf32> -> vector<8x384xf32>
    %17 = vector.extract_strided_slice %15 {offsets = [0, 0], sizes = [8, 128], strides = [1, 1]} : vector<8x384xf32> to vector<8x128xf32>
    %18 = vector.extract_strided_slice %16 {offsets = [0, 0], sizes = [8, 128], strides = [1, 1]} : vector<8x384xf32> to vector<8x128xf32>
    %19 = arith.addf %17, %18 : vector<8x128xf32>
    %20 = arith.negf %19 : vector<8x128xf32>
    %21 = math.exp %20 : vector<8x128xf32>
    %cst_12 = arith.constant 1.000000e+00 : f32
    %22 = vector.broadcast %cst_12 : f32 to vector<8x128xf32>
    %23 = arith.addf %22, %21 : vector<8x128xf32>
    %24 = arith.divf %22, %23 : vector<8x128xf32>
    %25 = vector.extract_strided_slice %15 {offsets = [0, 128], sizes = [8, 128], strides = [1, 1]} : vector<8x384xf32> to vector<8x128xf32>
    %26 = vector.extract_strided_slice %16 {offsets = [0, 128], sizes = [8, 128], strides = [1, 1]} : vector<8x384xf32> to vector<8x128xf32>
    %27 = arith.addf %25, %26 : vector<8x128xf32>
    %28 = arith.negf %27 : vector<8x128xf32>
    %29 = math.exp %28 : vector<8x128xf32>
    %cst_13 = arith.constant 1.000000e+00 : f32
    %30 = vector.broadcast %cst_13 : f32 to vector<8x128xf32>
    %31 = arith.addf %30, %29 : vector<8x128xf32>
    %32 = arith.divf %30, %31 : vector<8x128xf32>
    %33 = vector.extract_strided_slice %15 {offsets = [0, 256], sizes = [8, 128], strides = [1, 1]} : vector<8x384xf32> to vector<8x128xf32>
    %34 = vector.extract_strided_slice %16 {offsets = [0, 256], sizes = [8, 128], strides = [1, 1]} : vector<8x384xf32> to vector<8x128xf32>
    %35 = arith.addf %34, %10 : vector<8x128xf32>
    %36 = arith.mulf %24, %35 : vector<8x128xf32>
    %37 = arith.addf %33, %36 : vector<8x128xf32>
    %38 = math.tanh %37 : vector<8x128xf32>
    %39 = arith.subf %14, %38 : vector<8x128xf32>
    %40 = arith.mulf %32, %39 : vector<8x128xf32>
    %41 = arith.addf %38, %40 : vector<8x128xf32>
    %42 = vector.extract_strided_slice %13 {offsets = [8, 0], sizes = [8, 384], strides = [1, 1]} : vector<64x384xf32> to vector<8x384xf32>
    %cst_14 = arith.constant dense<0.000000e+00> : vector<8x384xf32>
    %43 = tpu.matmul %41, %4, %cst_14 {dimension_numbers = #tpu.dot_dimension_numbers<[1], [0], [0], [1], [0, 0, 1, 1], [], []>} : vector<8x128xf32>, vector<128x384xf32>, vector<8x384xf32> -> vector<8x384xf32>
    %44 = vector.extract_strided_slice %42 {offsets = [0, 0], sizes = [8, 128], strides = [1, 1]} : vector<8x384xf32> to vector<8x128xf32>
    %45 = vector.extract_strided_slice %43 {offsets = [0, 0], sizes = [8, 128], strides = [1, 1]} : vector<8x384xf32> to vector<8x128xf32>
    %46 = arith.addf %44, %45 : vector<8x128xf32>
    %47 = arith.negf %46 : vector<8x128xf32>
    %48 = math.exp %47 : vector<8x128xf32>
    %cst_15 = arith.constant 1.000000e+00 : f32
    %49 = vector.broadcast %cst_15 : f32 to vector<8x128xf32>
    %50 = arith.addf %49, %48 : vector<8x128xf32>
    %51 = arith.divf %49, %50 : vector<8x128xf32>
    %52 = vector.extract_strided_slice %42 {offsets = [0, 128], sizes = [8, 128], strides = [1, 1]} : vector<8x384xf32> to vector<8x128xf32>
    %53 = vector.extract_strided_slice %43 {offsets = [0, 128], sizes = [8, 128], strides = [1, 1]} : vector<8x384xf32> to vector<8x128xf32>
    %54 = arith.addf %52, %53 : vector<8x128xf32>
    %55 = arith.negf %54 : vector<8x128xf32>
    %56 = math.exp %55 : vector<8x128xf32>
    %cst_16 = arith.constant 1.000000e+00 : f32
    %57 = vector.broadcast %cst_16 : f32 to vector<8x128xf32>
    %58 = arith.addf %57, %56 : vector<8x128xf32>
    %59 = arith.divf %57, %58 : vector<8x128xf32>
    %60 = vector.extract_strided_slice %42 {offsets = [0, 256], sizes = [8, 128], strides = [1, 1]} : vector<8x384xf32> to vector<8x128xf32>
    %61 = vector.extract_strided_slice %43 {offsets = [0, 256], sizes = [8, 128], strides = [1, 1]} : vector<8x384xf32> to vector<8x128xf32>
    %62 = arith.addf %61, %10 : vector<8x128xf32>
    %63 = arith.mulf %51, %62 : vector<8x128xf32>
    %64 = arith.addf %60, %63 : vector<8x128xf32>
    %65 = math.tanh %64 : vector<8x128xf32>
    %66 = arith.subf %41, %65 : vector<8x128xf32>
    %67 = arith.mulf %59, %66 : vector<8x128xf32>
    %68 = arith.addf %65, %67 : vector<8x128xf32>
    %69 = vector.extract_strided_slice %13 {offsets = [16, 0], sizes = [8, 384], strides = [1, 1]} : vector<64x384xf32> to vector<8x384xf32>
    %cst_17 = arith.constant dense<0.000000e+00> : vector<8x384xf32>
    %70 = tpu.matmul %68, %4, %cst_17 {dimension_numbers = #tpu.dot_dimension_numbers<[1], [0], [0], [1], [0, 0, 1, 1], [], []>} : vector<8x128xf32>, vector<128x384xf32>, vector<8x384xf32> -> vector<8x384xf32>
    %71 = vector.extract_strided_slice %69 {offsets = [0, 0], sizes = [8, 128], strides = [1, 1]} : vector<8x384xf32> to vector<8x128xf32>
    %72 = vector.extract_strided_slice %70 {offsets = [0, 0], sizes = [8, 128], strides = [1, 1]} : vector<8x384xf32> to vector<8x128xf32>
    %73 = arith.addf %71, %72 : vector<8x128xf32>
    %74 = arith.negf %73 : vector<8x128xf32>
    %75 = math.exp %74 : vector<8x128xf32>
    %cst_18 = arith.constant 1.000000e+00 : f32
    %76 = vector.broadcast %cst_18 : f32 to vector<8x128xf32>
    %77 = arith.addf %76, %75 : vector<8x128xf32>
    %78 = arith.divf %76, %77 : vector<8x128xf32>
    %79 = vector.extract_strided_slice %69 {offsets = [0, 128], sizes = [8, 128], strides = [1, 1]} : vector<8x384xf32> to vector<8x128xf32>
    %80 = vector.extract_strided_slice %70 {offsets = [0, 128], sizes = [8, 128], strides = [1, 1]} : vector<8x384xf32> to vector<8x128xf32>
    %81 = arith.addf %79, %80 : vector<8x128xf32>
    %82 = arith.negf %81 : vector<8x128xf32>
    %83 = math.exp %82 : vector<8x128xf32>
    %cst_19 = arith.constant 1.000000e+00 : f32
    %84 = vector.broadcast %cst_19 : f32 to vector<8x128xf32>
    %85 = arith.addf %84, %83 : vector<8x128xf32>
    %86 = arith.divf %84, %85 : vector<8x128xf32>
    %87 = vector.extract_strided_slice %69 {offsets = [0, 256], sizes = [8, 128], strides = [1, 1]} : vector<8x384xf32> to vector<8x128xf32>
    %88 = vector.extract_strided_slice %70 {offsets = [0, 256], sizes = [8, 128], strides = [1, 1]} : vector<8x384xf32> to vector<8x128xf32>
    %89 = arith.addf %88, %10 : vector<8x128xf32>
    %90 = arith.mulf %78, %89 : vector<8x128xf32>
    %91 = arith.addf %87, %90 : vector<8x128xf32>
    %92 = math.tanh %91 : vector<8x128xf32>
    %93 = arith.subf %68, %92 : vector<8x128xf32>
    %94 = arith.mulf %86, %93 : vector<8x128xf32>
    %95 = arith.addf %92, %94 : vector<8x128xf32>
    %96 = vector.extract_strided_slice %13 {offsets = [24, 0], sizes = [8, 384], strides = [1, 1]} : vector<64x384xf32> to vector<8x384xf32>
    %cst_20 = arith.constant dense<0.000000e+00> : vector<8x384xf32>
    %97 = tpu.matmul %95, %4, %cst_20 {dimension_numbers = #tpu.dot_dimension_numbers<[1], [0], [0], [1], [0, 0, 1, 1], [], []>} : vector<8x128xf32>, vector<128x384xf32>, vector<8x384xf32> -> vector<8x384xf32>
    %98 = vector.extract_strided_slice %96 {offsets = [0, 0], sizes = [8, 128], strides = [1, 1]} : vector<8x384xf32> to vector<8x128xf32>
    %99 = vector.extract_strided_slice %97 {offsets = [0, 0], sizes = [8, 128], strides = [1, 1]} : vector<8x384xf32> to vector<8x128xf32>
    %100 = arith.addf %98, %99 : vector<8x128xf32>
    %101 = arith.negf %100 : vector<8x128xf32>
    %102 = math.exp %101 : vector<8x128xf32>
    %cst_21 = arith.constant 1.000000e+00 : f32
    %103 = vector.broadcast %cst_21 : f32 to vector<8x128xf32>
    %104 = arith.addf %103, %102 : vector<8x128xf32>
    %105 = arith.divf %103, %104 : vector<8x128xf32>
    %106 = vector.extract_strided_slice %96 {offsets = [0, 128], sizes = [8, 128], strides = [1, 1]} : vector<8x384xf32> to vector<8x128xf32>
    %107 = vector.extract_strided_slice %97 {offsets = [0, 128], sizes = [8, 128], strides = [1, 1]} : vector<8x384xf32> to vector<8x128xf32>
    %108 = arith.addf %106, %107 : vector<8x128xf32>
    %109 = arith.negf %108 : vector<8x128xf32>
    %110 = math.exp %109 : vector<8x128xf32>
    %cst_22 = arith.constant 1.000000e+00 : f32
    %111 = vector.broadcast %cst_22 : f32 to vector<8x128xf32>
    %112 = arith.addf %111, %110 : vector<8x128xf32>
    %113 = arith.divf %111, %112 : vector<8x128xf32>
    %114 = vector.extract_strided_slice %96 {offsets = [0, 256], sizes = [8, 128], strides = [1, 1]} : vector<8x384xf32> to vector<8x128xf32>
    %115 = vector.extract_strided_slice %97 {offsets = [0, 256], sizes = [8, 128], strides = [1, 1]} : vector<8x384xf32> to vector<8x128xf32>
    %116 = arith.addf %115, %10 : vector<8x128xf32>
    %117 = arith.mulf %105, %116 : vector<8x128xf32>
    %118 = arith.addf %114, %117 : vector<8x128xf32>
    %119 = math.tanh %118 : vector<8x128xf32>
    %120 = arith.subf %95, %119 : vector<8x128xf32>
    %121 = arith.mulf %113, %120 : vector<8x128xf32>
    %122 = arith.addf %119, %121 : vector<8x128xf32>
    %123 = vector.extract_strided_slice %13 {offsets = [32, 0], sizes = [8, 384], strides = [1, 1]} : vector<64x384xf32> to vector<8x384xf32>
    %cst_23 = arith.constant dense<0.000000e+00> : vector<8x384xf32>
    %124 = tpu.matmul %122, %4, %cst_23 {dimension_numbers = #tpu.dot_dimension_numbers<[1], [0], [0], [1], [0, 0, 1, 1], [], []>} : vector<8x128xf32>, vector<128x384xf32>, vector<8x384xf32> -> vector<8x384xf32>
    %125 = vector.extract_strided_slice %123 {offsets = [0, 0], sizes = [8, 128], strides = [1, 1]} : vector<8x384xf32> to vector<8x128xf32>
    %126 = vector.extract_strided_slice %124 {offsets = [0, 0], sizes = [8, 128], strides = [1, 1]} : vector<8x384xf32> to vector<8x128xf32>
    %127 = arith.addf %125, %126 : vector<8x128xf32>
    %128 = arith.negf %127 : vector<8x128xf32>
    %129 = math.exp %128 : vector<8x128xf32>
    %cst_24 = arith.constant 1.000000e+00 : f32
    %130 = vector.broadcast %cst_24 : f32 to vector<8x128xf32>
    %131 = arith.addf %130, %129 : vector<8x128xf32>
    %132 = arith.divf %130, %131 : vector<8x128xf32>
    %133 = vector.extract_strided_slice %123 {offsets = [0, 128], sizes = [8, 128], strides = [1, 1]} : vector<8x384xf32> to vector<8x128xf32>
    %134 = vector.extract_strided_slice %124 {offsets = [0, 128], sizes = [8, 128], strides = [1, 1]} : vector<8x384xf32> to vector<8x128xf32>
    %135 = arith.addf %133, %134 : vector<8x128xf32>
    %136 = arith.negf %135 : vector<8x128xf32>
    %137 = math.exp %136 : vector<8x128xf32>
    %cst_25 = arith.constant 1.000000e+00 : f32
    %138 = vector.broadcast %cst_25 : f32 to vector<8x128xf32>
    %139 = arith.addf %138, %137 : vector<8x128xf32>
    %140 = arith.divf %138, %139 : vector<8x128xf32>
    %141 = vector.extract_strided_slice %123 {offsets = [0, 256], sizes = [8, 128], strides = [1, 1]} : vector<8x384xf32> to vector<8x128xf32>
    %142 = vector.extract_strided_slice %124 {offsets = [0, 256], sizes = [8, 128], strides = [1, 1]} : vector<8x384xf32> to vector<8x128xf32>
    %143 = arith.addf %142, %10 : vector<8x128xf32>
    %144 = arith.mulf %132, %143 : vector<8x128xf32>
    %145 = arith.addf %141, %144 : vector<8x128xf32>
    %146 = math.tanh %145 : vector<8x128xf32>
    %147 = arith.subf %122, %146 : vector<8x128xf32>
    %148 = arith.mulf %140, %147 : vector<8x128xf32>
    %149 = arith.addf %146, %148 : vector<8x128xf32>
    %150 = vector.extract_strided_slice %13 {offsets = [40, 0], sizes = [8, 384], strides = [1, 1]} : vector<64x384xf32> to vector<8x384xf32>
    %cst_26 = arith.constant dense<0.000000e+00> : vector<8x384xf32>
    %151 = tpu.matmul %149, %4, %cst_26 {dimension_numbers = #tpu.dot_dimension_numbers<[1], [0], [0], [1], [0, 0, 1, 1], [], []>} : vector<8x128xf32>, vector<128x384xf32>, vector<8x384xf32> -> vector<8x384xf32>
    %152 = vector.extract_strided_slice %150 {offsets = [0, 0], sizes = [8, 128], strides = [1, 1]} : vector<8x384xf32> to vector<8x128xf32>
    %153 = vector.extract_strided_slice %151 {offsets = [0, 0], sizes = [8, 128], strides = [1, 1]} : vector<8x384xf32> to vector<8x128xf32>
    %154 = arith.addf %152, %153 : vector<8x128xf32>
    %155 = arith.negf %154 : vector<8x128xf32>
    %156 = math.exp %155 : vector<8x128xf32>
    %cst_27 = arith.constant 1.000000e+00 : f32
    %157 = vector.broadcast %cst_27 : f32 to vector<8x128xf32>
    %158 = arith.addf %157, %156 : vector<8x128xf32>
    %159 = arith.divf %157, %158 : vector<8x128xf32>
    %160 = vector.extract_strided_slice %150 {offsets = [0, 128], sizes = [8, 128], strides = [1, 1]} : vector<8x384xf32> to vector<8x128xf32>
    %161 = vector.extract_strided_slice %151 {offsets = [0, 128], sizes = [8, 128], strides = [1, 1]} : vector<8x384xf32> to vector<8x128xf32>
    %162 = arith.addf %160, %161 : vector<8x128xf32>
    %163 = arith.negf %162 : vector<8x128xf32>
    %164 = math.exp %163 : vector<8x128xf32>
    %cst_28 = arith.constant 1.000000e+00 : f32
    %165 = vector.broadcast %cst_28 : f32 to vector<8x128xf32>
    %166 = arith.addf %165, %164 : vector<8x128xf32>
    %167 = arith.divf %165, %166 : vector<8x128xf32>
    %168 = vector.extract_strided_slice %150 {offsets = [0, 256], sizes = [8, 128], strides = [1, 1]} : vector<8x384xf32> to vector<8x128xf32>
    %169 = vector.extract_strided_slice %151 {offsets = [0, 256], sizes = [8, 128], strides = [1, 1]} : vector<8x384xf32> to vector<8x128xf32>
    %170 = arith.addf %169, %10 : vector<8x128xf32>
    %171 = arith.mulf %159, %170 : vector<8x128xf32>
    %172 = arith.addf %168, %171 : vector<8x128xf32>
    %173 = math.tanh %172 : vector<8x128xf32>
    %174 = arith.subf %149, %173 : vector<8x128xf32>
    %175 = arith.mulf %167, %174 : vector<8x128xf32>
    %176 = arith.addf %173, %175 : vector<8x128xf32>
    %177 = vector.extract_strided_slice %13 {offsets = [48, 0], sizes = [8, 384], strides = [1, 1]} : vector<64x384xf32> to vector<8x384xf32>
    %cst_29 = arith.constant dense<0.000000e+00> : vector<8x384xf32>
    %178 = tpu.matmul %176, %4, %cst_29 {dimension_numbers = #tpu.dot_dimension_numbers<[1], [0], [0], [1], [0, 0, 1, 1], [], []>} : vector<8x128xf32>, vector<128x384xf32>, vector<8x384xf32> -> vector<8x384xf32>
    %179 = vector.extract_strided_slice %177 {offsets = [0, 0], sizes = [8, 128], strides = [1, 1]} : vector<8x384xf32> to vector<8x128xf32>
    %180 = vector.extract_strided_slice %178 {offsets = [0, 0], sizes = [8, 128], strides = [1, 1]} : vector<8x384xf32> to vector<8x128xf32>
    %181 = arith.addf %179, %180 : vector<8x128xf32>
    %182 = arith.negf %181 : vector<8x128xf32>
    %183 = math.exp %182 : vector<8x128xf32>
    %cst_30 = arith.constant 1.000000e+00 : f32
    %184 = vector.broadcast %cst_30 : f32 to vector<8x128xf32>
    %185 = arith.addf %184, %183 : vector<8x128xf32>
    %186 = arith.divf %184, %185 : vector<8x128xf32>
    %187 = vector.extract_strided_slice %177 {offsets = [0, 128], sizes = [8, 128], strides = [1, 1]} : vector<8x384xf32> to vector<8x128xf32>
    %188 = vector.extract_strided_slice %178 {offsets = [0, 128], sizes = [8, 128], strides = [1, 1]} : vector<8x384xf32> to vector<8x128xf32>
    %189 = arith.addf %187, %188 : vector<8x128xf32>
    %190 = arith.negf %189 : vector<8x128xf32>
    %191 = math.exp %190 : vector<8x128xf32>
    %cst_31 = arith.constant 1.000000e+00 : f32
    %192 = vector.broadcast %cst_31 : f32 to vector<8x128xf32>
    %193 = arith.addf %192, %191 : vector<8x128xf32>
    %194 = arith.divf %192, %193 : vector<8x128xf32>
    %195 = vector.extract_strided_slice %177 {offsets = [0, 256], sizes = [8, 128], strides = [1, 1]} : vector<8x384xf32> to vector<8x128xf32>
    %196 = vector.extract_strided_slice %178 {offsets = [0, 256], sizes = [8, 128], strides = [1, 1]} : vector<8x384xf32> to vector<8x128xf32>
    %197 = arith.addf %196, %10 : vector<8x128xf32>
    %198 = arith.mulf %186, %197 : vector<8x128xf32>
    %199 = arith.addf %195, %198 : vector<8x128xf32>
    %200 = math.tanh %199 : vector<8x128xf32>
    %201 = arith.subf %176, %200 : vector<8x128xf32>
    %202 = arith.mulf %194, %201 : vector<8x128xf32>
    %203 = arith.addf %200, %202 : vector<8x128xf32>
    %204 = vector.extract_strided_slice %13 {offsets = [56, 0], sizes = [8, 384], strides = [1, 1]} : vector<64x384xf32> to vector<8x384xf32>
    %cst_32 = arith.constant dense<0.000000e+00> : vector<8x384xf32>
    %205 = tpu.matmul %203, %4, %cst_32 {dimension_numbers = #tpu.dot_dimension_numbers<[1], [0], [0], [1], [0, 0, 1, 1], [], []>} : vector<8x128xf32>, vector<128x384xf32>, vector<8x384xf32> -> vector<8x384xf32>
    %206 = vector.extract_strided_slice %204 {offsets = [0, 0], sizes = [8, 128], strides = [1, 1]} : vector<8x384xf32> to vector<8x128xf32>
    %207 = vector.extract_strided_slice %205 {offsets = [0, 0], sizes = [8, 128], strides = [1, 1]} : vector<8x384xf32> to vector<8x128xf32>
    %208 = arith.addf %206, %207 : vector<8x128xf32>
    %209 = arith.negf %208 : vector<8x128xf32>
    %210 = math.exp %209 : vector<8x128xf32>
    %cst_33 = arith.constant 1.000000e+00 : f32
    %211 = vector.broadcast %cst_33 : f32 to vector<8x128xf32>
    %212 = arith.addf %211, %210 : vector<8x128xf32>
    %213 = arith.divf %211, %212 : vector<8x128xf32>
    %214 = vector.extract_strided_slice %204 {offsets = [0, 128], sizes = [8, 128], strides = [1, 1]} : vector<8x384xf32> to vector<8x128xf32>
    %215 = vector.extract_strided_slice %205 {offsets = [0, 128], sizes = [8, 128], strides = [1, 1]} : vector<8x384xf32> to vector<8x128xf32>
    %216 = arith.addf %214, %215 : vector<8x128xf32>
    %217 = arith.negf %216 : vector<8x128xf32>
    %218 = math.exp %217 : vector<8x128xf32>
    %cst_34 = arith.constant 1.000000e+00 : f32
    %219 = vector.broadcast %cst_34 : f32 to vector<8x128xf32>
    %220 = arith.addf %219, %218 : vector<8x128xf32>
    %221 = arith.divf %219, %220 : vector<8x128xf32>
    %222 = vector.extract_strided_slice %204 {offsets = [0, 256], sizes = [8, 128], strides = [1, 1]} : vector<8x384xf32> to vector<8x128xf32>
    %223 = vector.extract_strided_slice %205 {offsets = [0, 256], sizes = [8, 128], strides = [1, 1]} : vector<8x384xf32> to vector<8x128xf32>
    %224 = arith.addf %223, %10 : vector<8x128xf32>
    %225 = arith.mulf %213, %224 : vector<8x128xf32>
    %226 = arith.addf %222, %225 : vector<8x128xf32>
    %227 = math.tanh %226 : vector<8x128xf32>
    %228 = arith.subf %203, %227 : vector<8x128xf32>
    %229 = arith.mulf %221, %228 : vector<8x128xf32>
    %230 = arith.addf %227, %229 : vector<8x128xf32>
    %231 = tpu.concatenate %41, %68, %95, %122, %149, %176, %203, %230 in 0 : vector<8x128xf32>, vector<8x128xf32>, vector<8x128xf32>, vector<8x128xf32>, vector<8x128xf32>, vector<8x128xf32>, vector<8x128xf32>, vector<8x128xf32> -> vector<64x128xf32>
    %c1 = arith.constant 1 : index
    %c0_35 = arith.constant 0 : index
    %c0_36 = arith.constant 0 : index
    %232 = vector.load %arg1[%c1, %c0_35, %c0_36] : memref<2x272x384xf32, #tpu.memory_space<vmem>>, vector<1x128x384xf32>
    %233 = vector.shape_cast %232 : vector<1x128x384xf32> to vector<128x384xf32>
    %c1_37 = arith.constant 1 : index
    %c128_38 = arith.constant 128 : index
    %c0_39 = arith.constant 0 : index
    %234 = vector.load %arg1[%c1_37, %c128_38, %c0_39] : memref<2x272x384xf32, #tpu.memory_space<vmem>>, vector<1x128x384xf32>
    %235 = vector.shape_cast %234 : vector<1x128x384xf32> to vector<128x384xf32>
    %c1_40 = arith.constant 1 : index
    %c256_41 = arith.constant 256 : index
    %c0_42 = arith.constant 0 : index
    %236 = vector.load %arg1[%c1_40, %c256_41, %c0_42] : memref<2x272x384xf32, #tpu.memory_space<vmem>>, vector<1x1x384xf32>
    %237 = vector.shape_cast %236 : vector<1x1x384xf32> to vector<1x384xf32>
    %c1_43 = arith.constant 1 : index
    %c264_44 = arith.constant 264 : index
    %c0_45 = arith.constant 0 : index
    %238 = vector.load %arg1[%c1_43, %c264_44, %c0_45] : memref<2x272x384xf32, #tpu.memory_space<vmem>>, vector<1x1x128xf32>
    %239 = vector.shape_cast %238 : vector<1x1x128xf32> to vector<1x128xf32>
    %240 = vector.shape_cast %239 : vector<1x128xf32> to vector<1x128xf32>
    %241 = vector.broadcast %240 : vector<1x128xf32> to vector<8x128xf32>
    %cst_46 = arith.constant dense<0.000000e+00> : vector<64x384xf32>
    %242 = tpu.matmul %231, %233, %cst_46 {dimension_numbers = #tpu.dot_dimension_numbers<[1], [0], [0], [1], [0, 0, 1, 1], [], []>} : vector<64x128xf32>, vector<128x384xf32>, vector<64x384xf32> -> vector<64x384xf32>
    %243 = vector.broadcast %237 : vector<1x384xf32> to vector<64x384xf32>
    %244 = arith.addf %242, %243 : vector<64x384xf32>
    %cst_47 = arith.constant 0.000000e+00 : f32
    %245 = vector.broadcast %cst_47 : f32 to vector<8x128xf32>
    %246 = vector.extract_strided_slice %244 {offsets = [0, 0], sizes = [8, 384], strides = [1, 1]} : vector<64x384xf32> to vector<8x384xf32>
    %cst_48 = arith.constant dense<0.000000e+00> : vector<8x384xf32>
    %247 = tpu.matmul %245, %235, %cst_48 {dimension_numbers = #tpu.dot_dimension_numbers<[1], [0], [0], [1], [0, 0, 1, 1], [], []>} : vector<8x128xf32>, vector<128x384xf32>, vector<8x384xf32> -> vector<8x384xf32>
    %248 = vector.extract_strided_slice %246 {offsets = [0, 0], sizes = [8, 128], strides = [1, 1]} : vector<8x384xf32> to vector<8x128xf32>
    %249 = vector.extract_strided_slice %247 {offsets = [0, 0], sizes = [8, 128], strides = [1, 1]} : vector<8x384xf32> to vector<8x128xf32>
    %250 = arith.addf %248, %249 : vector<8x128xf32>
    %251 = arith.negf %250 : vector<8x128xf32>
    %252 = math.exp %251 : vector<8x128xf32>
    %cst_49 = arith.constant 1.000000e+00 : f32
    %253 = vector.broadcast %cst_49 : f32 to vector<8x128xf32>
    %254 = arith.addf %253, %252 : vector<8x128xf32>
    %255 = arith.divf %253, %254 : vector<8x128xf32>
    %256 = vector.extract_strided_slice %246 {offsets = [0, 128], sizes = [8, 128], strides = [1, 1]} : vector<8x384xf32> to vector<8x128xf32>
    %257 = vector.extract_strided_slice %247 {offsets = [0, 128], sizes = [8, 128], strides = [1, 1]} : vector<8x384xf32> to vector<8x128xf32>
    %258 = arith.addf %256, %257 : vector<8x128xf32>
    %259 = arith.negf %258 : vector<8x128xf32>
    %260 = math.exp %259 : vector<8x128xf32>
    %cst_50 = arith.constant 1.000000e+00 : f32
    %261 = vector.broadcast %cst_50 : f32 to vector<8x128xf32>
    %262 = arith.addf %261, %260 : vector<8x128xf32>
    %263 = arith.divf %261, %262 : vector<8x128xf32>
    %264 = vector.extract_strided_slice %246 {offsets = [0, 256], sizes = [8, 128], strides = [1, 1]} : vector<8x384xf32> to vector<8x128xf32>
    %265 = vector.extract_strided_slice %247 {offsets = [0, 256], sizes = [8, 128], strides = [1, 1]} : vector<8x384xf32> to vector<8x128xf32>
    %266 = arith.addf %265, %241 : vector<8x128xf32>
    %267 = arith.mulf %255, %266 : vector<8x128xf32>
    %268 = arith.addf %264, %267 : vector<8x128xf32>
    %269 = math.tanh %268 : vector<8x128xf32>
    %270 = arith.subf %245, %269 : vector<8x128xf32>
    %271 = arith.mulf %263, %270 : vector<8x128xf32>
    %272 = arith.addf %269, %271 : vector<8x128xf32>
    %273 = vector.extract_strided_slice %244 {offsets = [8, 0], sizes = [8, 384], strides = [1, 1]} : vector<64x384xf32> to vector<8x384xf32>
    %cst_51 = arith.constant dense<0.000000e+00> : vector<8x384xf32>
    %274 = tpu.matmul %272, %235, %cst_51 {dimension_numbers = #tpu.dot_dimension_numbers<[1], [0], [0], [1], [0, 0, 1, 1], [], []>} : vector<8x128xf32>, vector<128x384xf32>, vector<8x384xf32> -> vector<8x384xf32>
    %275 = vector.extract_strided_slice %273 {offsets = [0, 0], sizes = [8, 128], strides = [1, 1]} : vector<8x384xf32> to vector<8x128xf32>
    %276 = vector.extract_strided_slice %274 {offsets = [0, 0], sizes = [8, 128], strides = [1, 1]} : vector<8x384xf32> to vector<8x128xf32>
    %277 = arith.addf %275, %276 : vector<8x128xf32>
    %278 = arith.negf %277 : vector<8x128xf32>
    %279 = math.exp %278 : vector<8x128xf32>
    %cst_52 = arith.constant 1.000000e+00 : f32
    %280 = vector.broadcast %cst_52 : f32 to vector<8x128xf32>
    %281 = arith.addf %280, %279 : vector<8x128xf32>
    %282 = arith.divf %280, %281 : vector<8x128xf32>
    %283 = vector.extract_strided_slice %273 {offsets = [0, 128], sizes = [8, 128], strides = [1, 1]} : vector<8x384xf32> to vector<8x128xf32>
    %284 = vector.extract_strided_slice %274 {offsets = [0, 128], sizes = [8, 128], strides = [1, 1]} : vector<8x384xf32> to vector<8x128xf32>
    %285 = arith.addf %283, %284 : vector<8x128xf32>
    %286 = arith.negf %285 : vector<8x128xf32>
    %287 = math.exp %286 : vector<8x128xf32>
    %cst_53 = arith.constant 1.000000e+00 : f32
    %288 = vector.broadcast %cst_53 : f32 to vector<8x128xf32>
    %289 = arith.addf %288, %287 : vector<8x128xf32>
    %290 = arith.divf %288, %289 : vector<8x128xf32>
    %291 = vector.extract_strided_slice %273 {offsets = [0, 256], sizes = [8, 128], strides = [1, 1]} : vector<8x384xf32> to vector<8x128xf32>
    %292 = vector.extract_strided_slice %274 {offsets = [0, 256], sizes = [8, 128], strides = [1, 1]} : vector<8x384xf32> to vector<8x128xf32>
    %293 = arith.addf %292, %241 : vector<8x128xf32>
    %294 = arith.mulf %282, %293 : vector<8x128xf32>
    %295 = arith.addf %291, %294 : vector<8x128xf32>
    %296 = math.tanh %295 : vector<8x128xf32>
    %297 = arith.subf %272, %296 : vector<8x128xf32>
    %298 = arith.mulf %290, %297 : vector<8x128xf32>
    %299 = arith.addf %296, %298 : vector<8x128xf32>
    %300 = vector.extract_strided_slice %244 {offsets = [16, 0], sizes = [8, 384], strides = [1, 1]} : vector<64x384xf32> to vector<8x384xf32>
    %cst_54 = arith.constant dense<0.000000e+00> : vector<8x384xf32>
    %301 = tpu.matmul %299, %235, %cst_54 {dimension_numbers = #tpu.dot_dimension_numbers<[1], [0], [0], [1], [0, 0, 1, 1], [], []>} : vector<8x128xf32>, vector<128x384xf32>, vector<8x384xf32> -> vector<8x384xf32>
    %302 = vector.extract_strided_slice %300 {offsets = [0, 0], sizes = [8, 128], strides = [1, 1]} : vector<8x384xf32> to vector<8x128xf32>
    %303 = vector.extract_strided_slice %301 {offsets = [0, 0], sizes = [8, 128], strides = [1, 1]} : vector<8x384xf32> to vector<8x128xf32>
    %304 = arith.addf %302, %303 : vector<8x128xf32>
    %305 = arith.negf %304 : vector<8x128xf32>
    %306 = math.exp %305 : vector<8x128xf32>
    %cst_55 = arith.constant 1.000000e+00 : f32
    %307 = vector.broadcast %cst_55 : f32 to vector<8x128xf32>
    %308 = arith.addf %307, %306 : vector<8x128xf32>
    %309 = arith.divf %307, %308 : vector<8x128xf32>
    %310 = vector.extract_strided_slice %300 {offsets = [0, 128], sizes = [8, 128], strides = [1, 1]} : vector<8x384xf32> to vector<8x128xf32>
    %311 = vector.extract_strided_slice %301 {offsets = [0, 128], sizes = [8, 128], strides = [1, 1]} : vector<8x384xf32> to vector<8x128xf32>
    %312 = arith.addf %310, %311 : vector<8x128xf32>
    %313 = arith.negf %312 : vector<8x128xf32>
    %314 = math.exp %313 : vector<8x128xf32>
    %cst_56 = arith.constant 1.000000e+00 : f32
    %315 = vector.broadcast %cst_56 : f32 to vector<8x128xf32>
    %316 = arith.addf %315, %314 : vector<8x128xf32>
    %317 = arith.divf %315, %316 : vector<8x128xf32>
    %318 = vector.extract_strided_slice %300 {offsets = [0, 256], sizes = [8, 128], strides = [1, 1]} : vector<8x384xf32> to vector<8x128xf32>
    %319 = vector.extract_strided_slice %301 {offsets = [0, 256], sizes = [8, 128], strides = [1, 1]} : vector<8x384xf32> to vector<8x128xf32>
    %320 = arith.addf %319, %241 : vector<8x128xf32>
    %321 = arith.mulf %309, %320 : vector<8x128xf32>
    %322 = arith.addf %318, %321 : vector<8x128xf32>
    %323 = math.tanh %322 : vector<8x128xf32>
    %324 = arith.subf %299, %323 : vector<8x128xf32>
    %325 = arith.mulf %317, %324 : vector<8x128xf32>
    %326 = arith.addf %323, %325 : vector<8x128xf32>
    %327 = vector.extract_strided_slice %244 {offsets = [24, 0], sizes = [8, 384], strides = [1, 1]} : vector<64x384xf32> to vector<8x384xf32>
    %cst_57 = arith.constant dense<0.000000e+00> : vector<8x384xf32>
    %328 = tpu.matmul %326, %235, %cst_57 {dimension_numbers = #tpu.dot_dimension_numbers<[1], [0], [0], [1], [0, 0, 1, 1], [], []>} : vector<8x128xf32>, vector<128x384xf32>, vector<8x384xf32> -> vector<8x384xf32>
    %329 = vector.extract_strided_slice %327 {offsets = [0, 0], sizes = [8, 128], strides = [1, 1]} : vector<8x384xf32> to vector<8x128xf32>
    %330 = vector.extract_strided_slice %328 {offsets = [0, 0], sizes = [8, 128], strides = [1, 1]} : vector<8x384xf32> to vector<8x128xf32>
    %331 = arith.addf %329, %330 : vector<8x128xf32>
    %332 = arith.negf %331 : vector<8x128xf32>
    %333 = math.exp %332 : vector<8x128xf32>
    %cst_58 = arith.constant 1.000000e+00 : f32
    %334 = vector.broadcast %cst_58 : f32 to vector<8x128xf32>
    %335 = arith.addf %334, %333 : vector<8x128xf32>
    %336 = arith.divf %334, %335 : vector<8x128xf32>
    %337 = vector.extract_strided_slice %327 {offsets = [0, 128], sizes = [8, 128], strides = [1, 1]} : vector<8x384xf32> to vector<8x128xf32>
    %338 = vector.extract_strided_slice %328 {offsets = [0, 128], sizes = [8, 128], strides = [1, 1]} : vector<8x384xf32> to vector<8x128xf32>
    %339 = arith.addf %337, %338 : vector<8x128xf32>
    %340 = arith.negf %339 : vector<8x128xf32>
    %341 = math.exp %340 : vector<8x128xf32>
    %cst_59 = arith.constant 1.000000e+00 : f32
    %342 = vector.broadcast %cst_59 : f32 to vector<8x128xf32>
    %343 = arith.addf %342, %341 : vector<8x128xf32>
    %344 = arith.divf %342, %343 : vector<8x128xf32>
    %345 = vector.extract_strided_slice %327 {offsets = [0, 256], sizes = [8, 128], strides = [1, 1]} : vector<8x384xf32> to vector<8x128xf32>
    %346 = vector.extract_strided_slice %328 {offsets = [0, 256], sizes = [8, 128], strides = [1, 1]} : vector<8x384xf32> to vector<8x128xf32>
    %347 = arith.addf %346, %241 : vector<8x128xf32>
    %348 = arith.mulf %336, %347 : vector<8x128xf32>
    %349 = arith.addf %345, %348 : vector<8x128xf32>
    %350 = math.tanh %349 : vector<8x128xf32>
    %351 = arith.subf %326, %350 : vector<8x128xf32>
    %352 = arith.mulf %344, %351 : vector<8x128xf32>
    %353 = arith.addf %350, %352 : vector<8x128xf32>
    %354 = vector.extract_strided_slice %244 {offsets = [32, 0], sizes = [8, 384], strides = [1, 1]} : vector<64x384xf32> to vector<8x384xf32>
    %cst_60 = arith.constant dense<0.000000e+00> : vector<8x384xf32>
    %355 = tpu.matmul %353, %235, %cst_60 {dimension_numbers = #tpu.dot_dimension_numbers<[1], [0], [0], [1], [0, 0, 1, 1], [], []>} : vector<8x128xf32>, vector<128x384xf32>, vector<8x384xf32> -> vector<8x384xf32>
    %356 = vector.extract_strided_slice %354 {offsets = [0, 0], sizes = [8, 128], strides = [1, 1]} : vector<8x384xf32> to vector<8x128xf32>
    %357 = vector.extract_strided_slice %355 {offsets = [0, 0], sizes = [8, 128], strides = [1, 1]} : vector<8x384xf32> to vector<8x128xf32>
    %358 = arith.addf %356, %357 : vector<8x128xf32>
    %359 = arith.negf %358 : vector<8x128xf32>
    %360 = math.exp %359 : vector<8x128xf32>
    %cst_61 = arith.constant 1.000000e+00 : f32
    %361 = vector.broadcast %cst_61 : f32 to vector<8x128xf32>
    %362 = arith.addf %361, %360 : vector<8x128xf32>
    %363 = arith.divf %361, %362 : vector<8x128xf32>
    %364 = vector.extract_strided_slice %354 {offsets = [0, 128], sizes = [8, 128], strides = [1, 1]} : vector<8x384xf32> to vector<8x128xf32>
    %365 = vector.extract_strided_slice %355 {offsets = [0, 128], sizes = [8, 128], strides = [1, 1]} : vector<8x384xf32> to vector<8x128xf32>
    %366 = arith.addf %364, %365 : vector<8x128xf32>
    %367 = arith.negf %366 : vector<8x128xf32>
    %368 = math.exp %367 : vector<8x128xf32>
    %cst_62 = arith.constant 1.000000e+00 : f32
    %369 = vector.broadcast %cst_62 : f32 to vector<8x128xf32>
    %370 = arith.addf %369, %368 : vector<8x128xf32>
    %371 = arith.divf %369, %370 : vector<8x128xf32>
    %372 = vector.extract_strided_slice %354 {offsets = [0, 256], sizes = [8, 128], strides = [1, 1]} : vector<8x384xf32> to vector<8x128xf32>
    %373 = vector.extract_strided_slice %355 {offsets = [0, 256], sizes = [8, 128], strides = [1, 1]} : vector<8x384xf32> to vector<8x128xf32>
    %374 = arith.addf %373, %241 : vector<8x128xf32>
    %375 = arith.mulf %363, %374 : vector<8x128xf32>
    %376 = arith.addf %372, %375 : vector<8x128xf32>
    %377 = math.tanh %376 : vector<8x128xf32>
    %378 = arith.subf %353, %377 : vector<8x128xf32>
    %379 = arith.mulf %371, %378 : vector<8x128xf32>
    %380 = arith.addf %377, %379 : vector<8x128xf32>
    %381 = vector.extract_strided_slice %244 {offsets = [40, 0], sizes = [8, 384], strides = [1, 1]} : vector<64x384xf32> to vector<8x384xf32>
    %cst_63 = arith.constant dense<0.000000e+00> : vector<8x384xf32>
    %382 = tpu.matmul %380, %235, %cst_63 {dimension_numbers = #tpu.dot_dimension_numbers<[1], [0], [0], [1], [0, 0, 1, 1], [], []>} : vector<8x128xf32>, vector<128x384xf32>, vector<8x384xf32> -> vector<8x384xf32>
    %383 = vector.extract_strided_slice %381 {offsets = [0, 0], sizes = [8, 128], strides = [1, 1]} : vector<8x384xf32> to vector<8x128xf32>
    %384 = vector.extract_strided_slice %382 {offsets = [0, 0], sizes = [8, 128], strides = [1, 1]} : vector<8x384xf32> to vector<8x128xf32>
    %385 = arith.addf %383, %384 : vector<8x128xf32>
    %386 = arith.negf %385 : vector<8x128xf32>
    %387 = math.exp %386 : vector<8x128xf32>
    %cst_64 = arith.constant 1.000000e+00 : f32
    %388 = vector.broadcast %cst_64 : f32 to vector<8x128xf32>
    %389 = arith.addf %388, %387 : vector<8x128xf32>
    %390 = arith.divf %388, %389 : vector<8x128xf32>
    %391 = vector.extract_strided_slice %381 {offsets = [0, 128], sizes = [8, 128], strides = [1, 1]} : vector<8x384xf32> to vector<8x128xf32>
    %392 = vector.extract_strided_slice %382 {offsets = [0, 128], sizes = [8, 128], strides = [1, 1]} : vector<8x384xf32> to vector<8x128xf32>
    %393 = arith.addf %391, %392 : vector<8x128xf32>
    %394 = arith.negf %393 : vector<8x128xf32>
    %395 = math.exp %394 : vector<8x128xf32>
    %cst_65 = arith.constant 1.000000e+00 : f32
    %396 = vector.broadcast %cst_65 : f32 to vector<8x128xf32>
    %397 = arith.addf %396, %395 : vector<8x128xf32>
    %398 = arith.divf %396, %397 : vector<8x128xf32>
    %399 = vector.extract_strided_slice %381 {offsets = [0, 256], sizes = [8, 128], strides = [1, 1]} : vector<8x384xf32> to vector<8x128xf32>
    %400 = vector.extract_strided_slice %382 {offsets = [0, 256], sizes = [8, 128], strides = [1, 1]} : vector<8x384xf32> to vector<8x128xf32>
    %401 = arith.addf %400, %241 : vector<8x128xf32>
    %402 = arith.mulf %390, %401 : vector<8x128xf32>
    %403 = arith.addf %399, %402 : vector<8x128xf32>
    %404 = math.tanh %403 : vector<8x128xf32>
    %405 = arith.subf %380, %404 : vector<8x128xf32>
    %406 = arith.mulf %398, %405 : vector<8x128xf32>
    %407 = arith.addf %404, %406 : vector<8x128xf32>
    %408 = vector.extract_strided_slice %244 {offsets = [48, 0], sizes = [8, 384], strides = [1, 1]} : vector<64x384xf32> to vector<8x384xf32>
    %cst_66 = arith.constant dense<0.000000e+00> : vector<8x384xf32>
    %409 = tpu.matmul %407, %235, %cst_66 {dimension_numbers = #tpu.dot_dimension_numbers<[1], [0], [0], [1], [0, 0, 1, 1], [], []>} : vector<8x128xf32>, vector<128x384xf32>, vector<8x384xf32> -> vector<8x384xf32>
    %410 = vector.extract_strided_slice %408 {offsets = [0, 0], sizes = [8, 128], strides = [1, 1]} : vector<8x384xf32> to vector<8x128xf32>
    %411 = vector.extract_strided_slice %409 {offsets = [0, 0], sizes = [8, 128], strides = [1, 1]} : vector<8x384xf32> to vector<8x128xf32>
    %412 = arith.addf %410, %411 : vector<8x128xf32>
    %413 = arith.negf %412 : vector<8x128xf32>
    %414 = math.exp %413 : vector<8x128xf32>
    %cst_67 = arith.constant 1.000000e+00 : f32
    %415 = vector.broadcast %cst_67 : f32 to vector<8x128xf32>
    %416 = arith.addf %415, %414 : vector<8x128xf32>
    %417 = arith.divf %415, %416 : vector<8x128xf32>
    %418 = vector.extract_strided_slice %408 {offsets = [0, 128], sizes = [8, 128], strides = [1, 1]} : vector<8x384xf32> to vector<8x128xf32>
    %419 = vector.extract_strided_slice %409 {offsets = [0, 128], sizes = [8, 128], strides = [1, 1]} : vector<8x384xf32> to vector<8x128xf32>
    %420 = arith.addf %418, %419 : vector<8x128xf32>
    %421 = arith.negf %420 : vector<8x128xf32>
    %422 = math.exp %421 : vector<8x128xf32>
    %cst_68 = arith.constant 1.000000e+00 : f32
    %423 = vector.broadcast %cst_68 : f32 to vector<8x128xf32>
    %424 = arith.addf %423, %422 : vector<8x128xf32>
    %425 = arith.divf %423, %424 : vector<8x128xf32>
    %426 = vector.extract_strided_slice %408 {offsets = [0, 256], sizes = [8, 128], strides = [1, 1]} : vector<8x384xf32> to vector<8x128xf32>
    %427 = vector.extract_strided_slice %409 {offsets = [0, 256], sizes = [8, 128], strides = [1, 1]} : vector<8x384xf32> to vector<8x128xf32>
    %428 = arith.addf %427, %241 : vector<8x128xf32>
    %429 = arith.mulf %417, %428 : vector<8x128xf32>
    %430 = arith.addf %426, %429 : vector<8x128xf32>
    %431 = math.tanh %430 : vector<8x128xf32>
    %432 = arith.subf %407, %431 : vector<8x128xf32>
    %433 = arith.mulf %425, %432 : vector<8x128xf32>
    %434 = arith.addf %431, %433 : vector<8x128xf32>
    %435 = vector.extract_strided_slice %244 {offsets = [56, 0], sizes = [8, 384], strides = [1, 1]} : vector<64x384xf32> to vector<8x384xf32>
    %cst_69 = arith.constant dense<0.000000e+00> : vector<8x384xf32>
    %436 = tpu.matmul %434, %235, %cst_69 {dimension_numbers = #tpu.dot_dimension_numbers<[1], [0], [0], [1], [0, 0, 1, 1], [], []>} : vector<8x128xf32>, vector<128x384xf32>, vector<8x384xf32> -> vector<8x384xf32>
    %437 = vector.extract_strided_slice %435 {offsets = [0, 0], sizes = [8, 128], strides = [1, 1]} : vector<8x384xf32> to vector<8x128xf32>
    %438 = vector.extract_strided_slice %436 {offsets = [0, 0], sizes = [8, 128], strides = [1, 1]} : vector<8x384xf32> to vector<8x128xf32>
    %439 = arith.addf %437, %438 : vector<8x128xf32>
    %440 = arith.negf %439 : vector<8x128xf32>
    %441 = math.exp %440 : vector<8x128xf32>
    %cst_70 = arith.constant 1.000000e+00 : f32
    %442 = vector.broadcast %cst_70 : f32 to vector<8x128xf32>
    %443 = arith.addf %442, %441 : vector<8x128xf32>
    %444 = arith.divf %442, %443 : vector<8x128xf32>
    %445 = vector.extract_strided_slice %435 {offsets = [0, 128], sizes = [8, 128], strides = [1, 1]} : vector<8x384xf32> to vector<8x128xf32>
    %446 = vector.extract_strided_slice %436 {offsets = [0, 128], sizes = [8, 128], strides = [1, 1]} : vector<8x384xf32> to vector<8x128xf32>
    %447 = arith.addf %445, %446 : vector<8x128xf32>
    %448 = arith.negf %447 : vector<8x128xf32>
    %449 = math.exp %448 : vector<8x128xf32>
    %cst_71 = arith.constant 1.000000e+00 : f32
    %450 = vector.broadcast %cst_71 : f32 to vector<8x128xf32>
    %451 = arith.addf %450, %449 : vector<8x128xf32>
    %452 = arith.divf %450, %451 : vector<8x128xf32>
    %453 = vector.extract_strided_slice %435 {offsets = [0, 256], sizes = [8, 128], strides = [1, 1]} : vector<8x384xf32> to vector<8x128xf32>
    %454 = vector.extract_strided_slice %436 {offsets = [0, 256], sizes = [8, 128], strides = [1, 1]} : vector<8x384xf32> to vector<8x128xf32>
    %455 = arith.addf %454, %241 : vector<8x128xf32>
    %456 = arith.mulf %444, %455 : vector<8x128xf32>
    %457 = arith.addf %453, %456 : vector<8x128xf32>
    %458 = math.tanh %457 : vector<8x128xf32>
    %459 = arith.subf %434, %458 : vector<8x128xf32>
    %460 = arith.mulf %452, %459 : vector<8x128xf32>
    %461 = arith.addf %458, %460 : vector<8x128xf32>
    %c0_72 = arith.constant 0 : index
    %c0_73 = arith.constant 0 : index
    %462 = vector.load %arg2[%c0_72, %c0_73] : memref<136x128xf32, #tpu.memory_space<vmem>>, vector<128x128xf32>
    %c128_74 = arith.constant 128 : index
    %c0_75 = arith.constant 0 : index
    %463 = vector.load %arg2[%c128_74, %c0_75] : memref<136x128xf32, #tpu.memory_space<vmem>>, vector<1x128xf32>
    %cst_76 = arith.constant dense<0.000000e+00> : vector<8x128xf32>
    %464 = tpu.matmul %461, %462, %cst_76 {dimension_numbers = #tpu.dot_dimension_numbers<[1], [0], [0], [1], [0, 0, 1, 1], [], []>} : vector<8x128xf32>, vector<128x128xf32>, vector<8x128xf32> -> vector<8x128xf32>
    %465 = vector.broadcast %463 : vector<1x128xf32> to vector<8x128xf32>
    %466 = arith.addf %464, %465 : vector<8x128xf32>
    %c0_77 = arith.constant 0 : index
    %c0_78 = arith.constant 0 : index
    %467 = vector.load %arg3[%c0_77, %c0_78] : memref<8x128xf32, #tpu.memory_space<vmem>>, vector<8x128xf32>
    tpu.vector_store %arg3[%c0_77, %c0_78], %466 {strides = array<i32>} : memref<8x128xf32, #tpu.memory_space<vmem>>, vector<8x128xf32>,
    return
  }
}

</mosaic_0001>

<bundles_post_ra>
// kernel: forward.1
= control target key start
LH: loop header
LB: loop body
LE: loop exit
PB: predicated region body
PF: predicated region fallthrough
CT: control target
= control target key end

     0   :  { %8 = vsyncpa [#allocation3], 0  ;;  %s6771_s0 = inlined_call_operand.vmem [shape: f32[64,128], index: 0, kind: input, shape index: {}]   ;;  %s6772_s1 = inlined_call_operand.hbm [shape: f32[2,272,384], index: 1, kind: input, shape index: {}]   ;;  %s6773_s2 = inlined_call_operand.hbm [shape: f32[136,128], index: 2, kind: input, shape index: {}]   ;;  %s6774_s3 = inlined_call_operand.vmem [shape: f32[8,128], index: 3, kind: output, shape index: {}]  }
   0x1   :  { %9 = vsyncpa [#allocation5], 0  ;;  %s5791_s12 = smov [#allocation2]   ;;  %s5743_s16 = scalar_lea.hbm %s6772_s1, 26112 }
   0x2   :  { %s17_s13 = sshll.u32 %s5791_s12, 4  ;;  %p5744_p0 = scmp.ne.s32.totalorder %s6772_s1, %s5743_s16  ;;  %s18_s13 = int_to_ptr.vmem [resolvable:$true] %s17_s13 }
   0x3   :  { %p5747_p1 = scmp.lt.u32.totalorder %s5743_s16, %s6772_s1 }
   0x5   :  { %p5749_p2 = pnand %p5747_p1, %p5744_p0 }
   0x7   :  { %5752 = shalt.err (!%p5749_p2)
}
   0x8   :  { %s5753_s21 = scalar_lea.vmem %s18_s13, 26112  ;;  %p5758_p4 = scmp.lt.s32.totalorder %s18_s13, %s18_s13 }
   0x9   :  { %p5754_p3 = scmp.ne.s32.totalorder %s18_s13, %s5753_s21  ;;  %p5759_p5 = scmp.lt.s32.totalorder %s5753_s21, %s5753_s21 }
   0xb   :  { %p5760_p6 = por %p5759_p5, %p5758_p4 }
   0xd   :  { %p5761_p7 = pnand %p5760_p6, %p5754_p3 }
   0xf   :  { %5764 = shalt.err (!%p5761_p7)
}
  0x10   :  { %s5792_s22 = smov 384   ;;  %s5793_s23 = smov 24  }
  0x11   :  { %23 = dma.hbm_to_vmem [thread:$0]  %s6772_s1, 26112, %s18_s13, [#allocation3], %s5792_s22, %s5792_s22, %s5793_s23  }
  0x12   :  { %s5794_s26 = smov [#allocation4]   ;;  %s5765_s30 = scalar_lea.hbm %s6773_s2, 2176 }
  0x13   :  { %s29_s27 = sshll.u32 %s5794_s26, 4  ;;  %p5766_p8 = scmp.ne.s32.totalorder %s6773_s2, %s5765_s30  ;;  %s30_s27 = int_to_ptr.vmem [resolvable:$true] %s29_s27 }
  0x14   :  { %p5769_p9 = scmp.lt.u32.totalorder %s5765_s30, %s6773_s2 }
  0x16   :  { %p5771_p10 = pnand %p5769_p9, %p5766_p8 }
  0x18   :  { %5774 = shalt.err (!%p5771_p10)
}
  0x19   :  { %s5775_s8 = scalar_lea.vmem %s30_s27, 2176  ;;  %p5780_p12 = scmp.lt.s32.totalorder %s30_s27, %s30_s27 }
  0x1a   :  { %p5776_p11 = scmp.ne.s32.totalorder %s30_s27, %s5775_s8  ;;  %p5781_p13 = scmp.lt.s32.totalorder %s5775_s8, %s5775_s8 }
  0x1c   :  { %p5782_p0 = por %p5781_p13, %p5780_p12 }
  0x1e   :  { %p5783_p1 = pnand %p5782_p0, %p5776_p11 }
  0x20   :  { %5786 = shalt.err (!%p5783_p1)
}
  0x21   :  { %s5795_s1 = smov 128   ;;  %s5796_s9 = smov 8  }
  0x22   :  { %35 = dma.hbm_to_vmem [thread:$0]  %s6773_s2, 2176, %s30_s27, [#allocation5], %s5795_s1, %s5795_s1, %s5796_s9  }
  0x23   :  { %5787 = dma.done.wait [#allocation3], 26112  }
  0x24   :  { %5788 = vsyncadd [#allocation3], 4294941184 }
  0x25   :  { %5789 = dma.done.wait [#allocation5], 2176  }
  0x26   :  { %5790 = vsyncadd [#allocation5], 4294965120  ;;  %v5797_v0 = vmov 0.0   ;;  %v51_v1 = vld [vmem:[#allocation2 + $0x8] sm:$0xff]  ;;  %v54_v2 = vld [vmem:[#allocation2 + $0x20] sm:$0xff]  ;;  %vm5799_vm0 = vmmov 0  }
  0x27   :  { %229 = vmatprep.mubr.f32.mxu0 %v5797_v0  ;;  %v50_v3 = vld [vmem:[#allocation2] sm:$0xff]  ;;  %v4461_v4 = vpack.c.bf16 %v54_v2, %v51_v1  ;;  %v53_v5 = vld [vmem:[#allocation2 + $0x18] sm:$0xff]  ;;  %v60_v7 = vld [vmem:[#allocation2 + $0x50] sm:$0xff] }
  0x28   :  { %v57_v6 = vld [vmem:[#allocation2 + $0x38] sm:$0xff]  ;;  %v4463_v8 = vpack.c.bf16 %v53_v5, %v50_v3  ;;  %v56_v10 = vld [vmem:[#allocation2 + $0x30] sm:$0xff]  ;;  %v59_v11 = vld [vmem:[#allocation2 + $0x48] sm:$0xff] }
  0x29   :  { %v4465_v9 = vpack.c.bf16 %v60_v7, %v57_v6  ;;  %v63_v12 = vld [vmem:[#allocation2 + $0x68] sm:$0xff]  ;;  %4462 = vmatprep.subr.bf16.mxu0 %v4461_v4  ;;  %v66_v13 = vld [vmem:[#allocation2 + $0x80] sm:$0xff]  ;;  %v4467_v14 = vpack.c.bf16 %v59_v11, %v56_v10  ;;  %v65_v17 = vld [vmem:[#allocation2 + $0x78] sm:$0xff] }
  0x2a   :  { %4464 = vmatpush1.bf16.msra.mxu0 %v4463_v8  ;;  %v4469_v15 = vpack.c.bf16 %v66_v13, %v63_v12  ;;  %v62_v16 = vld [vmem:[#allocation2 + $0x60] sm:$0xff]  ;;  %v69_v18 = vld [vmem:[#allocation2 + $0x98] sm:$0xff]  ;;  %v72_v19 = vld [vmem:[#allocation2 + $0xb0] sm:$0xff] }
  0x2b   :  { %4466 = vmatprep.subr.bf16.mxu0 %v4465_v9  ;;  %v4471_v20 = vpack.c.bf16 %v65_v17, %v62_v16  ;;  %v68_v21 = vld [vmem:[#allocation2 + $0x90] sm:$0xff]  ;;  %v4473_v22 = vpack.c.bf16 %v72_v19, %v69_v18  ;;  %v71_v23 = vld [vmem:[#allocation2 + $0xa8] sm:$0xff]  ;;  %v78_v27 = vld [vmem:[#allocation2 + $0xe0] sm:$0xff] }
  0x2c   :  { %v52_v24 = vld [vmem:[#allocation2 + $0x10] sm:$0xff]  ;;  %v55_v25 = vld [vmem:[#allocation2 + $0x28] sm:$0xff]  ;;  %v58_v29 = vld [vmem:[#allocation2 + $0x40] sm:$0xff]  ;;  %v4475_v31 = vpack.c.bf16 %v71_v23, %v68_v21 }
  0x2d   :  { %v75_v26 = vld [vmem:[#allocation2 + $0xc8] sm:$0xff]  ;;  %v4493_v28 = vpack.c.bf16 %v55_v25, %v52_v24  ;;  %v61_v30 = vld [vmem:[#allocation2 + $0x58] sm:$0xff]  ;;  %v74_v32 = vld [vmem:[#allocation2 + $0xc0] sm:$0xff] }
  0x2e   :  { %4468 = vmatpush1.bf16.msra.mxu0 %v4467_v14  ;;  %v4497_v33 = vpack.c.bf16 %v61_v30, %v58_v29  ;;  %v4477_v34 = vpack.c.bf16 %v78_v27, %v75_v26  ;;  %v77_v35 = vld [vmem:[#allocation2 + $0xd8] sm:$0xff]  ;;  %v5848_v36 = vld [vmem:[%s6771_s0] sm:$0xff]  ;;  %v64_v37 = vld [vmem:[#allocation2 + $0x70] sm:$0xff] }
  0x2f   :  { %4470 = vmatprep.subr.bf16.mxu0 %v4469_v15  ;;  %4494 = vmatprep.subr.bf16.mxu1 %v4493_v28  ;;  %v81_v38 = vld [vmem:[#allocation2 + $0xf8] sm:$0xff]  ;;  %v84_v39 = vld [vmem:[#allocation2 + $0x110] sm:$0xff]  ;;  %v67_v40 = vld [vmem:[#allocation2 + $0x88] sm:$0xff]  ;;  %v4479_v42 = vpack.c.bf16 %v77_v35, %v74_v32 }
  0x30   :  { %4496 = vmatpush3.bf16.msra.mxu1 %v4493_v28  ;;  %3810 = vmatprep.mubr.f32.mxu1 %v5848_v36  ;;  %v4501_v41 = vpack.c.bf16 %v67_v40, %v64_v37  ;;  %v70_v43 = vld [vmem:[#allocation2 + $0xa0] sm:$0xff]  ;;  %v73_v44 = vld [vmem:[#allocation2 + $0xb8] sm:$0xff]  ;;  %v4481_v45 = vpack.c.bf16 %v84_v39, %v81_v38  ;;  %v80_v46 = vld [vmem:[#allocation2 + $0xf0] sm:$0xff]  ;;  %v5798_v40 = vmov 0.0|0.0  }
  0x31   :  { %4498 = vmatprep.subr.bf16.mxu1 %v4497_v33  ;;  %v83_v47 = vld [vmem:[#allocation2 + $0x108] sm:$0xff]  ;;  %v90_v49 = vld [vmem:[#allocation2 + $0x140] sm:$0xff]  ;;  %v4505_v50 = vpack.c.bf16 %v73_v44, %v70_v43  ;;  %v76_v51 = vld [vmem:[#allocation2 + $0xd0] sm:$0xff] }
  0x32   :  { %4472 = vmatpush1.bf16.msra.mxu0 %v4471_v20  ;;  %v87_v48 = vld [vmem:[#allocation2 + $0x128] sm:$0xff]  ;;  %v4483_v53 = vpack.c.bf16 %v83_v47, %v80_v46  ;;  %v86_v55 = vld [vmem:[#allocation2 + $0x120] sm:$0xff]  ;;  %v89_v56 = vld [vmem:[#allocation2 + $0x138] sm:$0xff] }
  0x33   :  { %4474 = vmatprep.subr.bf16.mxu0 %v4473_v22  ;;  %v79_v52 = vld [vmem:[#allocation2 + $0xe8] sm:$0xff]  ;;  %v4485_v54 = vpack.c.bf16 %v90_v49, %v87_v48  ;;  %v93_v57 = vld [vmem:[#allocation2 + $0x158] sm:$0xff]  ;;  %v96_v58 = vld [vmem:[#allocation2 + $0x170] sm:$0xff]  ;;  %v4487_v62 = vpack.c.bf16 %v89_v56, %v86_v55 }
  0x34   :  { %4500 = vmatpush3.bf16.msra.mxu1 %v4497_v33  ;;  %v4509_v59 = vpack.c.bf16 %v79_v52, %v76_v51  ;;  %v82_v60 = vld [vmem:[#allocation2 + $0x100] sm:$0xff]  ;;  %v85_v61 = vld [vmem:[#allocation2 + $0x118] sm:$0xff]  ;;  %v4489_v63 = vpack.c.bf16 %v96_v58, %v93_v57  ;;  %v92_v1 = vld [vmem:[#allocation2 + $0x150] sm:$0xff] }
  0x35   :  { %4502 = vmatprep.subr.bf16.mxu1 %v4501_v41  ;;  %v95_v2 = vld [vmem:[#allocation2 + $0x168] sm:$0xff]  ;;  %v102_v4 = vld [vmem:[#allocation2 + $0x1a0] sm:$0xff]  ;;  %v4513_v5 = vpack.c.bf16 %v85_v61, %v82_v60  ;;  %v88_v6 = vld [vmem:[#allocation2 + $0x130] sm:$0xff] }
  0x36   :  { %4476 = vmatpush1.bf16.msra.mxu0 %v4475_v31  ;;  %v99_v3 = vld [vmem:[#allocation2 + $0x188] sm:$0xff]  ;;  %v4491_v8 = vpack.c.bf16 %v95_v2, %v92_v1  ;;  %v98_v10 = vld [vmem:[#allocation2 + $0x180] sm:$0xff]  ;;  %v101_v11 = vld [vmem:[#allocation2 + $0x198] sm:$0xff] }
  0x37   :  { %4478 = vmatprep.subr.bf16.mxu0 %v4477_v34  ;;  %v91_v7 = vld [vmem:[#allocation2 + $0x148] sm:$0xff]  ;;  %v5851_v9 = vpack.c.bf16 %v102_v4, %v99_v3  ;;  %v105_v12 = vld [vmem:[#allocation2 + $0x1b8] sm:$0xff]  ;;  %v108_v13 = vld [vmem:[#allocation2 + $0x1d0] sm:$0xff]  ;;  %v5853_v17 = vpack.c.bf16 %v101_v11, %v98_v10 }
  0x38   :  { %4504 = vmatpush3.bf16.msra.mxu1 %v4501_v41  ;;  %v4517_v14 = vpack.c.bf16 %v91_v7, %v88_v6  ;;  %v94_v15 = vld [vmem:[#allocation2 + $0x160] sm:$0xff]  ;;  %v97_v16 = vld [vmem:[#allocation2 + $0x178] sm:$0xff]  ;;  %v5856_v18 = vpack.c.bf16 %v108_v13, %v105_v12  ;;  %v104_v19 = vld [vmem:[#allocation2 + $0x1b0] sm:$0xff] }
  0x39   :  { %4506 = vmatprep.subr.bf16.mxu1 %v4505_v50  ;;  %v107_v20 = vld [vmem:[#allocation2 + $0x1c8] sm:$0xff]  ;;  %v114_v22 = vld [vmem:[#allocation2 + $0x200] sm:$0xff]  ;;  %v4521_v23 = vpack.c.bf16 %v97_v16, %v94_v15  ;;  %v113_v28 = vld [vmem:[#allocation2 + $0x1f8] sm:$0xff] }
  0x3a   :  { %4480 = vmatpush1.bf16.msra.mxu0 %v4479_v42  ;;  %v111_v21 = vld [vmem:[#allocation2 + $0x1e8] sm:$0xff]  ;;  %v5864_v25 = vpack.c.bf16 %v107_v20, %v104_v19  ;;  %v110_v27 = vld [vmem:[#allocation2 + $0x1e0] sm:$0xff]  ;;  %v117_v29 = vld [vmem:[#allocation2 + $0x218] sm:$0xff] }
  0x3b   :  { %4482 = vmatprep.subr.bf16.mxu0 %v4481_v45  ;;  %v43_v24 = vld [vmem:[%s6771_s0 + $0x8] sm:$0xff]  ;;  %v5867_v26 = vpack.c.bf16 %v114_v22, %v111_v21  ;;  %v120_v30 = vld [vmem:[#allocation2 + $0x230] sm:$0xff]  ;;  %v5874_v34 = vpack.c.bf16 %v113_v28, %v110_v27  ;;  %v126_v39 = vld [vmem:[#allocation2 + $0x260] sm:$0xff] }
  0x3c   :  { %4508 = vmatpush3.bf16.msra.mxu1 %v4505_v50  ;;  %v100_v31 = vld [vmem:[#allocation2 + $0x190] sm:$0xff]  ;;  %v103_v32 = vld [vmem:[#allocation2 + $0x1a8] sm:$0xff]  ;;  %v5877_v35 = vpack.c.bf16 %v120_v30, %v117_v29  ;;  %v106_v42 = vld [vmem:[#allocation2 + $0x1c0] sm:$0xff] }
  0x3d   :  { %4510 = vmatprep.subr.bf16.mxu1 %v4509_v59  ;;  %v44_v33 = vld [vmem:[%s6771_s0 + $0x10] sm:$0xff]  ;;  %v119_v37 = vld [vmem:[#allocation2 + $0x228] sm:$0xff]  ;;  %v5880_v41 = vpack.c.bf16 %v103_v32, %v100_v31  ;;  %v109_v43 = vld [vmem:[#allocation2 + $0x1d8] sm:$0xff] }
  0x3e   :  { %4484 = vmatpush1.bf16.msra.mxu0 %v4483_v53  ;;  %v123_v38 = vld [vmem:[#allocation2 + $0x248] sm:$0xff]  ;;  %v45_v44 = vld [vmem:[%s6771_s0 + $0x18] sm:$0xff]  ;;  %v122_v47 = vld [vmem:[#allocation2 + $0x240] sm:$0xff]  ;;  %v5893_v51 = vpack.c.bf16 %v109_v43, %v106_v42 }
  0x3f   :  { %4486 = vmatprep.subr.bf16.mxu0 %v4485_v54  ;;  %v5890_v46 = vpack.c.bf16 %v126_v39, %v123_v38  ;;  %v125_v48 = vld [vmem:[#allocation2 + $0x258] sm:$0xff]  ;;  %v132_v50 = vld [vmem:[#allocation2 + $0x290] sm:$0xff]  ;;  %v115_v53 = vld [vmem:[#allocation2 + $0x208] sm:$0xff] }
  0x40   :  { %4512 = vmatpush3.bf16.msra.mxu1 %v4509_v59  ;;  %v129_v49 = vld [vmem:[#allocation2 + $0x278] sm:$0xff]  ;;  %v112_v52 = vld [vmem:[#allocation2 + $0x1f0] sm:$0xff]  ;;  %v46_v54 = vld [vmem:[%s6771_s0 + $0x20] sm:$0xff]  ;;  %v5901_v55 = vpack.c.bf16 %v125_v48, %v122_v47 }
  0x41   :  { %4514 = vmatprep.subr.bf16.mxu1 %v4513_v5  ;;  %v5904_v56 = vpack.c.bf16 %v132_v50, %v129_v49  ;;  %v128_v57 = vld [vmem:[#allocation2 + $0x270] sm:$0xff]  ;;  %v131_v58 = vld [vmem:[#allocation2 + $0x288] sm:$0xff]  ;;  %v138_v60 = vld [vmem:[#allocation2 + $0x2c0] sm:$0xff]  ;;  %v5907_v61 = vpack.c.bf16 %v115_v53, %v112_v52 }
  0x42   :  { %4488 = vmatpush1.bf16.msra.mxu0 %v4487_v62  ;;  %v135_v59 = vld [vmem:[#allocation2 + $0x2a8] sm:$0xff]  ;;  %v118_v62 = vld [vmem:[#allocation2 + $0x220] sm:$0xff]  ;;  %v5915_v2 = vpack.c.bf16 %v131_v58, %v128_v57  ;;  %v48_v3 = vld [vmem:[%s6771_s0 + $0x30] sm:$0xff] }
  0x43   :  { %4490 = vmatprep.subr.bf16.mxu0 %v4489_v63  ;;  %v121_v63 = vld [vmem:[#allocation2 + $0x238] sm:$0xff]  ;;  %v47_v1 = vld [vmem:[%s6771_s0 + $0x28] sm:$0xff]  ;;  %v5921_v4 = vpack.c.bf16 %v138_v60, %v135_v59  ;;  %v124_v11 = vld [vmem:[#allocation2 + $0x250] sm:$0xff] }
  0x44   :  { %4516 = vmatpush3.bf16.msra.mxu1 %v4513_v5  ;;  %v134_v5 = vld [vmem:[#allocation2 + $0x2a0] sm:$0xff]  ;;  %v137_v6 = vld [vmem:[#allocation2 + $0x2b8] sm:$0xff]  ;;  %v5924_v10 = vpack.c.bf16 %v121_v63, %v118_v62  ;;  %v127_v12 = vld [vmem:[#allocation2 + $0x268] sm:$0xff] }
  0x45   :  { %4518 = vmatprep.subr.bf16.mxu1 %v4517_v14  ;;  %v141_v7 = vld [vmem:[#allocation2 + $0x2d8] sm:$0xff]  ;;  %v5929_v13 = vpack.c.bf16 %v137_v6, %v134_v5  ;;  %v140_v16 = vld [vmem:[#allocation2 + $0x2d0] sm:$0xff]  ;;  %v143_v19 = vld [vmem:[#allocation2 + $0x2e8] sm:$0xff]  ;;  %v5938_v20 = vpack.c.bf16 %v127_v12, %v124_v11 }
  0x46   :  { %4492 = vmatpush1.bf16.msra.mxu0 %v4491_v8  ;;  %v144_v8 = vld [vmem:[#allocation2 + $0x2f0] sm:$0xff]  ;;  %v130_v21 = vld [vmem:[#allocation2 + $0x280] sm:$0xff]  ;;  %v133_v22 = vld [vmem:[#allocation2 + $0x298] sm:$0xff] }
  0x47   :  { %4526 = vmatprep.subr.bf16.mxu0 %v5851_v9  ;;  %v5935_v15 = vpack.c.bf16 %v144_v8, %v141_v7  ;;  %v136_v27 = vld [vmem:[#allocation2 + $0x2b0] sm:$0xff]  ;;  %v139_v28 = vld [vmem:[#allocation2 + $0x2c8] sm:$0xff]  ;;  %v142_v30 = vld [vmem:[#allocation2 + $0x2e0] sm:$0xff] }
  0x48   :  { %4520 = vmatpush3.bf16.msra.mxu1 %v4517_v14  ;;  %v49_v14 = vld [vmem:[%s6771_s0 + $0x38] sm:$0xff]  ;;  %v5956_v29 = vpack.c.bf16 %v139_v28, %v136_v27  ;;  %v147_v38 = vld [vmem:[#allocation2 + $0x300] ss:$8 sm:$0x7] }
  0x49   :  { %230 = vmatmul.mubr.f32.vlgmr.msra.gmra.mrb[0].mxu0 %v5848_v36  ;;  %4522 = vmatprep.subr.bf16.mxu1 %v4521_v23  ;;  %v116_v36 = vld [vmem:[#allocation2 + $0x210] sm:$0xff]  ;;  %v145_v31 = vld [vmem:[#allocation2 + $0x2f8] sm:$0xff] }
  0x4a   :  { %4528 = vmatpush1.bf16.msra.mxu0 %v5853_v17  ;;  %235 = vmatprep.mubr.f32.mxu0 %v5797_v0  ;;  %v5887_v45 = vpack.c.bf16 %v119_v37, %v116_v36  ;;  %v5964_v32 = vpack.c.bf16 %v145_v31, %v142_v30  ;;  %v6033_v27 = vld [vmem:[#allocation2 + $0x318] ss:$0 sm:$0xff] }
  0x4b   :  { %4530 = vmatprep.subr.bf16.mxu0 %v5856_v18 }
  0x4c   :  { %4524 = vmatpush3.bf16.msra.mxu1 %v4521_v23  ;;  %v5945_v23 = vpack.c.bf16 %v143_v19, %v140_v16 }
  0x4d   :  { %236 = vmatmul.mubr.f32.gmra.mrb[2].mxu0 %v43_v24  ;;  %4557 = vmatprep.subr.bf16.mxu1 %v5798_v40 }
  0x4e   :  { %4532 = vmatpush1.bf16.msra.mxu0 %v5864_v25  ;;  %241 = vmatprep.mubr.f32.mxu0 %v5797_v0 }
  0x4f   :  { %4534 = vmatprep.subr.bf16.mxu0 %v5867_v26  ;;  %3811 = vmatmul.mubr.f32.vlgmr.msra.gmra.mrb[0].mxu1 %v43_v24  ;;  %v5949_v24 = vpack.c.bf16 %v133_v22, %v130_v21 }
  0x50   :  { %4559 = vmatpush3.bf16.msra.mxu1 %v5880_v41  ;;  %3813 = vmatprep.mubr.f32.mxu1 %v44_v33 }
  0x51   :  { %242 = vmatmul.mubr.f32.gmra.mrb[4].mxu0 %v44_v33  ;;  %4560 = vmatprep.subr.bf16.mxu1 %v5798_v40  ;;  %v150_v33 = vlaneseq }
  0x52   :  { %4536 = vmatpush1.bf16.msra.mxu0 %v5874_v34  ;;  %247 = vmatprep.mubr.f32.mxu0 %v5797_v0 }
  0x53   :  { %4538 = vmatprep.subr.bf16.mxu0 %v5877_v35  ;;  %3814 = vmatmul.mubr.f32.gmra.mrb[2].mxu1 %v45_v44  ;;  %v6002_v36 = vshrl.u32 %v150_v33, 7 }
  0x54   :  { %4562 = vmatpush3.bf16.msra.mxu1 %v5893_v51  ;;  %3816 = vmatprep.mubr.f32.mxu1 %v46_v54 }
  0x55   :  { %248 = vmatmul.mubr.f32.gmra.mrb[6].mxu0 %v45_v44  ;;  %4563 = vmatprep.subr.bf16.mxu1 %v5798_v40  ;;  %v160_v37 = vsub.s32 2, %v6002_v36  ;;  %v152_v63 = vsub.s32 0, %v6002_v36  ;;  %v156_v6 = vsub.s32 1, %v6002_v36 }
  0x56   :  { %4540 = vmatpush1.bf16.msra.mxu0 %v5887_v45  ;;  %253 = vmatprep.mubr.f32.mxu0 %v5797_v0 }
  0x57   :  { %4542 = vmatprep.subr.bf16.mxu0 %v5890_v46  ;;  %3817 = vmatmul.mubr.f32.gmra.mrb[4].mxu1 %v47_v1  ;;  %v161_v39 = vrot.slane %v147_v38, %v160_v37  ;;  %v6030_v11 = vrot.slane %v147_v38, %v156_v6 }
  0x58   :  { %4565 = vmatpush3.bf16.msra.mxu1 %v5907_v61  ;;  %3819 = vmatprep.mubr.f32.mxu1 %v48_v3 }
  0x59   :  { %254 = vmatmul.mubr.f32.gmra.mrb[8].mxu0 %v46_v54  ;;  %4566 = vmatprep.subr.bf16.mxu1 %v5798_v40 }
  0x5a   :  { %4544 = vmatpush1.bf16.msra.mxu0 %v5901_v55  ;;  %259 = vmatprep.mubr.f32.mxu0 %v5797_v0 }
  0x5b   :  { %4546 = vmatprep.subr.bf16.mxu0 %v5904_v56  ;;  %3820 = vmatmul.mubr.f32.gmra.mrb[6].mxu1 %v49_v14 }
  0x5c   :  { %4568 = vmatpush3.bf16.msra.mxu1 %v5924_v10  ;;  %3854 = vmatprep.mubr.msk.f32.mxu1 %vm5799_vm0, %v5797_v0 }
  0x5d   :  { %260 = vmatmul.mubr.f32.gmra.mrb[10].mxu0 %v47_v1  ;;  %4569 = vmatprep.subr.bf16.mxu1 %v5798_v40  ;;  %v6024_v1 = vrot.slane %v147_v38, %v152_v63 }
  0x5e   :  { %4548 = vmatpush1.bf16.msra.mxu0 %v5915_v2  ;;  %265 = vmatprep.mubr.f32.mxu0 %v5797_v0 }
  0x5f   :  { %4550 = vmatprep.subr.bf16.mxu0 %v5921_v4 }
  0x60   :  { %4571 = vmatpush3.bf16.msra.mxu1 %v5938_v20 }
  0x61   :  { %266 = vmatmul.mubr.f32.gmra.mrb[12].mxu0 %v48_v3  ;;  %4572 = vmatprep.subr.bf16.mxu1 %v5798_v40 }
  0x62   :  { %4552 = vmatpush1.bf16.msra.mxu0 %v5929_v13  ;;  %271 = vmatprep.mubr.f32.mxu0 %v5797_v0 }
  0x63   :  { %4554 = vmatprep.subr.bf16.mxu0 %v5935_v15 }
  0x64   :  { %4574 = vmatpush3.bf16.msra.mxu1 %v5949_v24 }
  0x65   :  { %272 = vmatmul.mubr.f32.gmra.mrb[14].mxu0 %v49_v14  ;;  %4575 = vmatprep.subr.bf16.mxu1 %v5798_v40 }
  0x66   :  { %4556 = vmatpush1.bf16.msra.mxu0 %v5945_v23  ;;  %447 = vmatprep.mubr.f32.mxu0 %v5797_v0 }
  0x67   :  { %4582 = vmatprep.subr.bf16.mxu0 %v5851_v9 }
  0x68   :  { %4577 = vmatpush3.bf16.msra.mxu1 %v5956_v29 }
  0x69   :  { %448 = vmatmul.mubr.f32.vlgmr.msra.gmra.mrb[0].mxu0 %v5797_v0  ;;  %4578 = vmatprep.subr.bf16.mxu1 %v5798_v40 }
  0x6a   :  { %4584 = vmatpush1.bf16.msra.mxu0 %v5853_v17  ;;  %609 = vmatprep.mubr.f32.mxu0 %v5797_v0 }
  0x6b   :  { %4586 = vmatprep.subr.bf16.mxu0 %v5856_v18 }
  0x6c   :  { %4580 = vmatpush3.bf16.msra.mxu1 %v5964_v32 }
  0x6d   :  { %4613 = vmatprep.subr.bf16.mxu1 %v5798_v40 }
  0x6e   :  { %4588 = vmatpush1.bf16.msra.mxu0 %v5864_v25 }
  0x6f   :  { %4590 = vmatprep.subr.bf16.mxu0 %v5867_v26  ;;  %3855 = vmatmul.mubr.f32.vlgmr.msra.gmra.mrb[8].mxu1 %v5797_v0 }
  0x70   :  { %4615 = vmatpush3.bf16.msra.mxu1 %v5880_v41  ;;  %3889 = vmatprep.mubr.msk.f32.mxu1 %vm5799_vm0, %v5797_v0 }
  0x71   :  { %4616 = vmatprep.subr.bf16.mxu1 %v5798_v40 }
  0x72   :  { %4592 = vmatpush1.bf16.msra.mxu0 %v5874_v34 }
  0x73   :  { %4594 = vmatprep.subr.bf16.mxu0 %v5877_v35 }
  0x74   :  { %4618 = vmatpush3.bf16.msra.mxu1 %v5893_v51 }
  0x75   :  { %4619 = vmatprep.subr.bf16.mxu1 %v5798_v40 }
  0x76   :  { %4596 = vmatpush1.bf16.msra.mxu0 %v5887_v45 }
  0x77   :  { %4598 = vmatprep.subr.bf16.mxu0 %v5890_v46 }
  0x78   :  { %4621 = vmatpush3.bf16.msra.mxu1 %v5907_v61 }
  0x79   :  { %4622 = vmatprep.subr.bf16.mxu1 %v5798_v40 }
  0x7a   :  { %4600 = vmatpush1.bf16.msra.mxu0 %v5901_v55 }
  0x7b   :  { %4602 = vmatprep.subr.bf16.mxu0 %v5904_v56 }
  0x7c   :  { %4624 = vmatpush3.bf16.msra.mxu1 %v5924_v10 }
  0x7d   :  { %4625 = vmatprep.subr.bf16.mxu1 %v5798_v40 }
  0x7e   :  { %4604 = vmatpush1.bf16.msra.mxu0 %v5915_v2 }
  0x7f   :  { %4606 = vmatprep.subr.bf16.mxu0 %v5921_v4 }
  0x80   :  { %4627 = vmatpush3.bf16.msra.mxu1 %v5938_v20 }
  0x81   :  { %4628 = vmatprep.subr.bf16.mxu1 %v5798_v40 }
  0x82   :  { %4608 = vmatpush1.bf16.msra.mxu0 %v5929_v13 }
  0x83   :  { %4610 = vmatprep.subr.bf16.mxu0 %v5935_v15 }
  0x84   :  { %4630 = vmatpush3.bf16.msra.mxu1 %v5949_v24 }
  0x85   :  { %4631 = vmatprep.subr.bf16.mxu1 %v5798_v40 }
  0x86   :  { %4612 = vmatpush1.bf16.msra.mxu0 %v5945_v23 }
  0x87   :  { %4638 = vmatprep.subr.bf16.mxu0 %v5851_v9 }
  0x88   :  { %4633 = vmatpush3.bf16.msra.mxu1 %v5956_v29 }
  0x89   :  { %4634 = vmatprep.subr.bf16.mxu1 %v5798_v40 }
  0x8c   :  { %4636 = vmatpush3.bf16.msra.mxu1 %v5964_v32 }
  0x8d   :  { %4669 = vmatprep.subr.bf16.mxu1 %v5798_v40 }
 0x122   :  { %v3812_v42 = vpop.f32.mrb[0].mxu1 }
 0x123   :  { %v6007_v43 = vadd.f32 %v3812_v42, %v161_v39  ;;  %v344_v44 = vpop.f32.mrb[1].mxu1 }
 0x124   :  { %v345_v33 = vadd.f32 %v344_v44, %v161_v39 }
 0x126   :  { %v3815_v47 = vpop.f32.mrb[2].mxu1 }
 0x127   :  { %v6009_v48 = vadd.f32 %v3815_v47, %v161_v39  ;;  %v354_v49 = vpop.f32.mrb[3].mxu1 }
 0x128   :  { %v6011_v50 = vadd.f32 %v354_v49, %v161_v39 }
 0x12a   :  { %v3818_v52 = vpop.f32.mrb[4].mxu1 }
 0x12b   :  { %v6013_v53 = vadd.f32 %v3818_v52, %v161_v39  ;;  %v364_v54 = vpop.f32.mrb[5].mxu1 }
 0x12c   :  { %v6015_v57 = vadd.f32 %v364_v54, %v161_v39 }
 0x12e   :  { %v3821_v58 = vpop.f32.mrb[6].mxu1 }
 0x12f   :  { %v6017_v59 = vadd.f32 %v3821_v58, %v161_v39  ;;  %v374_v60 = vpop.f32.mrb[7].mxu1 }
 0x130   :  { %v6019_v62 = vadd.f32 %v374_v60, %v161_v39 }
 0x13c   :  { %v449_v3 = vpop.f32.mrb[0].mxu0 }
 0x13d   :  { %v5509_v5 = vadd.f32 %v449_v3, %v6024_v1  ;;  %v451_v7 = vpop.f32.mrb[1].mxu0 }
 0x13e   :  { %v5510_v12 = vadd.f32 %v451_v7, %v6030_v11 }
 0x13f   :  { %v3408_v8 = vmul.f32 -1.442695, %v5509_v5 }
 0x140   :  { %v3409_v19 = vmul.f32 -1.442695, %v5510_v12 }
 0x141   :  { %5582 = vpow2.f32 %v3408_v8 }
 0x142   :  { %v520_v14 = vpop.f32.mrb[8].mxu1  ;;  %5584 = vpow2.f32 %v3409_v19 }
 0x143   :  { %v3856_v16 = vpop.f32.mrb[9].mxu1  ;;  %v538_v28 = vadd.f32 %v520_v14, %v6033_v27 }
 0x14b   :  { %v5583_v21 = vpop.eup %5582 }
 0x14c   :  { %v528_v22 = vadd.f32 1.0, %v5583_v21  ;;  %v5585_v30 = vpop.eup %5584 }
 0x14d   :  { %v535_v47 = vadd.f32 1.0, %v5585_v30 }
 0x14e   :  { %5586 = vrcp.f32 %v528_v22 }
 0x158   :  { %v5587_v31 = vpop.eup %5586 }
 0x159   :  { %v539_v42 = vmul.f32 %v5587_v31, %v538_v28 }
 0x15b   :  { %v540_v38 = vadd.f32 %v539_v42, %v345_v33 }
 0x15d   :  { %5588 = vtanh.f32 %v540_v38 }
 0x15e   :  { %5590 = vrcp.f32 %v535_v47 }
 0x167   :  { %v5589_v49 = vpop.eup %5588 }
 0x168   :  { %v542_v52 = vsub.f32 0.0, %v5589_v49  ;;  %v5591_v54 = vpop.eup %5590 }
 0x16a   :  { %v543_v58 = vmul.f32 %v5591_v54, %v542_v52 }
 0x16c   :  { %v6036_v60 = vadd.f32 %v5589_v49, %v543_v58 }
 0x16e   :  { %610 = vmatmul.mubr.f32.vlgmr.msra.gmra.mrb[2].mxu0 %v6036_v60  ;;  %3890 = vmatmul.mubr.f32.vlgmr.msra.gmra.mrb[10].mxu1 %v6036_v60 }
 0x16f   :  { %4640 = vmatpush1.bf16.msra.mxu0 %v5853_v17  ;;  %4671 = vmatpush3.bf16.msra.mxu1 %v5880_v41 }
 0x170   :  { %4642 = vmatprep.subr.bf16.mxu0 %v5856_v18  ;;  %4672 = vmatprep.subr.bf16.mxu1 %v5798_v40 }
 0x171   :  { %771 = vmatprep.mubr.f32.mxu0 %v5797_v0  ;;  %3924 = vmatprep.mubr.msk.f32.mxu1 %vm5799_vm0, %v5797_v0 }
 0x173   :  { %4644 = vmatpush1.bf16.msra.mxu0 %v5864_v25  ;;  %4674 = vmatpush3.bf16.msra.mxu1 %v5893_v51 }
 0x174   :  { %4646 = vmatprep.subr.bf16.mxu0 %v5867_v26  ;;  %4675 = vmatprep.subr.bf16.mxu1 %v5798_v40 }
 0x177   :  { %4648 = vmatpush1.bf16.msra.mxu0 %v5874_v34  ;;  %4677 = vmatpush3.bf16.msra.mxu1 %v5907_v61 }
 0x178   :  { %4650 = vmatprep.subr.bf16.mxu0 %v5877_v35  ;;  %4678 = vmatprep.subr.bf16.mxu1 %v5798_v40 }
 0x17b   :  { %4652 = vmatpush1.bf16.msra.mxu0 %v5887_v45  ;;  %4680 = vmatpush3.bf16.msra.mxu1 %v5924_v10 }
 0x17c   :  { %4654 = vmatprep.subr.bf16.mxu0 %v5890_v46  ;;  %4681 = vmatprep.subr.bf16.mxu1 %v5798_v40 }
 0x17f   :  { %4656 = vmatpush1.bf16.msra.mxu0 %v5901_v55  ;;  %4683 = vmatpush3.bf16.msra.mxu1 %v5938_v20 }
 0x180   :  { %4658 = vmatprep.subr.bf16.mxu0 %v5904_v56  ;;  %4684 = vmatprep.subr.bf16.mxu1 %v5798_v40 }
 0x183   :  { %4660 = vmatpush1.bf16.msra.mxu0 %v5915_v2  ;;  %4686 = vmatpush3.bf16.msra.mxu1 %v5949_v24 }
 0x184   :  { %4662 = vmatprep.subr.bf16.mxu0 %v5921_v4  ;;  %4687 = vmatprep.subr.bf16.mxu1 %v5798_v40 }
 0x187   :  { %4664 = vmatpush1.bf16.msra.mxu0 %v5929_v13  ;;  %4689 = vmatpush3.bf16.msra.mxu1 %v5956_v29 }
 0x188   :  { %4666 = vmatprep.subr.bf16.mxu0 %v5935_v15  ;;  %4690 = vmatprep.subr.bf16.mxu1 %v5798_v40 }
 0x18b   :  { %4668 = vmatpush1.bf16.msra.mxu0 %v5945_v23  ;;  %4692 = vmatpush3.bf16.msra.mxu1 %v5964_v32 }
 0x18c   :  { %4694 = vmatprep.subr.bf16.mxu0 %v5851_v9  ;;  %4725 = vmatprep.subr.bf16.mxu1 %v5798_v40 }
 0x241   :  { %v611_v39 = vpop.f32.mrb[2].mxu0  ;;  %v682_v44 = vpop.f32.mrb[10].mxu1 }
 0x242   :  { %v5511_v3 = vadd.f32 %v611_v39, %v6024_v1  ;;  %v613_v5 = vpop.f32.mrb[3].mxu0  ;;  %v3891_v7 = vpop.f32.mrb[11].mxu1  ;;  %v700_v22 = vadd.f32 %v682_v44, %v6033_v27 }
 0x243   :  { %v5512_v12 = vadd.f32 %v613_v5, %v6030_v11 }
 0x244   :  { %v3410_v8 = vmul.f32 -1.442695, %v5511_v3 }
 0x245   :  { %v3411_v14 = vmul.f32 -1.442695, %v5512_v12 }
 0x246   :  { %5592 = vpow2.f32 %v3410_v8 }
 0x247   :  { %5594 = vpow2.f32 %v3411_v14 }
 0x250   :  { %v5593_v16 = vpop.eup %5592 }
 0x251   :  { %v690_v19 = vadd.f32 1.0, %v5593_v16  ;;  %v5595_v21 = vpop.eup %5594 }
 0x252   :  { %v697_v33 = vadd.f32 1.0, %v5595_v21 }
 0x253   :  { %5596 = vrcp.f32 %v690_v19 }
 0x25d   :  { %v5597_v28 = vpop.eup %5596 }
 0x25e   :  { %v701_v30 = vmul.f32 %v5597_v28, %v700_v22 }
 0x260   :  { %v702_v31 = vadd.f32 %v701_v30, %v6007_v43 }
 0x262   :  { %5598 = vtanh.f32 %v702_v31 }
 0x263   :  { %5600 = vrcp.f32 %v697_v33 }
 0x26c   :  { %v5599_v42 = vpop.eup %5598 }
 0x26d   :  { %v704_v47 = vsub.f32 %v6036_v60, %v5599_v42  ;;  %v5601_v38 = vpop.eup %5600 }
 0x26f   :  { %v705_v49 = vmul.f32 %v5601_v38, %v704_v47 }
 0x271   :  { %v6080_v52 = vadd.f32 %v5599_v42, %v705_v49 }
 0x273   :  { %772 = vmatmul.mubr.f32.vlgmr.msra.gmra.mrb[4].mxu0 %v6080_v52  ;;  %3925 = vmatmul.mubr.f32.vlgmr.msra.gmra.mrb[12].mxu1 %v6080_v52 }
 0x274   :  { %4696 = vmatpush1.bf16.msra.mxu0 %v5853_v17  ;;  %4727 = vmatpush3.bf16.msra.mxu1 %v5880_v41 }
 0x275   :  { %4698 = vmatprep.subr.bf16.mxu0 %v5856_v18  ;;  %4728 = vmatprep.subr.bf16.mxu1 %v5798_v40 }
 0x276   :  { %933 = vmatprep.mubr.f32.mxu0 %v5797_v0  ;;  %3959 = vmatprep.mubr.msk.f32.mxu1 %vm5799_vm0, %v5797_v0 }
 0x278   :  { %4700 = vmatpush1.bf16.msra.mxu0 %v5864_v25  ;;  %4730 = vmatpush3.bf16.msra.mxu1 %v5893_v51 }
 0x279   :  { %4702 = vmatprep.subr.bf16.mxu0 %v5867_v26  ;;  %4731 = vmatprep.subr.bf16.mxu1 %v5798_v40 }
 0x27c   :  { %4704 = vmatpush1.bf16.msra.mxu0 %v5874_v34  ;;  %4733 = vmatpush3.bf16.msra.mxu1 %v5907_v61 }
 0x27d   :  { %4706 = vmatprep.subr.bf16.mxu0 %v5877_v35  ;;  %4734 = vmatprep.subr.bf16.mxu1 %v5798_v40 }
 0x280   :  { %4708 = vmatpush1.bf16.msra.mxu0 %v5887_v45  ;;  %4736 = vmatpush3.bf16.msra.mxu1 %v5924_v10 }
 0x281   :  { %4710 = vmatprep.subr.bf16.mxu0 %v5890_v46  ;;  %4737 = vmatprep.subr.bf16.mxu1 %v5798_v40 }
 0x284   :  { %4712 = vmatpush1.bf16.msra.mxu0 %v5901_v55  ;;  %4739 = vmatpush3.bf16.msra.mxu1 %v5938_v20 }
 0x285   :  { %4714 = vmatprep.subr.bf16.mxu0 %v5904_v56  ;;  %4740 = vmatprep.subr.bf16.mxu1 %v5798_v40 }
 0x288   :  { %4716 = vmatpush1.bf16.msra.mxu0 %v5915_v2  ;;  %4742 = vmatpush3.bf16.msra.mxu1 %v5949_v24 }
 0x289   :  { %4718 = vmatprep.subr.bf16.mxu0 %v5921_v4  ;;  %4743 = vmatprep.subr.bf16.mxu1 %v5798_v40 }
 0x28c   :  { %4720 = vmatpush1.bf16.msra.mxu0 %v5929_v13  ;;  %4745 = vmatpush3.bf16.msra.mxu1 %v5956_v29 }
 0x28d   :  { %4722 = vmatprep.subr.bf16.mxu0 %v5935_v15  ;;  %4746 = vmatprep.subr.bf16.mxu1 %v5798_v40 }
 0x290   :  { %4724 = vmatpush1.bf16.msra.mxu0 %v5945_v23  ;;  %4748 = vmatpush3.bf16.msra.mxu1 %v5964_v32 }
 0x291   :  { %4750 = vmatprep.subr.bf16.mxu0 %v5851_v9  ;;  %4781 = vmatprep.subr.bf16.mxu1 %v5798_v40 }
 0x346   :  { %v773_v43 = vpop.f32.mrb[4].mxu0  ;;  %v844_v54 = vpop.f32.mrb[12].mxu1 }
 0x347   :  { %v5513_v58 = vadd.f32 %v773_v43, %v6024_v1  ;;  %v775_v39 = vpop.f32.mrb[5].mxu0  ;;  %v3926_v44 = vpop.f32.mrb[13].mxu1  ;;  %v862_v16 = vadd.f32 %v844_v54, %v6033_v27 }
 0x348   :  { %v5514_v5 = vadd.f32 %v775_v39, %v6030_v11 }
 0x349   :  { %v3412_v3 = vmul.f32 -1.442695, %v5513_v58 }
 0x34a   :  { %v3413_v7 = vmul.f32 -1.442695, %v5514_v5 }
 0x34b   :  { %5602 = vpow2.f32 %v3412_v3 }
 0x34c   :  { %5604 = vpow2.f32 %v3413_v7 }
 0x355   :  { %v5603_v8 = vpop.eup %5602 }
 0x356   :  { %v852_v12 = vadd.f32 1.0, %v5603_v8  ;;  %v5605_v14 = vpop.eup %5604 }
 0x357   :  { %v859_v28 = vadd.f32 1.0, %v5605_v14 }
 0x358   :  { %5606 = vrcp.f32 %v852_v12 }
 0x362   :  { %v5607_v19 = vpop.eup %5606 }
 0x363   :  { %v863_v21 = vmul.f32 %v5607_v19, %v862_v16 }
 0x365   :  { %v864_v22 = vadd.f32 %v863_v21, %v6011_v50 }
 0x367   :  { %5608 = vtanh.f32 %v864_v22 }
 0x368   :  { %5610 = vrcp.f32 %v859_v28 }
 0x371   :  { %v5609_v30 = vpop.eup %5608 }
 0x372   :  { %v866_v31 = vsub.f32 %v6080_v52, %v5609_v30  ;;  %v5611_v33 = vpop.eup %5610 }
 0x374   :  { %v867_v42 = vmul.f32 %v5611_v33, %v866_v31 }
 0x376   :  { %v6124_v47 = vadd.f32 %v5609_v30, %v867_v42 }
 0x378   :  { %934 = vmatmul.mubr.f32.vlgmr.msra.gmra.mrb[6].mxu0 %v6124_v47  ;;  %3960 = vmatmul.mubr.f32.vlgmr.msra.gmra.mrb[14].mxu1 %v6124_v47 }
 0x379   :  { %4752 = vmatpush1.bf16.msra.mxu0 %v5853_v17  ;;  %4783 = vmatpush3.bf16.msra.mxu1 %v5880_v41 }
 0x37a   :  { %4754 = vmatprep.subr.bf16.mxu0 %v5856_v18  ;;  %4784 = vmatprep.subr.bf16.mxu1 %v5798_v40 }
 0x37b   :  { %1095 = vmatprep.mubr.f32.mxu0 %v5797_v0  ;;  %3994 = vmatprep.mubr.msk.f32.mxu1 %vm5799_vm0, %v5797_v0 }
 0x37d   :  { %4756 = vmatpush1.bf16.msra.mxu0 %v5864_v25  ;;  %4786 = vmatpush3.bf16.msra.mxu1 %v5893_v51 }
 0x37e   :  { %4758 = vmatprep.subr.bf16.mxu0 %v5867_v26  ;;  %4787 = vmatprep.subr.bf16.mxu1 %v5798_v40 }
 0x381   :  { %4760 = vmatpush1.bf16.msra.mxu0 %v5874_v34  ;;  %4789 = vmatpush3.bf16.msra.mxu1 %v5907_v61 }
 0x382   :  { %4762 = vmatprep.subr.bf16.mxu0 %v5877_v35  ;;  %4790 = vmatprep.subr.bf16.mxu1 %v5798_v40 }
 0x385   :  { %4764 = vmatpush1.bf16.msra.mxu0 %v5887_v45  ;;  %4792 = vmatpush3.bf16.msra.mxu1 %v5924_v10 }
 0x386   :  { %4766 = vmatprep.subr.bf16.mxu0 %v5890_v46  ;;  %4793 = vmatprep.subr.bf16.mxu1 %v5798_v40 }
 0x389   :  { %4768 = vmatpush1.bf16.msra.mxu0 %v5901_v55  ;;  %4795 = vmatpush3.bf16.msra.mxu1 %v5938_v20 }
 0x38a   :  { %4770 = vmatprep.subr.bf16.mxu0 %v5904_v56  ;;  %4796 = vmatprep.subr.bf16.mxu1 %v5798_v40 }
 0x38d   :  { %4772 = vmatpush1.bf16.msra.mxu0 %v5915_v2  ;;  %4798 = vmatpush3.bf16.msra.mxu1 %v5949_v24 }
 0x38e   :  { %4774 = vmatprep.subr.bf16.mxu0 %v5921_v4  ;;  %4799 = vmatprep.subr.bf16.mxu1 %v5798_v40 }
 0x391   :  { %4776 = vmatpush1.bf16.msra.mxu0 %v5929_v13  ;;  %4801 = vmatpush3.bf16.msra.mxu1 %v5956_v29 }
 0x392   :  { %4778 = vmatprep.subr.bf16.mxu0 %v5935_v15  ;;  %4802 = vmatprep.subr.bf16.mxu1 %v5798_v40 }
 0x395   :  { %4780 = vmatpush1.bf16.msra.mxu0 %v5945_v23  ;;  %4804 = vmatpush3.bf16.msra.mxu1 %v5964_v32 }
 0x396   :  { %4806 = vmatprep.subr.bf16.mxu0 %v5851_v9  ;;  %4837 = vmatprep.subr.bf16.mxu1 %v5798_v40 }
 0x44b   :  { %v935_v50 = vpop.f32.mrb[6].mxu0  ;;  %v1006_v38 = vpop.f32.mrb[14].mxu1 }
 0x44c   :  { %v5515_v49 = vadd.f32 %v935_v50, %v6024_v1  ;;  %v937_v43 = vpop.f32.mrb[7].mxu0  ;;  %v3961_v54 = vpop.f32.mrb[15].mxu1  ;;  %v1024_v8 = vadd.f32 %v1006_v38, %v6033_v27 }
 0x44d   :  { %v5516_v39 = vadd.f32 %v937_v43, %v6030_v11 }
 0x44e   :  { %v3414_v58 = vmul.f32 -1.442695, %v5515_v49 }
 0x44f   :  { %v3415_v44 = vmul.f32 -1.442695, %v5516_v39 }
 0x450   :  { %5612 = vpow2.f32 %v3414_v58 }
 0x451   :  { %5614 = vpow2.f32 %v3415_v44 }
 0x45a   :  { %v5613_v3 = vpop.eup %5612 }
 0x45b   :  { %v1014_v5 = vadd.f32 1.0, %v5613_v3  ;;  %v5615_v7 = vpop.eup %5614 }
 0x45c   :  { %v1021_v19 = vadd.f32 1.0, %v5615_v7 }
 0x45d   :  { %5616 = vrcp.f32 %v1014_v5 }
 0x467   :  { %v5617_v12 = vpop.eup %5616 }
 0x468   :  { %v1025_v14 = vmul.f32 %v5617_v12, %v1024_v8 }
 0x46a   :  { %v1026_v16 = vadd.f32 %v1025_v14, %v6009_v48 }
 0x46c   :  { %5618 = vtanh.f32 %v1026_v16 }
 0x46d   :  { %5620 = vrcp.f32 %v1021_v19 }
 0x476   :  { %v5619_v21 = vpop.eup %5618 }
 0x477   :  { %v1028_v22 = vsub.f32 %v6124_v47, %v5619_v21  ;;  %v5621_v28 = vpop.eup %5620 }
 0x479   :  { %v1029_v30 = vmul.f32 %v5621_v28, %v1028_v22 }
 0x47b   :  { %v6168_v31 = vadd.f32 %v5619_v21, %v1029_v30 }
 0x47d   :  { %1096 = vmatmul.mubr.f32.vlgmr.msra.gmra.mrb[8].mxu0 %v6168_v31  ;;  %3995 = vmatmul.mubr.f32.vlgmr.msra.gmra.mrb[16].mxu1 %v6168_v31 }
 0x47e   :  { %4808 = vmatpush1.bf16.msra.mxu0 %v5853_v17  ;;  %4839 = vmatpush3.bf16.msra.mxu1 %v5880_v41 }
 0x47f   :  { %4810 = vmatprep.subr.bf16.mxu0 %v5856_v18  ;;  %4840 = vmatprep.subr.bf16.mxu1 %v5798_v40 }
 0x480   :  { %1257 = vmatprep.mubr.f32.mxu0 %v5797_v0  ;;  %4029 = vmatprep.mubr.msk.f32.mxu1 %vm5799_vm0, %v5797_v0 }
 0x482   :  { %4812 = vmatpush1.bf16.msra.mxu0 %v5864_v25  ;;  %4842 = vmatpush3.bf16.msra.mxu1 %v5893_v51 }
 0x483   :  { %4814 = vmatprep.subr.bf16.mxu0 %v5867_v26  ;;  %4843 = vmatprep.subr.bf16.mxu1 %v5798_v40 }
 0x486   :  { %4816 = vmatpush1.bf16.msra.mxu0 %v5874_v34  ;;  %4845 = vmatpush3.bf16.msra.mxu1 %v5907_v61 }
 0x487   :  { %4818 = vmatprep.subr.bf16.mxu0 %v5877_v35  ;;  %4846 = vmatprep.subr.bf16.mxu1 %v5798_v40 }
 0x48a   :  { %4820 = vmatpush1.bf16.msra.mxu0 %v5887_v45  ;;  %4848 = vmatpush3.bf16.msra.mxu1 %v5924_v10 }
 0x48b   :  { %4822 = vmatprep.subr.bf16.mxu0 %v5890_v46  ;;  %4849 = vmatprep.subr.bf16.mxu1 %v5798_v40 }
 0x48e   :  { %4824 = vmatpush1.bf16.msra.mxu0 %v5901_v55  ;;  %4851 = vmatpush3.bf16.msra.mxu1 %v5938_v20 }
 0x48f   :  { %4826 = vmatprep.subr.bf16.mxu0 %v5904_v56  ;;  %4852 = vmatprep.subr.bf16.mxu1 %v5798_v40 }
 0x492   :  { %4828 = vmatpush1.bf16.msra.mxu0 %v5915_v2  ;;  %4854 = vmatpush3.bf16.msra.mxu1 %v5949_v24 }
 0x493   :  { %4830 = vmatprep.subr.bf16.mxu0 %v5921_v4  ;;  %4855 = vmatprep.subr.bf16.mxu1 %v5798_v40 }
 0x496   :  { %4832 = vmatpush1.bf16.msra.mxu0 %v5929_v13  ;;  %4857 = vmatpush3.bf16.msra.mxu1 %v5956_v29 }
 0x497   :  { %4834 = vmatprep.subr.bf16.mxu0 %v5935_v15  ;;  %4858 = vmatprep.subr.bf16.mxu1 %v5798_v40 }
 0x49a   :  { %4836 = vmatpush1.bf16.msra.mxu0 %v5945_v23  ;;  %4860 = vmatpush3.bf16.msra.mxu1 %v5964_v32 }
 0x49b   :  { %4862 = vmatprep.subr.bf16.mxu0 %v5851_v9  ;;  %4893 = vmatprep.subr.bf16.mxu1 %v5798_v40 }
 0x550   :  { %v1097_v48 = vpop.f32.mrb[8].mxu0  ;;  %v1168_v33 = vpop.f32.mrb[16].mxu1 }
 0x551   :  { %v5517_v42 = vadd.f32 %v1097_v48, %v6024_v1  ;;  %v1099_v50 = vpop.f32.mrb[9].mxu0  ;;  %v3996_v38 = vpop.f32.mrb[17].mxu1  ;;  %v1186_v3 = vadd.f32 %v1168_v33, %v6033_v27 }
 0x552   :  { %v5518_v43 = vadd.f32 %v1099_v50, %v6030_v11 }
 0x553   :  { %v3416_v49 = vmul.f32 -1.442695, %v5517_v42 }
 0x554   :  { %v3417_v54 = vmul.f32 -1.442695, %v5518_v43 }
 0x555   :  { %5622 = vpow2.f32 %v3416_v49 }
 0x556   :  { %5624 = vpow2.f32 %v3417_v54 }
 0x55f   :  { %v5623_v58 = vpop.eup %5622 }
 0x560   :  { %v1176_v39 = vadd.f32 1.0, %v5623_v58  ;;  %v5625_v44 = vpop.eup %5624 }
 0x561   :  { %v1183_v12 = vadd.f32 1.0, %v5625_v44 }
 0x562   :  { %5626 = vrcp.f32 %v1176_v39 }
 0x56c   :  { %v5627_v5 = vpop.eup %5626 }
 0x56d   :  { %v1187_v7 = vmul.f32 %v5627_v5, %v1186_v3 }
 0x56f   :  { %v1188_v8 = vadd.f32 %v1187_v7, %v6015_v57 }
 0x571   :  { %5628 = vtanh.f32 %v1188_v8 }
 0x572   :  { %5630 = vrcp.f32 %v1183_v12 }
 0x57b   :  { %v5629_v14 = vpop.eup %5628 }
 0x57c   :  { %v1190_v16 = vsub.f32 %v6168_v31, %v5629_v14  ;;  %v5631_v19 = vpop.eup %5630 }
 0x57e   :  { %v1191_v21 = vmul.f32 %v5631_v19, %v1190_v16  ;;  %v1680_v16 = vld [vmem:[#allocation2 + $0x330] sm:$0xff]  ;;  %v1683_v19 = vld [vmem:[#allocation2 + $0x348] sm:$0xff] }
 0x580   :  { %v6212_v22 = vadd.f32 %v5629_v14, %v1191_v21 }
 0x582   :  { %1258 = vmatmul.mubr.f32.vlgmr.msra.gmra.mrb[10].mxu0 %v6212_v22  ;;  %4030 = vmatmul.mubr.f32.vlgmr.msra.gmra.mrb[18].mxu1 %v6212_v22 }
 0x583   :  { %4864 = vmatpush1.bf16.msra.mxu0 %v5853_v17  ;;  %4895 = vmatpush3.bf16.msra.mxu1 %v5880_v41 }
 0x584   :  { %4866 = vmatprep.subr.bf16.mxu0 %v5856_v18  ;;  %4896 = vmatprep.subr.bf16.mxu1 %v5798_v40 }
 0x585   :  { %1419 = vmatprep.mubr.f32.mxu0 %v5797_v0  ;;  %4064 = vmatprep.mubr.msk.f32.mxu1 %vm5799_vm0, %v5797_v0 }
 0x587   :  { %4868 = vmatpush1.bf16.msra.mxu0 %v5864_v25  ;;  %4898 = vmatpush3.bf16.msra.mxu1 %v5893_v51 }
 0x588   :  { %4870 = vmatprep.subr.bf16.mxu0 %v5867_v26  ;;  %4899 = vmatprep.subr.bf16.mxu1 %v5798_v40 }
 0x58b   :  { %4872 = vmatpush1.bf16.msra.mxu0 %v5874_v34  ;;  %4901 = vmatpush3.bf16.msra.mxu1 %v5907_v61 }
 0x58c   :  { %4874 = vmatprep.subr.bf16.mxu0 %v5877_v35  ;;  %4902 = vmatprep.subr.bf16.mxu1 %v5798_v40 }
 0x58f   :  { %4876 = vmatpush1.bf16.msra.mxu0 %v5887_v45  ;;  %4904 = vmatpush3.bf16.msra.mxu1 %v5924_v10 }
 0x590   :  { %4878 = vmatprep.subr.bf16.mxu0 %v5890_v46  ;;  %4905 = vmatprep.subr.bf16.mxu1 %v5798_v40 }
 0x593   :  { %4880 = vmatpush1.bf16.msra.mxu0 %v5901_v55  ;;  %4907 = vmatpush3.bf16.msra.mxu1 %v5938_v20 }
 0x594   :  { %4882 = vmatprep.subr.bf16.mxu0 %v5904_v56  ;;  %4908 = vmatprep.subr.bf16.mxu1 %v5798_v40 }
 0x597   :  { %4884 = vmatpush1.bf16.msra.mxu0 %v5915_v2  ;;  %4910 = vmatpush3.bf16.msra.mxu1 %v5949_v24 }
 0x598   :  { %4886 = vmatprep.subr.bf16.mxu0 %v5921_v4  ;;  %4911 = vmatprep.subr.bf16.mxu1 %v5798_v40 }
 0x59b   :  { %4888 = vmatpush1.bf16.msra.mxu0 %v5929_v13  ;;  %4913 = vmatpush3.bf16.msra.mxu1 %v5956_v29 }
 0x59c   :  { %4890 = vmatprep.subr.bf16.mxu0 %v5935_v15  ;;  %4914 = vmatprep.subr.bf16.mxu1 %v5798_v40 }
 0x59f   :  { %4892 = vmatpush1.bf16.msra.mxu0 %v5945_v23  ;;  %4916 = vmatpush3.bf16.msra.mxu1 %v5964_v32 }
 0x5a0   :  { %4918 = vmatprep.subr.bf16.mxu0 %v5851_v9  ;;  %4949 = vmatprep.subr.bf16.mxu1 %v5798_v40 }
 0x655   :  { %v1259_v57 = vpop.f32.mrb[10].mxu0  ;;  %v1330_v28 = vpop.f32.mrb[18].mxu1 }
 0x656   :  { %v5519_v30 = vadd.f32 %v1259_v57, %v6024_v1  ;;  %v1261_v48 = vpop.f32.mrb[11].mxu0  ;;  %v4031_v33 = vpop.f32.mrb[19].mxu1  ;;  %v1348_v9 = vadd.f32 %v1330_v28, %v6033_v27  ;;  %v1687_v57 = vld [vmem:[#allocation2 + $0x368] sm:$0xff]  ;;  %v1690_v28 = vld [vmem:[#allocation2 + $0x380] sm:$0xff] }
 0x657   :  { %v5520_v50 = vadd.f32 %v1261_v48, %v6030_v11  ;;  %v1688_v48 = vld [vmem:[#allocation2 + $0x370] sm:$0xff]  ;;  %v1691_v33 = vld [vmem:[#allocation2 + $0x388] sm:$0xff] }
 0x658   :  { %v3418_v42 = vmul.f32 -1.442695, %v5519_v30 }
 0x659   :  { %v3419_v38 = vmul.f32 -1.442695, %v5520_v50  ;;  %v4977_v50 = vpack.c.bf16 %v1690_v28, %v1687_v57  ;;  %v1718_v57 = vld [vmem:[#allocation2 + $0x460] sm:$0xff]  ;;  %v1721_v28 = vld [vmem:[#allocation2 + $0x478] sm:$0xff] }
 0x65a   :  { %5632 = vpow2.f32 %v3418_v42  ;;  %v4975_v42 = vpack.c.bf16 %v1683_v19, %v1680_v16  ;;  %v1713_v16 = vld [vmem:[#allocation2 + $0x438] sm:$0xff] }
 0x65b   :  { %5634 = vpow2.f32 %v3419_v38  ;;  %v1686_v38 = vld [vmem:[#allocation2 + $0x360] sm:$0xff]  ;;  %v1717_v19 = vld [vmem:[#allocation2 + $0x458] sm:$0xff] }
 0x664   :  { %v5633_v49 = vpop.eup %5632 }
 0x665   :  { %v1338_v43 = vadd.f32 1.0, %v5633_v49  ;;  %v5635_v54 = vpop.eup %5634  ;;  %v1693_v49 = vld [vmem:[#allocation2 + $0x398] sm:$0xff] }
 0x666   :  { %v1345_v3 = vadd.f32 1.0, %v5635_v54  ;;  %v1696_v54 = vld [vmem:[#allocation2 + $0x3b0] sm:$0xff] }
 0x667   :  { %5636 = vrcp.f32 %v1338_v43  ;;  %v5009_v43 = vpack.c.bf16 %v1691_v33, %v1688_v48  ;;  %v5029_v33 = vpack.c.bf16 %v1721_v28, %v1718_v57  ;;  %v1768_v57 = vld [vmem:[#allocation2 + $0x5f0] sm:$0xff] }
 0x668   :  { %v1764_v28 = vld [vmem:[#allocation2 + $0x5d0] sm:$0xff] }
 0x671   :  { %v5637_v58 = vpop.eup %5636 }
 0x672   :  { %v1349_v39 = vmul.f32 %v5637_v58, %v1348_v9  ;;  %v1694_v9 = vld [vmem:[#allocation2 + $0x3a0] sm:$0xff]  ;;  %v1697_v58 = vld [vmem:[#allocation2 + $0x3b8] sm:$0xff] }
 0x674   :  { %v1350_v44 = vadd.f32 %v1349_v39, %v6013_v53 }
 0x676   :  { %5638 = vtanh.f32 %v1350_v44  ;;  %v4981_v44 = vpack.c.bf16 %v1696_v54, %v1693_v49  ;;  %v1724_v49 = vld [vmem:[#allocation2 + $0x490] sm:$0xff] }
 0x677   :  { %5640 = vrcp.f32 %v1345_v3  ;;  %v5013_v3 = vpack.c.bf16 %v1697_v58, %v1694_v9 }
 0x680   :  { %v5639_v5 = vpop.eup %5638 }
 0x681   :  { %v1352_v7 = vsub.f32 %v6212_v22, %v5639_v5  ;;  %v5641_v8 = vpop.eup %5640 }
 0x683   :  { %v1353_v12 = vmul.f32 %v5641_v8, %v1352_v7  ;;  %v1695_v7 = vld [vmem:[#allocation2 + $0x3a8] sm:$0xff] }
 0x684   :  { %v1699_v8 = vld [vmem:[#allocation2 + $0x3c8] sm:$0xff] }
 0x685   :  { %v6256_v14 = vadd.f32 %v5639_v5, %v1353_v12  ;;  %v1692_v5 = vld [vmem:[#allocation2 + $0x390] sm:$0xff]  ;;  %v1702_v12 = vld [vmem:[#allocation2 + $0x3e0] sm:$0xff] }
 0x687   :  { %1420 = vmatmul.mubr.f32.vlgmr.msra.gmra.mrb[12].mxu0 %v6256_v14  ;;  %4065 = vmatmul.mubr.f32.vlgmr.msra.gmra.mrb[20].mxu1 %v6256_v14 }
 0x688   :  { %4920 = vmatpush1.bf16.msra.mxu0 %v5853_v17  ;;  %4951 = vmatpush3.bf16.msra.mxu1 %v5880_v41  ;;  %v1681_v17 = vld [vmem:[#allocation2 + $0x338] sm:$0xff] }
 0x689   :  { %4922 = vmatprep.subr.bf16.mxu0 %v5856_v18  ;;  %4952 = vmatprep.subr.bf16.mxu1 %v5798_v40  ;;  %v1684_v18 = vld [vmem:[#allocation2 + $0x350] sm:$0xff] }
 0x68a   :  { %1581 = vmatprep.mubr.f32.mxu0 %v5797_v0  ;;  %4099 = vmatprep.mubr.msk.f32.mxu1 %vm5799_vm0, %v5797_v0 }
 0x68c   :  { %4924 = vmatpush1.bf16.msra.mxu0 %v5864_v25  ;;  %4954 = vmatpush3.bf16.msra.mxu1 %v5893_v51  ;;  %v1682_v25 = vld [vmem:[#allocation2 + $0x340] sm:$0xff] }
 0x68d   :  { %4926 = vmatprep.subr.bf16.mxu0 %v5867_v26  ;;  %4955 = vmatprep.subr.bf16.mxu1 %v5798_v40  ;;  %v4973_v26 = vpack.c.bf16 %v1684_v18, %v1681_v17  ;;  %v1700_v17 = vld [vmem:[#allocation2 + $0x3d0] sm:$0xff]  ;;  %v1703_v18 = vld [vmem:[#allocation2 + $0x3e8] sm:$0xff] }
 0x690   :  { %4928 = vmatpush1.bf16.msra.mxu0 %v5874_v34  ;;  %4957 = vmatpush3.bf16.msra.mxu1 %v5907_v61  ;;  %v1685_v34 = vld [vmem:[#allocation2 + $0x358] sm:$0xff] }
 0x691   :  { %4930 = vmatprep.subr.bf16.mxu0 %v5877_v35  ;;  %4958 = vmatprep.subr.bf16.mxu1 %v5798_v40  ;;  %v5005_v35 = vpack.c.bf16 %v1685_v34, %v1682_v25  ;;  %v4983_v25 = vpack.c.bf16 %v1695_v7, %v1692_v5  ;;  %v5017_v34 = vpack.c.bf16 %v1703_v18, %v1700_v17  ;;  %v1728_v5 = vld [vmem:[#allocation2 + $0x4b0] sm:$0xff]  ;;  %v1737_v17 = vld [vmem:[#allocation2 + $0x4f8] sm:$0xff] }
 0x694   :  { %4932 = vmatpush1.bf16.msra.mxu0 %v5887_v45  ;;  %4960 = vmatpush3.bf16.msra.mxu1 %v5924_v10 }
 0x695   :  { %4934 = vmatprep.subr.bf16.mxu0 %v5890_v46  ;;  %4961 = vmatprep.subr.bf16.mxu1 %v5798_v40 }
 0x698   :  { %4936 = vmatpush1.bf16.msra.mxu0 %v5901_v55  ;;  %4963 = vmatpush3.bf16.msra.mxu1 %v5938_v20 }
 0x699   :  { %4938 = vmatprep.subr.bf16.mxu0 %v5904_v56  ;;  %4964 = vmatprep.subr.bf16.mxu1 %v5798_v40 }
 0x69c   :  { %4940 = vmatpush1.bf16.msra.mxu0 %v5915_v2  ;;  %4966 = vmatpush3.bf16.msra.mxu1 %v5949_v24 }
 0x69d   :  { %4942 = vmatprep.subr.bf16.mxu0 %v5921_v4  ;;  %4967 = vmatprep.subr.bf16.mxu1 %v5798_v40 }
 0x6a0   :  { %4944 = vmatpush1.bf16.msra.mxu0 %v5929_v13  ;;  %4969 = vmatpush3.bf16.msra.mxu1 %v5956_v29 }
 0x6a1   :  { %4946 = vmatprep.subr.bf16.mxu0 %v5935_v15  ;;  %4970 = vmatprep.subr.bf16.mxu1 %v5798_v40 }
 0x6a4   :  { %4948 = vmatpush1.bf16.msra.mxu0 %v5945_v23  ;;  %4972 = vmatpush3.bf16.msra.mxu1 %v5964_v32 }
 0x6a5   :  { %4974 = vmatprep.subr.bf16.mxu0 %v4973_v26  ;;  %5006 = vmatprep.subr.bf16.mxu1 %v5005_v35  ;;  %v4985_v26 = vpack.c.bf16 %v1702_v12, %v1699_v8  ;;  %v1734_v12 = vld [vmem:[#allocation2 + $0x4e0] sm:$0xff] }
 0x6a6   :  { %v6333_v18 = vpack.c.bf16 %v1737_v17, %v1734_v12  ;;  %v1754_v12 = vld [vmem:[#allocation2 + $0x580] sm:$0xff]  ;;  %v1757_v17 = vld [vmem:[#allocation2 + $0x598] sm:$0xff] }
 0x75a   :  { %v1421_v41 = vpop.f32.mrb[12].mxu0  ;;  %v1492_v45 = vpop.f32.mrb[20].mxu1 }
 0x75b   :  { %v5521_v46 = vadd.f32 %v1421_v41, %v6024_v1  ;;  %v1423_v51 = vpop.f32.mrb[13].mxu0  ;;  %v4066_v55 = vpop.f32.mrb[21].mxu1  ;;  %v1510_v15 = vadd.f32 %v1492_v45, %v6033_v27  ;;  %v1701_v41 = vld [vmem:[#allocation2 + $0x3d8] sm:$0xff] }
 0x75c   :  { %v5522_v61 = vadd.f32 %v1423_v51, %v6030_v11  ;;  %v1705_v45 = vld [vmem:[#allocation2 + $0x3f8] sm:$0xff]  ;;  %v1706_v51 = vld [vmem:[#allocation2 + $0x400] sm:$0xff] }
 0x75d   :  { %v3420_v56 = vmul.f32 -1.442695, %v5521_v46  ;;  %v1708_v46 = vld [vmem:[#allocation2 + $0x410] sm:$0xff]  ;;  %v1709_v55 = vld [vmem:[#allocation2 + $0x418] sm:$0xff] }
 0x75e   :  { %v3421_v2 = vmul.f32 -1.442695, %v5522_v61  ;;  %v4989_v61 = vpack.c.bf16 %v1708_v46, %v1705_v45  ;;  %v1747_v46 = vld [vmem:[#allocation2 + $0x548] sm:$0xff] }
 0x75f   :  { %5642 = vpow2.f32 %v3420_v56 }
 0x760   :  { %5644 = vpow2.f32 %v3421_v2  ;;  %v5021_v2 = vpack.c.bf16 %v1709_v55, %v1706_v51  ;;  %v1750_v51 = vld [vmem:[#allocation2 + $0x560] sm:$0xff] }
 0x761   :  { %v6343_v55 = vpack.c.bf16 %v1750_v51, %v1747_v46  ;;  %v1766_v46 = vld [vmem:[#allocation2 + $0x5e0] sm:$0xff]  ;;  %v1769_v51 = vld [vmem:[#allocation2 + $0x5f8] sm:$0xff] }
 0x769   :  { %v5643_v4 = vpop.eup %5642 }
 0x76a   :  { %v1500_v10 = vadd.f32 1.0, %v5643_v4  ;;  %v5645_v13 = vpop.eup %5644  ;;  %v1704_v4 = vld [vmem:[#allocation2 + $0x3f0] sm:$0xff] }
 0x76b   :  { %v1507_v29 = vadd.f32 1.0, %v5645_v13  ;;  %v1711_v13 = vld [vmem:[#allocation2 + $0x428] sm:$0xff] }
 0x76c   :  { %5646 = vrcp.f32 %v1500_v10  ;;  %v1707_v10 = vld [vmem:[#allocation2 + $0x408] sm:$0xff] }
 0x776   :  { %v5647_v20 = vpop.eup %5646 }
 0x777   :  { %v1511_v23 = vmul.f32 %v5647_v20, %v1510_v15  ;;  %v1714_v15 = vld [vmem:[#allocation2 + $0x440] sm:$0xff]  ;;  %v1712_v20 = vld [vmem:[#allocation2 + $0x430] sm:$0xff] }
 0x779   :  { %v1512_v24 = vadd.f32 %v1511_v23, %v6019_v62  ;;  %v1689_v62 = vld [vmem:[#allocation2 + $0x378] sm:$0xff]  ;;  %v1715_v23 = vld [vmem:[#allocation2 + $0x448] sm:$0xff] }
 0x77a   :  { %v4979_v39 = vpack.c.bf16 %v1689_v62, %v1686_v38  ;;  %v1723_v38 = vld [vmem:[#allocation2 + $0x488] sm:$0xff]  ;;  %v1726_v62 = vld [vmem:[#allocation2 + $0x4a0] sm:$0xff] }
 0x77b   :  { %5648 = vtanh.f32 %v1512_v24  ;;  %v4991_v24 = vpack.c.bf16 %v1707_v10, %v1704_v4  ;;  %v5001_v9 = vpack.c.bf16 %v1726_v62, %v1723_v38  ;;  %v1753_v4 = vld [vmem:[#allocation2 + $0x578] sm:$0xff]  ;;  %v1756_v10 = vld [vmem:[#allocation2 + $0x590] sm:$0xff]  ;;  %v1771_v62 = vld [vmem:[#allocation2 + $0x608] sm:$0xff] }
 0x77c   :  { %5650 = vrcp.f32 %v1507_v29  ;;  %v4993_v29 = vpack.c.bf16 %v1714_v15, %v1711_v13  ;;  %v6349_v13 = vpack.c.bf16 %v1756_v10, %v1753_v4  ;;  %v1752_v15 = vld [vmem:[#allocation2 + $0x570] sm:$0xff]  ;;  %v1775_v4 = vld [vmem:[#allocation2 + $0x628] sm:$0xff] }
 0x785   :  { %v5649_v32 = vpop.eup %5648 }
 0x786   :  { %v1514_v53 = vsub.f32 %v6256_v14, %v5649_v32  ;;  %v5651_v21 = vpop.eup %5650 }
 0x788   :  { %v1515_v30 = vmul.f32 %v5651_v21, %v1514_v53  ;;  %v1710_v53 = vld [vmem:[#allocation2 + $0x420] sm:$0xff]  ;;  %v1720_v21 = vld [vmem:[#allocation2 + $0x470] sm:$0xff] }
 0x789   :  { %v4997_v48 = vpack.c.bf16 %v1720_v21, %v1717_v19  ;;  %v1765_v21 = vld [vmem:[#allocation2 + $0x5d8] sm:$0xff] }
 0x78a   :  { %v6298_v27 = vadd.f32 %v5649_v32, %v1515_v30  ;;  %v5025_v32 = vpack.c.bf16 %v1715_v23, %v1712_v20  ;;  %v4995_v30 = vpack.c.bf16 %v1713_v16, %v1710_v53  ;;  %v1755_v20 = vld [vmem:[#allocation2 + $0x588] sm:$0xff]  ;;  %v1758_v53 = vld [vmem:[#allocation2 + $0x5a0] sm:$0xff]  ;;  %v1761_v16 = vld [vmem:[#allocation2 + $0x5b8] sm:$0xff] }
 0x78b   :  { %v6351_v23 = vpack.c.bf16 %v1755_v20, %v1752_v15  ;;  %v6357_v19 = vpack.c.bf16 %v1761_v16, %v1758_v53 }
 0x78c   :  { %1582 = vmatmul.mubr.f32.vlgmr.msra.gmra.mrb[14].mxu0 %v6298_v27  ;;  %4100 = vmatmul.mubr.f32.vlgmr.msra.gmra.mrb[22].mxu1 %v6298_v27 }
 0x78d   :  { %4976 = vmatpush1.bf16.msra.mxu0 %v4975_v42  ;;  %5008 = vmatpush3.bf16.msra.mxu1 %v5005_v35  ;;  %v1698_v35 = vld [vmem:[#allocation2 + $0x3c0] sm:$0xff]  ;;  %v1716_v42 = vld [vmem:[#allocation2 + $0x450] sm:$0xff] }
 0x78e   :  { %4134 = vmatprep.mubr.f32.mxu1 %v6036_v60  ;;  %4978 = vmatprep.subr.bf16.mxu0 %v4977_v50  ;;  %v4987_v56 = vpack.c.bf16 %v1701_v41, %v1698_v35  ;;  %v1719_v50 = vld [vmem:[#allocation2 + $0x468] sm:$0xff]  ;;  %v1740_v35 = vld [vmem:[#allocation2 + $0x510] sm:$0xff] }
 0x78f   :  { %5010 = vmatprep.subr.bf16.mxu1 %v5009_v43  ;;  %1859 = vmatprep.mubr.f32.mxu0 %v5797_v0  ;;  %v4999_v54 = vpack.c.bf16 %v1719_v50, %v1716_v42  ;;  %v1743_v41 = vld [vmem:[#allocation2 + $0x528] sm:$0xff]  ;;  %v1733_v42 = vld [vmem:[#allocation2 + $0x4d8] sm:$0xff] }
 0x790   :  { %v6339_v45 = vpack.c.bf16 %v1743_v41, %v1740_v35  ;;  %v1763_v35 = vld [vmem:[#allocation2 + $0x5c8] sm:$0xff] }
 0x791   :  { %4980 = vmatpush1.bf16.msra.mxu0 %v4979_v39  ;;  %5012 = vmatpush3.bf16.msra.mxu1 %v5009_v43  ;;  %v1727_v43 = vld [vmem:[#allocation2 + $0x4a8] sm:$0xff]  ;;  %v1722_v39 = vld [vmem:[#allocation2 + $0x480] sm:$0xff] }
 0x792   :  { %4982 = vmatprep.subr.bf16.mxu0 %v4981_v44  ;;  %5014 = vmatprep.subr.bf16.mxu1 %v5013_v3  ;;  %v5033_v58 = vpack.c.bf16 %v1727_v43, %v1724_v49  ;;  %v1725_v44 = vld [vmem:[#allocation2 + $0x498] sm:$0xff]  ;;  %v1774_v49 = vld [vmem:[#allocation2 + $0x620] sm:$0xff] }
 0x793   :  { %v6371_v43 = vpack.c.bf16 %v1774_v49, %v1771_v62 }
 0x795   :  { %4984 = vmatpush1.bf16.msra.mxu0 %v4983_v25  ;;  %5016 = vmatpush3.bf16.msra.mxu1 %v5013_v3  ;;  %v5003_v3 = vpack.c.bf16 %v1725_v44, %v1722_v39  ;;  %v1741_v25 = vld [vmem:[#allocation2 + $0x518] sm:$0xff]  ;;  %v1736_v39 = vld [vmem:[#allocation2 + $0x4f0] sm:$0xff]  ;;  %v1739_v44 = vld [vmem:[#allocation2 + $0x508] sm:$0xff] }
 0x796   :  { %4986 = vmatprep.subr.bf16.mxu0 %v4985_v26  ;;  %5018 = vmatprep.subr.bf16.mxu1 %v5017_v34  ;;  %v1744_v26 = vld [vmem:[#allocation2 + $0x530] sm:$0xff] }
 0x799   :  { %4988 = vmatpush1.bf16.msra.mxu0 %v4987_v56  ;;  %5020 = vmatpush3.bf16.msra.mxu1 %v5017_v34  ;;  %v6337_v34 = vpack.c.bf16 %v1744_v26, %v1741_v25  ;;  %v1746_v56 = vld [vmem:[#allocation2 + $0x540] sm:$0xff]  ;;  %v6389_v25 = vpack.c.bf16 %v1757_v17, %v1754_v12  ;;  %v1760_v26 = vld [vmem:[#allocation2 + $0x5b0] sm:$0xff] }
 0x79a   :  { %4990 = vmatprep.subr.bf16.mxu0 %v4989_v61  ;;  %5022 = vmatprep.subr.bf16.mxu1 %v5021_v2  ;;  %v1749_v61 = vld [vmem:[#allocation2 + $0x558] sm:$0xff]  ;;  %v6393_v41 = vpack.c.bf16 %v1763_v35, %v1760_v26 }
 0x79d   :  { %4992 = vmatpush1.bf16.msra.mxu0 %v4991_v24  ;;  %5024 = vmatpush3.bf16.msra.mxu1 %v5021_v2  ;;  %v6345_v2 = vpack.c.bf16 %v1749_v61, %v1746_v56  ;;  %v1759_v24 = vld [vmem:[#allocation2 + $0x5a8] sm:$0xff]  ;;  %v6397_v56 = vpack.c.bf16 %v1769_v51, %v1766_v46  ;;  %v1772_v61 = vld [vmem:[#allocation2 + $0x610] sm:$0xff] }
 0x79e   :  { %4994 = vmatprep.subr.bf16.mxu0 %v4993_v29  ;;  %5026 = vmatprep.subr.bf16.mxu1 %v5025_v32  ;;  %v1762_v29 = vld [vmem:[#allocation2 + $0x5c0] sm:$0xff]  ;;  %v6401_v10 = vpack.c.bf16 %v1775_v4, %v1772_v61 }
 0x7a1   :  { %4996 = vmatpush1.bf16.msra.mxu0 %v4995_v30  ;;  %5028 = vmatpush3.bf16.msra.mxu1 %v5025_v32  ;;  %v6355_v32 = vpack.c.bf16 %v1762_v29, %v1759_v24  ;;  %v6360_v30 = vpack.c.bf16 %v1768_v57, %v1765_v21 }
 0x7a2   :  { %4998 = vmatprep.subr.bf16.mxu0 %v4997_v48  ;;  %5030 = vmatprep.subr.bf16.mxu1 %v5029_v33  ;;  %v1767_v48 = vld [vmem:[#allocation2 + $0x5e8] sm:$0xff] }
 0x7a3   :  { %v6363_v50 = vpack.c.bf16 %v1767_v48, %v1764_v28 }
 0x7a5   :  { %5000 = vmatpush1.bf16.msra.mxu0 %v4999_v54  ;;  %5032 = vmatpush3.bf16.msra.mxu1 %v5029_v33  ;;  %v1730_v33 = vld [vmem:[#allocation2 + $0x4c0] sm:$0xff] }
 0x7a6   :  { %5002 = vmatprep.subr.bf16.mxu0 %v5001_v9  ;;  %5034 = vmatprep.subr.bf16.mxu1 %v5033_v58  ;;  %v6365_v38 = vpack.c.bf16 %v1733_v42, %v1730_v33  ;;  %v1770_v54 = vld [vmem:[#allocation2 + $0x600] sm:$0xff]  ;;  %v1773_v9 = vld [vmem:[#allocation2 + $0x618] sm:$0xff] }
 0x7a7   :  { %v5742_v42 = vld [vmem:[#allocation2 + $0x318] ss:$0 sm:$0xff] }
 0x7a9   :  { %5004 = vmatpush1.bf16.msra.mxu0 %v5003_v3  ;;  %5036 = vmatpush3.bf16.msra.mxu1 %v5033_v58  ;;  %v6373_v58 = vpack.c.bf16 %v1773_v9, %v1770_v54  ;;  %v6376_v3 = vpack.c.bf16 %v1739_v44, %v1736_v39 }
 0x7aa   :  { %5069 = vmatprep.subr.bf16.mxu1 %v5798_v40 }
 0x7ac   :  { %1860 = vmatmul.mubr.f32.vlgmr.msra.gmra.mrb[16].mxu0 %v6036_v60  ;;  %4135 = vmatmul.mubr.f32.vlgmr.msra.gmra.mrb[24].mxu1 %v6080_v52  ;;  %v1729_v60 = vld [vmem:[#allocation2 + $0x4b8] sm:$0xff] }
 0x7ad   :  { %4137 = vmatprep.mubr.f32.mxu1 %v6124_v47  ;;  %1865 = vmatprep.mubr.f32.mxu0 %v5797_v0 }
 0x7ae   :  { %5071 = vmatpush3.bf16.msra.mxu1 %v6365_v38 }
 0x7af   :  { %5072 = vmatprep.subr.bf16.mxu1 %v5798_v40 }
 0x7b0   :  { %1866 = vmatmul.mubr.f32.gmra.mrb[18].mxu0 %v6080_v52  ;;  %4138 = vmatmul.mubr.f32.gmra.mrb[26].mxu1 %v6168_v31  ;;  %v1732_v52 = vld [vmem:[#allocation2 + $0x4d0] sm:$0xff] }
 0x7b1   :  { %4140 = vmatprep.mubr.f32.mxu1 %v6212_v22  ;;  %1871 = vmatprep.mubr.f32.mxu0 %v5797_v0 }
 0x7b2   :  { %5074 = vmatpush3.bf16.msra.mxu1 %v6376_v3 }
 0x7b3   :  { %5075 = vmatprep.subr.bf16.mxu1 %v5798_v40 }
 0x7b4   :  { %1872 = vmatmul.mubr.f32.gmra.mrb[20].mxu0 %v6124_v47  ;;  %4141 = vmatmul.mubr.f32.gmra.mrb[28].mxu1 %v6256_v14  ;;  %v6325_v47 = vpack.c.bf16 %v1732_v52, %v1729_v60  ;;  %v1742_v60 = vld [vmem:[#allocation2 + $0x520] sm:$0xff]  ;;  %v1745_v52 = vld [vmem:[#allocation2 + $0x538] sm:$0xff] }
 0x7b5   :  { %4143 = vmatprep.mubr.f32.mxu1 %v6298_v27  ;;  %1877 = vmatprep.mubr.f32.mxu0 %v5797_v0 }
 0x7b6   :  { %5038 = vmatprep.subr.bf16.mxu0 %v6325_v47 }
 0x7b8   :  { %1878 = vmatmul.mubr.f32.gmra.mrb[22].mxu0 %v6168_v31  ;;  %v1731_v31 = vld [vmem:[#allocation2 + $0x4c8] sm:$0xff] }
 0x7b9   :  { %1883 = vmatprep.mubr.f32.mxu0 %v5797_v0  ;;  %v6327_v7 = vpack.c.bf16 %v1731_v31, %v1728_v5  ;;  %v1748_v5 = vld [vmem:[#allocation2 + $0x550] sm:$0xff]  ;;  %v6382_v31 = vpack.c.bf16 %v1745_v52, %v1742_v60 }
 0x7bb   :  { %5040 = vmatpush1.bf16.msra.mxu0 %v6327_v7  ;;  %5077 = vmatpush3.bf16.msra.mxu1 %v6382_v31 }
 0x7bc   :  { %1884 = vmatmul.mubr.f32.gmra.mrb[24].mxu0 %v6212_v22  ;;  %v1735_v22 = vld [vmem:[#allocation2 + $0x4e8] sm:$0xff]  ;;  %5078 = vmatprep.subr.bf16.mxu1 %v5798_v40 }
 0x7bd   :  { %1889 = vmatprep.mubr.f32.mxu0 %v5797_v0 }
 0x7c0   :  { %1890 = vmatmul.mubr.f32.gmra.mrb[26].mxu0 %v6256_v14  ;;  %v1738_v14 = vld [vmem:[#allocation2 + $0x500] sm:$0xff] }
 0x7c1   :  { %1895 = vmatprep.mubr.f32.mxu0 %v5797_v0  ;;  %v6331_v8 = vpack.c.bf16 %v1738_v14, %v1735_v22  ;;  %v1751_v22 = vld [vmem:[#allocation2 + $0x568] sm:$0xff] }
 0x7c2   :  { %v6385_v14 = vpack.c.bf16 %v1751_v22, %v1748_v5 }
 0x7c3   :  { %5042 = vmatprep.subr.bf16.mxu0 %v6331_v8 }
 0x7c4   :  { %1896 = vmatmul.mubr.f32.gmra.mrb[28].mxu0 %v6298_v27  ;;  %5080 = vmatpush3.bf16.msra.mxu1 %v6385_v14 }
 0x7c5   :  { %1901 = vmatprep.mubr.f32.mxu0 %v5797_v0  ;;  %5044 = vmatpush1.bf16.msra.mxu0 %v6333_v18 }
 0x7c6   :  { %5046 = vmatprep.subr.bf16.mxu0 %v6337_v34  ;;  %5081 = vmatprep.subr.bf16.mxu1 %v5798_v40 }
 0x7c8   :  { %5083 = vmatpush3.bf16.msra.mxu1 %v6389_v25 }
 0x7c9   :  { %5048 = vmatpush1.bf16.msra.mxu0 %v6339_v45  ;;  %5084 = vmatprep.subr.bf16.mxu1 %v5798_v40 }
 0x7ca   :  { %5050 = vmatprep.subr.bf16.mxu0 %v6343_v55 }
 0x7cc   :  { %5086 = vmatpush3.bf16.msra.mxu1 %v6393_v41 }
 0x7cd   :  { %5052 = vmatpush1.bf16.msra.mxu0 %v6345_v2  ;;  %5087 = vmatprep.subr.bf16.mxu1 %v5798_v40 }
 0x7ce   :  { %5054 = vmatprep.subr.bf16.mxu0 %v6349_v13 }
 0x7d0   :  { %5089 = vmatpush3.bf16.msra.mxu1 %v6397_v56 }
 0x7d1   :  { %5056 = vmatpush1.bf16.msra.mxu0 %v6351_v23  ;;  %5090 = vmatprep.subr.bf16.mxu1 %v5798_v40 }
 0x7d2   :  { %5058 = vmatprep.subr.bf16.mxu0 %v6355_v32 }
 0x7d4   :  { %5092 = vmatpush3.bf16.msra.mxu1 %v6401_v10 }
 0x7d5   :  { %5060 = vmatpush1.bf16.msra.mxu0 %v6357_v19  ;;  %5125 = vmatprep.subr.bf16.mxu1 %v5798_v40 }
 0x7d6   :  { %5062 = vmatprep.subr.bf16.mxu0 %v6360_v30 }
 0x7d9   :  { %5064 = vmatpush1.bf16.msra.mxu0 %v6363_v50 }
 0x7da   :  { %5066 = vmatprep.subr.bf16.mxu0 %v6371_v43 }
 0x7dd   :  { %5068 = vmatpush1.bf16.msra.mxu0 %v6373_v58 }
 0x7de   :  { %5094 = vmatprep.subr.bf16.mxu0 %v6325_v47 }
 0x85f   :  { %v1583_v15 = vpop.f32.mrb[14].mxu0  ;;  %v1654_v20 = vpop.f32.mrb[22].mxu1 }
 0x860   :  { %v5523_v24 = vadd.f32 %v1583_v15, %v6024_v1  ;;  %v1585_v29 = vpop.f32.mrb[15].mxu0  ;;  %v4101_v53 = vpop.f32.mrb[23].mxu1  ;;  %v1672_v62 = vadd.f32 %v5742_v42, %v1654_v20 }
 0x861   :  { %v5524_v21 = vadd.f32 %v1585_v29, %v6030_v11 }
 0x862   :  { %v3422_v16 = vmul.f32 -1.442695, %v5523_v24 }
 0x863   :  { %v3423_v57 = vmul.f32 -1.442695, %v5524_v21 }
 0x864   :  { %5652 = vpow2.f32 %v3422_v16 }
 0x865   :  { %5654 = vpow2.f32 %v3423_v57 }
 0x86e   :  { %v5653_v28 = vpop.eup %5652 }
 0x86f   :  { %v1662_v48 = vadd.f32 1.0, %v5653_v28  ;;  %v5655_v33 = vpop.eup %5654 }
 0x870   :  { %v1669_v39 = vadd.f32 1.0, %v5655_v33 }
 0x871   :  { %5656 = vrcp.f32 %v1662_v48 }
 0x87b   :  { %v5657_v49 = vpop.eup %5656 }
 0x87c   :  { %v1673_v54 = vmul.f32 %v5657_v49, %v1672_v62 }
 0x87e   :  { %v1674_v9 = vadd.f32 %v1673_v54, %v6017_v59 }
 0x87f   :  { %v6409_v1 = vpop.f32.mrb[24].mxu1 }
 0x880   :  { %5658 = vtanh.f32 %v1674_v9  ;;  %v6411_v44 = vpop.f32.mrb[25].mxu1 }
 0x881   :  { %5660 = vrcp.f32 %v1669_v39 }
 0x883   :  { %v6413_v11 = vpop.f32.mrb[26].mxu1 }
 0x884   :  { %v6415_v60 = vpop.f32.mrb[27].mxu1 }
 0x887   :  { %v6417_v52 = vpop.f32.mrb[28].mxu1 }
 0x888   :  { %v6419_v5 = vpop.f32.mrb[29].mxu1 }
 0x88a   :  { %v5659_v22 = vpop.eup %5658 }
 0x88b   :  { %v1676_v12 = vsub.f32 %v6298_v27, %v5659_v22  ;;  %v5661_v17 = vpop.eup %5660  ;;  %v1777_v27 = vld [vmem:[#allocation2 + $0x630] ss:$8 sm:$0x7] }
 0x88c   :  { %v6468_v51 = vrot.slane %v1777_v27, %v152_v63  ;;  %v6473_v53 = vrot.slane %v1777_v27, %v156_v6  ;;  %v6476_v63 = vld [vmem:[#allocation2 + $0x648] ss:$0 sm:$0xff]  ;;  %v6480_v48 = vrot.slane %v1777_v27, %v160_v37 }
 0x88d   :  { %v1677_v59 = vmul.f32 %v5661_v17, %v1676_v12 }
 0x88e   :  { %v1975_v6 = vadd.f32 %v6411_v44, %v6480_v48 }
 0x88f   :  { %v1678_v26 = vadd.f32 %v5659_v22, %v1677_v59 }
 0x891   :  { %1902 = vmatmul.mubr.f32.gmra.mrb[30].mxu0 %v1678_v26  ;;  %4144 = vmatmul.mubr.f32.gmra.mrb[30].mxu1 %v1678_v26 }
 0x892   :  { %2077 = vmatprep.mubr.f32.mxu0 %v5797_v0  ;;  %4178 = vmatprep.mubr.msk.f32.mxu1 %vm5799_vm0, %v5797_v0 }
 0x895   :  { %2078 = vmatmul.mubr.f32.vlgmr.msra.gmra.mrb[16].mxu0 %v5797_v0  ;;  %4179 = vmatmul.mubr.f32.vlgmr.msra.gmra.mrb[32].mxu1 %v5797_v0 }
 0x896   :  { %5096 = vmatpush1.bf16.msra.mxu0 %v6327_v7  ;;  %5127 = vmatpush3.bf16.msra.mxu1 %v6365_v38 }
 0x897   :  { %5098 = vmatprep.subr.bf16.mxu0 %v6331_v8  ;;  %5128 = vmatprep.subr.bf16.mxu1 %v5798_v40 }
 0x898   :  { %2239 = vmatprep.mubr.f32.mxu0 %v5797_v0  ;;  %4213 = vmatprep.mubr.msk.f32.mxu1 %vm5799_vm0, %v5797_v0 }
 0x89a   :  { %5100 = vmatpush1.bf16.msra.mxu0 %v6333_v18  ;;  %5130 = vmatpush3.bf16.msra.mxu1 %v6376_v3 }
 0x89b   :  { %5102 = vmatprep.subr.bf16.mxu0 %v6337_v34  ;;  %5131 = vmatprep.subr.bf16.mxu1 %v5798_v40 }
 0x89e   :  { %5104 = vmatpush1.bf16.msra.mxu0 %v6339_v45  ;;  %5133 = vmatpush3.bf16.msra.mxu1 %v6382_v31 }
 0x89f   :  { %5106 = vmatprep.subr.bf16.mxu0 %v6343_v55  ;;  %5134 = vmatprep.subr.bf16.mxu1 %v5798_v40 }
 0x8a2   :  { %5108 = vmatpush1.bf16.msra.mxu0 %v6345_v2  ;;  %5136 = vmatpush3.bf16.msra.mxu1 %v6385_v14 }
 0x8a3   :  { %5110 = vmatprep.subr.bf16.mxu0 %v6349_v13  ;;  %5137 = vmatprep.subr.bf16.mxu1 %v5798_v40 }
 0x8a6   :  { %5112 = vmatpush1.bf16.msra.mxu0 %v6351_v23  ;;  %5139 = vmatpush3.bf16.msra.mxu1 %v6389_v25 }
 0x8a7   :  { %5114 = vmatprep.subr.bf16.mxu0 %v6355_v32  ;;  %5140 = vmatprep.subr.bf16.mxu1 %v5798_v40 }
 0x8aa   :  { %5116 = vmatpush1.bf16.msra.mxu0 %v6357_v19  ;;  %5142 = vmatpush3.bf16.msra.mxu1 %v6393_v41 }
 0x8ab   :  { %5118 = vmatprep.subr.bf16.mxu0 %v6360_v30  ;;  %5143 = vmatprep.subr.bf16.mxu1 %v5798_v40 }
 0x8ae   :  { %5120 = vmatpush1.bf16.msra.mxu0 %v6363_v50  ;;  %5145 = vmatpush3.bf16.msra.mxu1 %v6397_v56 }
 0x8af   :  { %5122 = vmatprep.subr.bf16.mxu0 %v6371_v43  ;;  %5146 = vmatprep.subr.bf16.mxu1 %v5798_v40 }
 0x8b2   :  { %5124 = vmatpush1.bf16.msra.mxu0 %v6373_v58  ;;  %5148 = vmatpush3.bf16.msra.mxu1 %v6401_v10 }
 0x8b3   :  { %5150 = vmatprep.subr.bf16.mxu0 %v6325_v47  ;;  %5181 = vmatprep.subr.bf16.mxu1 %v5798_v40 }
 0x964   :  { %v6462_v35 = vpop.f32.mrb[30].mxu1 }
 0x965   :  { %v6464_v46 = vpop.f32.mrb[31].mxu1 }
 0x968   :  { %v2079_v61 = vpop.f32.mrb[16].mxu0  ;;  %v2150_v4 = vpop.f32.mrb[32].mxu1 }
 0x969   :  { %v5525_v15 = vadd.f32 %v2079_v61, %v6468_v51  ;;  %v2081_v20 = vpop.f32.mrb[17].mxu0  ;;  %v4180_v24 = vpop.f32.mrb[33].mxu1  ;;  %v2168_v33 = vadd.f32 %v2150_v4, %v6476_v63 }
 0x96a   :  { %v5526_v16 = vadd.f32 %v2081_v20, %v6473_v53 }
 0x96b   :  { %v3424_v29 = vmul.f32 -1.442695, %v5525_v15 }
 0x96c   :  { %v3425_v21 = vmul.f32 -1.442695, %v5526_v16 }
 0x96d   :  { %5662 = vpow2.f32 %v3424_v29 }
 0x96e   :  { %5664 = vpow2.f32 %v3425_v21 }
 0x977   :  { %v5663_v57 = vpop.eup %5662 }
 0x978   :  { %v2158_v28 = vadd.f32 1.0, %v5663_v57  ;;  %v5665_v42 = vpop.eup %5664  ;;  %v1980_v57 = vadd.f32 %v6409_v1, %v6480_v48 }
 0x979   :  { %v2165_v54 = vadd.f32 1.0, %v5665_v42 }
 0x97a   :  { %5666 = vrcp.f32 %v2158_v28 }
 0x984   :  { %v5667_v62 = vpop.eup %5666 }
 0x985   :  { %v2169_v49 = vmul.f32 %v5667_v62, %v2168_v33 }
 0x987   :  { %v2170_v9 = vadd.f32 %v2169_v49, %v1975_v6 }
 0x989   :  { %5668 = vtanh.f32 %v2170_v9 }
 0x98a   :  { %5670 = vrcp.f32 %v2165_v54 }
 0x993   :  { %v5669_v39 = vpop.eup %5668 }
 0x994   :  { %v2172_v22 = vsub.f32 0.0, %v5669_v39  ;;  %v5671_v12 = vpop.eup %5670 }
 0x996   :  { %v2173_v17 = vmul.f32 %v5671_v12, %v2172_v22 }
 0x998   :  { %v6485_v59 = vadd.f32 %v5669_v39, %v2173_v17 }
 0x99a   :  { %2240 = vmatmul.mubr.f32.vlgmr.msra.gmra.mrb[18].mxu0 %v6485_v59  ;;  %4214 = vmatmul.mubr.f32.vlgmr.msra.gmra.mrb[34].mxu1 %v6485_v59 }
 0x99b   :  { %5152 = vmatpush1.bf16.msra.mxu0 %v6327_v7  ;;  %5183 = vmatpush3.bf16.msra.mxu1 %v6365_v38 }
 0x99c   :  { %5154 = vmatprep.subr.bf16.mxu0 %v6331_v8  ;;  %5184 = vmatprep.subr.bf16.mxu1 %v5798_v40 }
 0x99d   :  { %2401 = vmatprep.mubr.f32.mxu0 %v5797_v0  ;;  %4248 = vmatprep.mubr.msk.f32.mxu1 %vm5799_vm0, %v5797_v0 }
 0x99f   :  { %5156 = vmatpush1.bf16.msra.mxu0 %v6333_v18  ;;  %5186 = vmatpush3.bf16.msra.mxu1 %v6376_v3 }
 0x9a0   :  { %5158 = vmatprep.subr.bf16.mxu0 %v6337_v34  ;;  %5187 = vmatprep.subr.bf16.mxu1 %v5798_v40 }
 0x9a3   :  { %5160 = vmatpush1.bf16.msra.mxu0 %v6339_v45  ;;  %5189 = vmatpush3.bf16.msra.mxu1 %v6382_v31 }
 0x9a4   :  { %5162 = vmatprep.subr.bf16.mxu0 %v6343_v55  ;;  %5190 = vmatprep.subr.bf16.mxu1 %v5798_v40 }
 0x9a7   :  { %5164 = vmatpush1.bf16.msra.mxu0 %v6345_v2  ;;  %5192 = vmatpush3.bf16.msra.mxu1 %v6385_v14 }
 0x9a8   :  { %5166 = vmatprep.subr.bf16.mxu0 %v6349_v13  ;;  %5193 = vmatprep.subr.bf16.mxu1 %v5798_v40 }
 0x9ab   :  { %5168 = vmatpush1.bf16.msra.mxu0 %v6351_v23  ;;  %5195 = vmatpush3.bf16.msra.mxu1 %v6389_v25 }
 0x9ac   :  { %5170 = vmatprep.subr.bf16.mxu0 %v6355_v32  ;;  %5196 = vmatprep.subr.bf16.mxu1 %v5798_v40 }
 0x9af   :  { %5172 = vmatpush1.bf16.msra.mxu0 %v6357_v19  ;;  %5198 = vmatpush3.bf16.msra.mxu1 %v6393_v41 }
 0x9b0   :  { %5174 = vmatprep.subr.bf16.mxu0 %v6360_v30  ;;  %5199 = vmatprep.subr.bf16.mxu1 %v5798_v40 }
 0x9b3   :  { %5176 = vmatpush1.bf16.msra.mxu0 %v6363_v50  ;;  %5201 = vmatpush3.bf16.msra.mxu1 %v6397_v56 }
 0x9b4   :  { %5178 = vmatprep.subr.bf16.mxu0 %v6371_v43  ;;  %5202 = vmatprep.subr.bf16.mxu1 %v5798_v40 }
 0x9b7   :  { %5180 = vmatpush1.bf16.msra.mxu0 %v6373_v58  ;;  %5204 = vmatpush3.bf16.msra.mxu1 %v6401_v10 }
 0x9b8   :  { %5206 = vmatprep.subr.bf16.mxu0 %v6325_v47  ;;  %5237 = vmatprep.subr.bf16.mxu1 %v5798_v40 }
 0xa6d   :  { %v2241_v36 = vpop.f32.mrb[18].mxu0  ;;  %v2312_v37 = vpop.f32.mrb[34].mxu1 }
 0xa6e   :  { %v5527_v44 = vadd.f32 %v2241_v36, %v6468_v51  ;;  %v2243_v26 = vpop.f32.mrb[19].mxu0  ;;  %v4215_v27 = vpop.f32.mrb[35].mxu1  ;;  %v2330_v16 = vadd.f32 %v2312_v37, %v6476_v63 }
 0xa6f   :  { %v5528_v4 = vadd.f32 %v2243_v26, %v6473_v53 }
 0xa70   :  { %v3426_v61 = vmul.f32 -1.442695, %v5527_v44 }
 0xa71   :  { %v3427_v15 = vmul.f32 -1.442695, %v5528_v4 }
 0xa72   :  { %5672 = vpow2.f32 %v3426_v61 }
 0xa73   :  { %5674 = vpow2.f32 %v3427_v15  ;;  %v1985_v15 = vadd.f32 %v6415_v60, %v6480_v48 }
 0xa7c   :  { %v5673_v20 = vpop.eup %5672 }
 0xa7d   :  { %v2320_v24 = vadd.f32 1.0, %v5673_v20  ;;  %v5675_v29 = vpop.eup %5674 }
 0xa7e   :  { %v2327_v42 = vadd.f32 1.0, %v5675_v29 }
 0xa7f   :  { %5676 = vrcp.f32 %v2320_v24 }
 0xa89   :  { %v5677_v21 = vpop.eup %5676 }
 0xa8a   :  { %v2331_v28 = vmul.f32 %v5677_v21, %v2330_v16 }
 0xa8c   :  { %v2332_v33 = vadd.f32 %v2331_v28, %v1980_v57 }
 0xa8e   :  { %5678 = vtanh.f32 %v2332_v33 }
 0xa8f   :  { %5680 = vrcp.f32 %v2327_v42 }
 0xa98   :  { %v5679_v62 = vpop.eup %5678 }
 0xa99   :  { %v2334_v6 = vsub.f32 %v6485_v59, %v5679_v62  ;;  %v5681_v49 = vpop.eup %5680 }
 0xa9b   :  { %v2335_v54 = vmul.f32 %v5681_v49, %v2334_v6 }
 0xa9d   :  { %v6530_v9 = vadd.f32 %v5679_v62, %v2335_v54 }
 0xa9f   :  { %2402 = vmatmul.mubr.f32.vlgmr.msra.gmra.mrb[20].mxu0 %v6530_v9  ;;  %4249 = vmatmul.mubr.f32.vlgmr.msra.gmra.mrb[36].mxu1 %v6530_v9 }
 0xaa0   :  { %5208 = vmatpush1.bf16.msra.mxu0 %v6327_v7  ;;  %5239 = vmatpush3.bf16.msra.mxu1 %v6365_v38 }
 0xaa1   :  { %5210 = vmatprep.subr.bf16.mxu0 %v6331_v8  ;;  %5240 = vmatprep.subr.bf16.mxu1 %v5798_v40 }
 0xaa2   :  { %2563 = vmatprep.mubr.f32.mxu0 %v5797_v0  ;;  %4283 = vmatprep.mubr.msk.f32.mxu1 %vm5799_vm0, %v5797_v0 }
 0xaa4   :  { %5212 = vmatpush1.bf16.msra.mxu0 %v6333_v18  ;;  %5242 = vmatpush3.bf16.msra.mxu1 %v6376_v3 }
 0xaa5   :  { %5214 = vmatprep.subr.bf16.mxu0 %v6337_v34  ;;  %5243 = vmatprep.subr.bf16.mxu1 %v5798_v40 }
 0xaa8   :  { %5216 = vmatpush1.bf16.msra.mxu0 %v6339_v45  ;;  %5245 = vmatpush3.bf16.msra.mxu1 %v6382_v31 }
 0xaa9   :  { %5218 = vmatprep.subr.bf16.mxu0 %v6343_v55  ;;  %5246 = vmatprep.subr.bf16.mxu1 %v5798_v40 }
 0xaac   :  { %5220 = vmatpush1.bf16.msra.mxu0 %v6345_v2  ;;  %5248 = vmatpush3.bf16.msra.mxu1 %v6385_v14 }
 0xaad   :  { %5222 = vmatprep.subr.bf16.mxu0 %v6349_v13  ;;  %5249 = vmatprep.subr.bf16.mxu1 %v5798_v40 }
 0xab0   :  { %5224 = vmatpush1.bf16.msra.mxu0 %v6351_v23  ;;  %5251 = vmatpush3.bf16.msra.mxu1 %v6389_v25 }
 0xab1   :  { %5226 = vmatprep.subr.bf16.mxu0 %v6355_v32  ;;  %5252 = vmatprep.subr.bf16.mxu1 %v5798_v40 }
 0xab4   :  { %5228 = vmatpush1.bf16.msra.mxu0 %v6357_v19  ;;  %5254 = vmatpush3.bf16.msra.mxu1 %v6393_v41 }
 0xab5   :  { %5230 = vmatprep.subr.bf16.mxu0 %v6360_v30  ;;  %5255 = vmatprep.subr.bf16.mxu1 %v5798_v40 }
 0xab8   :  { %5232 = vmatpush1.bf16.msra.mxu0 %v6363_v50  ;;  %5257 = vmatpush3.bf16.msra.mxu1 %v6397_v56 }
 0xab9   :  { %5234 = vmatprep.subr.bf16.mxu0 %v6371_v43  ;;  %5258 = vmatprep.subr.bf16.mxu1 %v5798_v40 }
 0xabc   :  { %5236 = vmatpush1.bf16.msra.mxu0 %v6373_v58  ;;  %5260 = vmatpush3.bf16.msra.mxu1 %v6401_v10 }
 0xabd   :  { %5262 = vmatprep.subr.bf16.mxu0 %v6325_v47  ;;  %5293 = vmatprep.subr.bf16.mxu1 %v5798_v40 }
 0xb72   :  { %v2403_v1 = vpop.f32.mrb[20].mxu0  ;;  %v2474_v39 = vpop.f32.mrb[36].mxu1 }
 0xb73   :  { %v5529_v22 = vadd.f32 %v2403_v1, %v6468_v51  ;;  %v2405_v12 = vpop.f32.mrb[21].mxu0  ;;  %v4250_v17 = vpop.f32.mrb[37].mxu1  ;;  %v2492_v61 = vadd.f32 %v2474_v39, %v6476_v63 }
 0xb74   :  { %v5530_v36 = vadd.f32 %v2405_v12, %v6473_v53 }
 0xb75   :  { %v3428_v59 = vmul.f32 -1.442695, %v5529_v22 }
 0xb76   :  { %v3429_v37 = vmul.f32 -1.442695, %v5530_v36  ;;  %v1990_v36 = vadd.f32 %v6413_v11, %v6480_v48 }
 0xb77   :  { %5682 = vpow2.f32 %v3428_v59 }
 0xb78   :  { %5684 = vpow2.f32 %v3429_v37 }
 0xb81   :  { %v5683_v44 = vpop.eup %5682 }
 0xb82   :  { %v2482_v26 = vadd.f32 1.0, %v5683_v44  ;;  %v5685_v27 = vpop.eup %5684 }
 0xb83   :  { %v2489_v29 = vadd.f32 1.0, %v5685_v27 }
 0xb84   :  { %5686 = vrcp.f32 %v2482_v26 }
 0xb8e   :  { %v5687_v4 = vpop.eup %5686 }
 0xb8f   :  { %v2493_v20 = vmul.f32 %v5687_v4, %v2492_v61 }
 0xb91   :  { %v2494_v24 = vadd.f32 %v2493_v20, %v1985_v15 }
 0xb93   :  { %5688 = vtanh.f32 %v2494_v24 }
 0xb94   :  { %5690 = vrcp.f32 %v2489_v29 }
 0xb9d   :  { %v5689_v16 = vpop.eup %5688 }
 0xb9e   :  { %v2496_v21 = vsub.f32 %v6530_v9, %v5689_v16  ;;  %v5691_v57 = vpop.eup %5690 }
 0xba0   :  { %v2497_v28 = vmul.f32 %v5691_v57, %v2496_v21 }
 0xba2   :  { %v6575_v33 = vadd.f32 %v5689_v16, %v2497_v28 }
 0xba4   :  { %2564 = vmatmul.mubr.f32.vlgmr.msra.gmra.mrb[22].mxu0 %v6575_v33  ;;  %4284 = vmatmul.mubr.f32.vlgmr.msra.gmra.mrb[38].mxu1 %v6575_v33 }
 0xba5   :  { %5264 = vmatpush1.bf16.msra.mxu0 %v6327_v7  ;;  %5295 = vmatpush3.bf16.msra.mxu1 %v6365_v38 }
 0xba6   :  { %5266 = vmatprep.subr.bf16.mxu0 %v6331_v8  ;;  %5296 = vmatprep.subr.bf16.mxu1 %v5798_v40 }
 0xba7   :  { %2725 = vmatprep.mubr.f32.mxu0 %v5797_v0  ;;  %4318 = vmatprep.mubr.msk.f32.mxu1 %vm5799_vm0, %v5797_v0 }
 0xba9   :  { %5268 = vmatpush1.bf16.msra.mxu0 %v6333_v18  ;;  %5298 = vmatpush3.bf16.msra.mxu1 %v6376_v3 }
 0xbaa   :  { %5270 = vmatprep.subr.bf16.mxu0 %v6337_v34  ;;  %5299 = vmatprep.subr.bf16.mxu1 %v5798_v40 }
 0xbad   :  { %5272 = vmatpush1.bf16.msra.mxu0 %v6339_v45  ;;  %5301 = vmatpush3.bf16.msra.mxu1 %v6382_v31 }
 0xbae   :  { %5274 = vmatprep.subr.bf16.mxu0 %v6343_v55  ;;  %5302 = vmatprep.subr.bf16.mxu1 %v5798_v40 }
 0xbb1   :  { %5276 = vmatpush1.bf16.msra.mxu0 %v6345_v2  ;;  %5304 = vmatpush3.bf16.msra.mxu1 %v6385_v14 }
 0xbb2   :  { %5278 = vmatprep.subr.bf16.mxu0 %v6349_v13  ;;  %5305 = vmatprep.subr.bf16.mxu1 %v5798_v40 }
 0xbb5   :  { %5280 = vmatpush1.bf16.msra.mxu0 %v6351_v23  ;;  %5307 = vmatpush3.bf16.msra.mxu1 %v6389_v25 }
 0xbb6   :  { %5282 = vmatprep.subr.bf16.mxu0 %v6355_v32  ;;  %5308 = vmatprep.subr.bf16.mxu1 %v5798_v40 }
 0xbb9   :  { %5284 = vmatpush1.bf16.msra.mxu0 %v6357_v19  ;;  %5310 = vmatpush3.bf16.msra.mxu1 %v6393_v41 }
 0xbba   :  { %5286 = vmatprep.subr.bf16.mxu0 %v6360_v30  ;;  %5311 = vmatprep.subr.bf16.mxu1 %v5798_v40 }
 0xbbd   :  { %5288 = vmatpush1.bf16.msra.mxu0 %v6363_v50  ;;  %5313 = vmatpush3.bf16.msra.mxu1 %v6397_v56 }
 0xbbe   :  { %5290 = vmatprep.subr.bf16.mxu0 %v6371_v43  ;;  %5314 = vmatprep.subr.bf16.mxu1 %v5798_v40 }
 0xbc1   :  { %5292 = vmatpush1.bf16.msra.mxu0 %v6373_v58  ;;  %5316 = vmatpush3.bf16.msra.mxu1 %v6401_v10 }
 0xbc2   :  { %5318 = vmatprep.subr.bf16.mxu0 %v6325_v47  ;;  %5349 = vmatprep.subr.bf16.mxu1 %v5798_v40 }
 0xc77   :  { %v2565_v60 = vpop.f32.mrb[22].mxu0  ;;  %v2636_v42 = vpop.f32.mrb[38].mxu1 }
 0xc78   :  { %v5531_v62 = vadd.f32 %v2565_v60, %v6468_v51  ;;  %v2567_v6 = vpop.f32.mrb[23].mxu0  ;;  %v4285_v49 = vpop.f32.mrb[39].mxu1  ;;  %v2654_v17 = vadd.f32 %v2636_v42, %v6476_v63 }
 0xc79   :  { %v5532_v9 = vadd.f32 %v2567_v6, %v6473_v53 }
 0xc7a   :  { %v3430_v54 = vmul.f32 -1.442695, %v5531_v62 }
 0xc7b   :  { %v3431_v1 = vmul.f32 -1.442695, %v5532_v9 }
 0xc7c   :  { %5692 = vpow2.f32 %v3430_v54  ;;  %v1995_v54 = vadd.f32 %v6419_v5, %v6480_v48 }
 0xc7d   :  { %5694 = vpow2.f32 %v3431_v1 }
 0xc86   :  { %v5693_v39 = vpop.eup %5692 }
 0xc87   :  { %v2644_v22 = vadd.f32 1.0, %v5693_v39  ;;  %v5695_v12 = vpop.eup %5694 }
 0xc88   :  { %v2651_v26 = vadd.f32 1.0, %v5695_v12 }
 0xc89   :  { %5696 = vrcp.f32 %v2644_v22 }
 0xc93   :  { %v5697_v59 = vpop.eup %5696 }
 0xc94   :  { %v2655_v37 = vmul.f32 %v5697_v59, %v2654_v17 }
 0xc96   :  { %v2656_v44 = vadd.f32 %v2655_v37, %v1990_v36 }
 0xc98   :  { %5698 = vtanh.f32 %v2656_v44 }
 0xc99   :  { %5700 = vrcp.f32 %v2651_v26 }
 0xca2   :  { %v5699_v27 = vpop.eup %5698 }
 0xca3   :  { %v2658_v61 = vsub.f32 %v6575_v33, %v5699_v27  ;;  %v5701_v4 = vpop.eup %5700 }
 0xca5   :  { %v2659_v15 = vmul.f32 %v5701_v4, %v2658_v61 }
 0xca7   :  { %v6620_v20 = vadd.f32 %v5699_v27, %v2659_v15 }
 0xca9   :  { %2726 = vmatmul.mubr.f32.vlgmr.msra.gmra.mrb[24].mxu0 %v6620_v20  ;;  %4319 = vmatmul.mubr.f32.vlgmr.msra.gmra.mrb[40].mxu1 %v6620_v20 }
 0xcaa   :  { %5320 = vmatpush1.bf16.msra.mxu0 %v6327_v7  ;;  %5351 = vmatpush3.bf16.msra.mxu1 %v6365_v38 }
 0xcab   :  { %5322 = vmatprep.subr.bf16.mxu0 %v6331_v8  ;;  %5352 = vmatprep.subr.bf16.mxu1 %v5798_v40 }
 0xcac   :  { %2887 = vmatprep.mubr.f32.mxu0 %v5797_v0  ;;  %4353 = vmatprep.mubr.msk.f32.mxu1 %vm5799_vm0, %v5797_v0 }
 0xcae   :  { %5324 = vmatpush1.bf16.msra.mxu0 %v6333_v18  ;;  %5354 = vmatpush3.bf16.msra.mxu1 %v6376_v3 }
 0xcaf   :  { %5326 = vmatprep.subr.bf16.mxu0 %v6337_v34  ;;  %5355 = vmatprep.subr.bf16.mxu1 %v5798_v40 }
 0xcb2   :  { %5328 = vmatpush1.bf16.msra.mxu0 %v6339_v45  ;;  %5357 = vmatpush3.bf16.msra.mxu1 %v6382_v31 }
 0xcb3   :  { %5330 = vmatprep.subr.bf16.mxu0 %v6343_v55  ;;  %5358 = vmatprep.subr.bf16.mxu1 %v5798_v40 }
 0xcb6   :  { %5332 = vmatpush1.bf16.msra.mxu0 %v6345_v2  ;;  %5360 = vmatpush3.bf16.msra.mxu1 %v6385_v14 }
 0xcb7   :  { %5334 = vmatprep.subr.bf16.mxu0 %v6349_v13  ;;  %5361 = vmatprep.subr.bf16.mxu1 %v5798_v40 }
 0xcba   :  { %5336 = vmatpush1.bf16.msra.mxu0 %v6351_v23  ;;  %5363 = vmatpush3.bf16.msra.mxu1 %v6389_v25 }
 0xcbb   :  { %5338 = vmatprep.subr.bf16.mxu0 %v6355_v32  ;;  %5364 = vmatprep.subr.bf16.mxu1 %v5798_v40 }
 0xcbe   :  { %5340 = vmatpush1.bf16.msra.mxu0 %v6357_v19  ;;  %5366 = vmatpush3.bf16.msra.mxu1 %v6393_v41 }
 0xcbf   :  { %5342 = vmatprep.subr.bf16.mxu0 %v6360_v30  ;;  %5367 = vmatprep.subr.bf16.mxu1 %v5798_v40 }
 0xcc2   :  { %5344 = vmatpush1.bf16.msra.mxu0 %v6363_v50  ;;  %5369 = vmatpush3.bf16.msra.mxu1 %v6397_v56 }
 0xcc3   :  { %5346 = vmatprep.subr.bf16.mxu0 %v6371_v43  ;;  %5370 = vmatprep.subr.bf16.mxu1 %v5798_v40 }
 0xcc6   :  { %5348 = vmatpush1.bf16.msra.mxu0 %v6373_v58  ;;  %5372 = vmatpush3.bf16.msra.mxu1 %v6401_v10 }
 0xcc7   :  { %5374 = vmatprep.subr.bf16.mxu0 %v6325_v47  ;;  %5405 = vmatprep.subr.bf16.mxu1 %v5798_v40 }
 0xd7c   :  { %v2727_v11 = vpop.f32.mrb[24].mxu0  ;;  %v2798_v24 = vpop.f32.mrb[40].mxu1 }
 0xd7d   :  { %v5533_v29 = vadd.f32 %v2727_v11, %v6468_v51  ;;  %v2729_v16 = vpop.f32.mrb[25].mxu0  ;;  %v4320_v21 = vpop.f32.mrb[41].mxu1  ;;  %v2816_v6 = vadd.f32 %v2798_v24, %v6476_v63 }
 0xd7e   :  { %v5534_v28 = vadd.f32 %v2729_v16, %v6473_v53  ;;  %v2000_v16 = vadd.f32 %v6417_v52, %v6480_v48  ;;  %v3310_v52 = vld [vmem:[#allocation4 + $0x8] sm:$0xff] }
 0xd7f   :  { %v3432_v57 = vmul.f32 -1.442695, %v5533_v29 }
 0xd80   :  { %v3433_v33 = vmul.f32 -1.442695, %v5534_v28 }
 0xd81   :  { %5702 = vpow2.f32 %v3432_v57 }
 0xd82   :  { %5704 = vpow2.f32 %v3433_v33 }
 0xd8b   :  { %v5703_v60 = vpop.eup %5702 }
 0xd8c   :  { %v2806_v42 = vadd.f32 1.0, %v5703_v60  ;;  %v5705_v62 = vpop.eup %5704 }
 0xd8d   :  { %v2813_v39 = vadd.f32 1.0, %v5705_v62 }
 0xd8e   :  { %5706 = vrcp.f32 %v2806_v42 }
 0xd98   :  { %v5707_v49 = vpop.eup %5706 }
 0xd99   :  { %v2817_v9 = vmul.f32 %v5707_v49, %v2816_v6  ;;  %v3311_v49 = vld [vmem:[#allocation4 + $0x10] sm:$0xff] }
 0xd9b   :  { %v2818_v1 = vadd.f32 %v2817_v9, %v1995_v54  ;;  %v3312_v54 = vld [vmem:[#allocation4 + $0x18] sm:$0xff] }
 0xd9c   :  { %v5489_v9 = vpack.c.bf16 %v3312_v54, %v3311_v49 }
 0xd9d   :  { %5708 = vtanh.f32 %v2818_v1  ;;  %v3313_v1 = vld [vmem:[#allocation4 + $0x20] sm:$0xff] }
 0xd9e   :  { %5710 = vrcp.f32 %v2813_v39  ;;  %v3314_v39 = vld [vmem:[#allocation4 + $0x28] sm:$0xff] }
 0xda7   :  { %v5709_v22 = vpop.eup %5708 }
 0xda8   :  { %v2820_v12 = vsub.f32 %v6620_v20, %v5709_v22  ;;  %v5711_v17 = vpop.eup %5710 }
 0xdaa   :  { %v2821_v59 = vmul.f32 %v5711_v17, %v2820_v12  ;;  %v3315_v12 = vld [vmem:[#allocation4 + $0x30] sm:$0xff] }
 0xdac   :  { %v6665_v36 = vadd.f32 %v5709_v22, %v2821_v59  ;;  %v5492_v22 = vpack.c.bf16 %v3314_v39, %v3313_v1  ;;  %v3317_v59 = vld [vmem:[#allocation4 + $0x40] sm:$0xff] }
 0xdae   :  { %2888 = vmatmul.mubr.f32.vlgmr.msra.gmra.mrb[26].mxu0 %v6665_v36  ;;  %4354 = vmatmul.mubr.f32.vlgmr.msra.gmra.mrb[42].mxu1 %v6665_v36 }
 0xdaf   :  { %5376 = vmatpush1.bf16.msra.mxu0 %v6327_v7  ;;  %5407 = vmatpush3.bf16.msra.mxu1 %v6365_v38 }
 0xdb0   :  { %5378 = vmatprep.subr.bf16.mxu0 %v6331_v8  ;;  %5408 = vmatprep.subr.bf16.mxu1 %v5798_v40 }
 0xdb1   :  { %3049 = vmatprep.mubr.f32.mxu0 %v5797_v0  ;;  %4388 = vmatprep.mubr.msk.f32.mxu1 %vm5799_vm0, %v5797_v0 }
 0xdb3   :  { %5380 = vmatpush1.bf16.msra.mxu0 %v6333_v18  ;;  %5410 = vmatpush3.bf16.msra.mxu1 %v6376_v3 }
 0xdb4   :  { %5382 = vmatprep.subr.bf16.mxu0 %v6337_v34  ;;  %5411 = vmatprep.subr.bf16.mxu1 %v5798_v40 }
 0xdb7   :  { %5384 = vmatpush1.bf16.msra.mxu0 %v6339_v45  ;;  %5413 = vmatpush3.bf16.msra.mxu1 %v6382_v31 }
 0xdb8   :  { %5386 = vmatprep.subr.bf16.mxu0 %v6343_v55  ;;  %5414 = vmatprep.subr.bf16.mxu1 %v5798_v40 }
 0xdbb   :  { %5388 = vmatpush1.bf16.msra.mxu0 %v6345_v2  ;;  %5416 = vmatpush3.bf16.msra.mxu1 %v6385_v14 }
 0xdbc   :  { %5390 = vmatprep.subr.bf16.mxu0 %v6349_v13  ;;  %5417 = vmatprep.subr.bf16.mxu1 %v5798_v40 }
 0xdbf   :  { %5392 = vmatpush1.bf16.msra.mxu0 %v6351_v23  ;;  %5419 = vmatpush3.bf16.msra.mxu1 %v6389_v25 }
 0xdc0   :  { %5394 = vmatprep.subr.bf16.mxu0 %v6355_v32  ;;  %5420 = vmatprep.subr.bf16.mxu1 %v5798_v40 }
 0xdc3   :  { %5396 = vmatpush1.bf16.msra.mxu0 %v6357_v19  ;;  %5422 = vmatpush3.bf16.msra.mxu1 %v6393_v41 }
 0xdc4   :  { %5398 = vmatprep.subr.bf16.mxu0 %v6360_v30  ;;  %5423 = vmatprep.subr.bf16.mxu1 %v5798_v40 }
 0xdc7   :  { %5400 = vmatpush1.bf16.msra.mxu0 %v6363_v50  ;;  %5425 = vmatpush3.bf16.msra.mxu1 %v6397_v56 }
 0xdc8   :  { %5402 = vmatprep.subr.bf16.mxu0 %v6371_v43  ;;  %5426 = vmatprep.subr.bf16.mxu1 %v5798_v40 }
 0xdcb   :  { %5404 = vmatpush1.bf16.msra.mxu0 %v6373_v58  ;;  %5428 = vmatpush3.bf16.msra.mxu1 %v6401_v10 }
 0xdcc   :  { %5430 = vmatprep.subr.bf16.mxu0 %v6325_v47  ;;  %5461 = vmatprep.subr.bf16.mxu1 %v5798_v40 }
 0xe81   :  { %v2889_v5 = vpop.f32.mrb[26].mxu0  ;;  %v2960_v37 = vpop.f32.mrb[42].mxu1 }
 0xe82   :  { %v5535_v44 = vadd.f32 %v2889_v5, %v6468_v51  ;;  %v2891_v26 = vpop.f32.mrb[27].mxu0  ;;  %v4355_v27 = vpop.f32.mrb[43].mxu1  ;;  %v2978_v47 = vadd.f32 %v2960_v37, %v6476_v63  ;;  %v3319_v5 = vld [vmem:[#allocation4 + $0x50] sm:$0xff] }
 0xe83   :  { %v5536_v4 = vadd.f32 %v2891_v26, %v6473_v53  ;;  %v3321_v27 = vld [vmem:[#allocation4 + $0x60] sm:$0xff] }
 0xe84   :  { %v3434_v61 = vmul.f32 -1.442695, %v5535_v44  ;;  %v3320_v44 = vld [vmem:[#allocation4 + $0x58] sm:$0xff] }
 0xe85   :  { %v3435_v15 = vmul.f32 -1.442695, %v5536_v4  ;;  %v5501_v26 = vpack.c.bf16 %v3320_v44, %v3319_v5 }
 0xe86   :  { %5712 = vpow2.f32 %v3434_v61  ;;  %v3322_v61 = vld [vmem:[#allocation4 + $0x68] sm:$0xff] }
 0xe87   :  { %5714 = vpow2.f32 %v3435_v15  ;;  %v5504_v4 = vpack.c.bf16 %v3322_v61, %v3321_v27  ;;  %v3323_v15 = vld [vmem:[#allocation4 + $0x70] sm:$0xff] }
 0xe90   :  { %v5713_v20 = vpop.eup %5712 }
 0xe91   :  { %v2968_v11 = vadd.f32 1.0, %v5713_v20  ;;  %v5715_v24 = vpop.eup %5714  ;;  %v3324_v20 = vld [vmem:[#allocation4 + $0x78] sm:$0xff] }
 0xe92   :  { %v2975_v28 = vadd.f32 1.0, %v5715_v24 }
 0xe93   :  { %5716 = vrcp.f32 %v2968_v11  ;;  %v5507_v11 = vpack.c.bf16 %v3324_v20, %v3323_v15 }
 0xe9d   :  { %v5717_v29 = vpop.eup %5716 }
 0xe9e   :  { %v2979_v21 = vmul.f32 %v5717_v29, %v2978_v47 }
 0xea0   :  { %v2980_v57 = vadd.f32 %v2979_v21, %v2000_v16 }
 0xea2   :  { %5718 = vtanh.f32 %v2980_v57 }
 0xea3   :  { %5720 = vrcp.f32 %v2975_v28 }
 0xeac   :  { %v5719_v33 = vpop.eup %5718 }
 0xead   :  { %v2982_v60 = vsub.f32 %v6665_v36, %v5719_v33  ;;  %v5721_v42 = vpop.eup %5720  ;;  %v3318_v36 = vld [vmem:[#allocation4 + $0x48] sm:$0xff] }
 0xeae   :  { %v5498_v37 = vpack.c.bf16 %v3318_v36, %v3317_v59 }
 0xeaf   :  { %v2983_v62 = vmul.f32 %v5721_v42, %v2982_v60 }
 0xeb1   :  { %v2984_v6 = vadd.f32 %v5719_v33, %v2983_v62 }
 0xeb3   :  { %3050 = vmatmul.mubr.f32.vlgmr.msra.gmra.mrb[28].mxu0 %v2984_v6  ;;  %4389 = vmatmul.mubr.f32.vlgmr.msra.gmra.mrb[44].mxu1 %v2984_v6 }
 0xeb4   :  { %5432 = vmatpush1.bf16.msra.mxu0 %v6327_v7  ;;  %5463 = vmatpush3.bf16.msra.mxu1 %v6365_v38  ;;  %v2005_v38 = vadd.f32 %v6464_v46, %v6480_v48 }
 0xeb5   :  { %5434 = vmatprep.subr.bf16.mxu0 %v6331_v8  ;;  %5464 = vmatprep.subr.bf16.mxu1 %v5798_v40 }
 0xeb6   :  { %3211 = vmatprep.mubr.f32.mxu0 %v5797_v0  ;;  %4423 = vmatprep.mubr.msk.f32.mxu1 %vm5799_vm0, %v5797_v0 }
 0xeb8   :  { %5436 = vmatpush1.bf16.msra.mxu0 %v6333_v18  ;;  %5466 = vmatpush3.bf16.msra.mxu1 %v6376_v3 }
 0xeb9   :  { %5438 = vmatprep.subr.bf16.mxu0 %v6337_v34  ;;  %5467 = vmatprep.subr.bf16.mxu1 %v5798_v40 }
 0xebc   :  { %5440 = vmatpush1.bf16.msra.mxu0 %v6339_v45  ;;  %5469 = vmatpush3.bf16.msra.mxu1 %v6382_v31 }
 0xebd   :  { %5442 = vmatprep.subr.bf16.mxu0 %v6343_v55  ;;  %5470 = vmatprep.subr.bf16.mxu1 %v5798_v40 }
 0xec0   :  { %5444 = vmatpush1.bf16.msra.mxu0 %v6345_v2  ;;  %5472 = vmatpush3.bf16.msra.mxu1 %v6385_v14 }
 0xec1   :  { %5446 = vmatprep.subr.bf16.mxu0 %v6349_v13  ;;  %5473 = vmatprep.subr.bf16.mxu1 %v5798_v40 }
 0xec4   :  { %5448 = vmatpush1.bf16.msra.mxu0 %v6351_v23  ;;  %5475 = vmatpush3.bf16.msra.mxu1 %v6389_v25 }
 0xec5   :  { %5450 = vmatprep.subr.bf16.mxu0 %v6355_v32  ;;  %5476 = vmatprep.subr.bf16.mxu1 %v5798_v40 }
 0xec8   :  { %5452 = vmatpush1.bf16.msra.mxu0 %v6357_v19  ;;  %5478 = vmatpush3.bf16.msra.mxu1 %v6393_v41 }
 0xec9   :  { %5454 = vmatprep.subr.bf16.mxu0 %v6360_v30  ;;  %5479 = vmatprep.subr.bf16.mxu1 %v5798_v40 }
 0xecc   :  { %5456 = vmatpush1.bf16.msra.mxu0 %v6363_v50  ;;  %5481 = vmatpush3.bf16.msra.mxu1 %v6397_v56 }
 0xecd   :  { %5458 = vmatprep.subr.bf16.mxu0 %v6371_v43  ;;  %5482 = vmatprep.subr.bf16.mxu1 %v5798_v40 }
 0xed0   :  { %5460 = vmatpush1.bf16.msra.mxu0 %v6373_v58  ;;  %5484 = vmatpush3.bf16.msra.mxu1 %v6401_v10  ;;  %v3309_v10 = vld [vmem:[#allocation4] sm:$0xff] }
 0xed1   :  { %5485 = vmatprep.subr.bf16.mxu0 %v5798_v40  ;;  %v5486_v46 = vpack.c.bf16 %v3310_v52, %v3309_v10 }
 0xf86   :  { %v3051_v7 = vpop.f32.mrb[28].mxu0  ;;  %v3122_v8 = vpop.f32.mrb[44].mxu1 }
 0xf87   :  { %v5537_v18 = vadd.f32 %v3051_v7, %v6468_v51  ;;  %v3053_v34 = vpop.f32.mrb[29].mxu0  ;;  %v4390_v45 = vpop.f32.mrb[45].mxu1  ;;  %v3140_v30 = vadd.f32 %v3122_v8, %v6476_v63  ;;  %v2010_v7 = vadd.f32 %v6462_v35, %v6480_v48 }
 0xf88   :  { %v5538_v2 = vadd.f32 %v3053_v34, %v6473_v53 }
 0xf89   :  { %v3436_v55 = vmul.f32 -1.442695, %v5537_v18 }
 0xf8a   :  { %v3437_v13 = vmul.f32 -1.442695, %v5538_v2 }
 0xf8b   :  { %5722 = vpow2.f32 %v3436_v55 }
 0xf8c   :  { %5724 = vpow2.f32 %v3437_v13  ;;  %v3440_v13 = vld [vmem:[#allocation4 + $0x80] ss:$0 sm:$0xff] }
 0xf95   :  { %v5723_v23 = vpop.eup %5722 }
 0xf96   :  { %v3130_v32 = vadd.f32 1.0, %v5723_v23  ;;  %v5725_v19 = vpop.eup %5724 }
 0xf97   :  { %v3137_v3 = vadd.f32 1.0, %v5725_v19 }
 0xf98   :  { %5726 = vrcp.f32 %v3130_v32 }
 0xfa2   :  { %v5727_v50 = vpop.eup %5726 }
 0xfa3   :  { %v3141_v43 = vmul.f32 %v5727_v50, %v3140_v30 }
 0xfa5   :  { %v3142_v58 = vadd.f32 %v3141_v43, %v2005_v38 }
 0xfa7   :  { %5728 = vtanh.f32 %v3142_v58 }
 0xfa8   :  { %5730 = vrcp.f32 %v3137_v3 }
 0xfb1   :  { %v5729_v31 = vpop.eup %5728 }
 0xfb2   :  { %v3144_v14 = vsub.f32 %v2984_v6, %v5729_v31  ;;  %v5731_v25 = vpop.eup %5730 }
 0xfb4   :  { %v3145_v41 = vmul.f32 %v5731_v25, %v3144_v14 }
 0xfb6   :  { %v6749_v56 = vadd.f32 %v5729_v31, %v3145_v41 }
 0xfb8   :  { %3212 = vmatmul.mubr.f32.vlgmr.msra.gmra.mrb[30].mxu0 %v6749_v56  ;;  %4424 = vmatmul.mubr.f32.vlgmr.msra.gmra.mrb[46].mxu1 %v6749_v56 }
 0xfb9   :  { %4458 = vmatprep.mubr.msk.f32.mxu0 %vm5799_vm0, %v5797_v0  ;;  %5487 = vmatpush3.bf16.msra.mxu0 %v5486_v46  ;;  %v3316_v0 = vld [vmem:[#allocation4 + $0x38] sm:$0xff] }
 0xfba   :  { %5488 = vmatprep.subr.bf16.mxu0 %v5798_v40  ;;  %v5495_v17 = vpack.c.bf16 %v3316_v0, %v3315_v12 }
 0xfbd   :  { %5490 = vmatpush3.bf16.msra.mxu0 %v5489_v9 }
 0xfbe   :  { %5491 = vmatprep.subr.bf16.mxu0 %v5798_v40 }
 0xfc1   :  { %5493 = vmatpush3.bf16.msra.mxu0 %v5492_v22 }
 0xfc2   :  { %5494 = vmatprep.subr.bf16.mxu0 %v5798_v40 }
 0xfc5   :  { %5496 = vmatpush3.bf16.msra.mxu0 %v5495_v17 }
 0xfc6   :  { %5497 = vmatprep.subr.bf16.mxu0 %v5798_v40 }
 0xfc9   :  { %5499 = vmatpush3.bf16.msra.mxu0 %v5498_v37 }
 0xfca   :  { %5500 = vmatprep.subr.bf16.mxu0 %v5798_v40 }
 0xfcd   :  { %5502 = vmatpush3.bf16.msra.mxu0 %v5501_v26 }
 0xfce   :  { %5503 = vmatprep.subr.bf16.mxu0 %v5798_v40 }
 0xfd1   :  { %5505 = vmatpush3.bf16.msra.mxu0 %v5504_v4 }
 0xfd2   :  { %5506 = vmatprep.subr.bf16.mxu0 %v5798_v40 }
 0xfd5   :  { %5508 = vmatpush3.bf16.msra.mxu0 %v5507_v11 }
0x108b   :  { %v3213_v24 = vpop.f32.mrb[30].mxu0  ;;  %v3284_v47 = vpop.f32.mrb[46].mxu1 }
0x108c   :  { %v5539_v29 = vadd.f32 %v3213_v24, %v6468_v51  ;;  %v3215_v16 = vpop.f32.mrb[31].mxu0  ;;  %v4425_v21 = vpop.f32.mrb[47].mxu1  ;;  %v3302_v6 = vadd.f32 %v3284_v47, %v6476_v63 }
0x108d   :  { %v5540_v28 = vadd.f32 %v3215_v16, %v6473_v53 }
0x108e   :  { %v3438_v57 = vmul.f32 -1.442695, %v5539_v29 }
0x108f   :  { %v3439_v33 = vmul.f32 -1.442695, %v5540_v28 }
0x1090   :  { %5732 = vpow2.f32 %v3438_v57 }
0x1091   :  { %5734 = vpow2.f32 %v3439_v33 }
0x109a   :  { %v5733_v60 = vpop.eup %5732 }
0x109b   :  { %v3292_v42 = vadd.f32 1.0, %v5733_v60  ;;  %v5735_v62 = vpop.eup %5734 }
0x109c   :  { %v3299_v18 = vadd.f32 1.0, %v5735_v62 }
0x109d   :  { %5736 = vrcp.f32 %v3292_v42 }
0x10a7   :  { %v5737_v40 = vpop.eup %5736 }
0x10a8   :  { %v3303_v8 = vmul.f32 %v5737_v40, %v3302_v6 }
0x10aa   :  { %v3304_v51 = vadd.f32 %v3303_v8, %v2010_v7 }
0x10ac   :  { %5738 = vtanh.f32 %v3304_v51 }
0x10ad   :  { %5740 = vrcp.f32 %v3299_v18 }
0x10b6   :  { %v5739_v34 = vpop.eup %5738 }
0x10b7   :  { %v3306_v53 = vsub.f32 %v6749_v56, %v5739_v34  ;;  %v5741_v45 = vpop.eup %5740 }
0x10b9   :  { %v3307_v55 = vmul.f32 %v5741_v45, %v3306_v53 }
0x10bb   :  { %v3308_v2 = vadd.f32 %v5739_v34, %v3307_v55 }
0x10bd   :  { %4459 = vmatmul.mubr.f32.vlgmr.msra.gmra.mrb[32].mxu0 %v3308_v2 }
0x1190   :  { %v3396_v23 = vpop.f32.mrb[32].mxu0 }
0x1191   :  { %v3397_v32 = vadd.f32 %v3440_v13, %v3396_v23  ;;  %v4460_v63 = vpop.f32.mrb[33].mxu0 }
0x1193   :  { %3400 = vst [vmem:[%s6774_s3] sm:$0xff] %v3397_v32 }
0x1194   :  { %3405 = vsyncpa [#allocation3], 1 }
0x1195   :  { %3406 = vsyncpa [#allocation5], 1 }

</bundles_post_ra>
